<compile_context>
chip_gen: v6e
topology: v6e:2x2x1
jax: 0.10.0
libtpu: 0.0.40
codegen_flags: <defaults>
</compile_context>

<pallas_src>
import functools
import math

import jax
import jax.numpy as jnp
from jax.experimental import pallas as pl
from jax.experimental.pallas import tpu as pltpu


_ACTIVATIONS = {
    "relu": lambda x: jnp.maximum(x, 0.0),
    "gelu": lambda x: jax.nn.gelu(x, approximate=False),
    "tanh": jnp.tanh,
    "sigmoid": jax.nn.sigmoid,
}


def _round_up(x, m):
    return ((x + m - 1) // m) * m


def _layer_norm(x, w, b, d_true, eps=1e-5):
    """LayerNorm over the last dim.  Lanes >= d_true are zero padding; w/b are
    zero there, so padded lanes of the output stay exactly zero."""
    d_pad = x.shape[-1]
    inv_d = 1.0 / d_true
    mean = jnp.sum(x, axis=-1, keepdims=True) * inv_d
    xc = x - mean
    if d_pad != d_true:
        lane = jax.lax.broadcasted_iota(jnp.int32, (1, d_pad), 1)
        xc = jnp.where(lane < d_true, xc, 0.0)
    var = jnp.sum(xc * xc, axis=-1, keepdims=True) * inv_d
    return xc * jax.lax.rsqrt(var + eps) * w + b


def encoder_layer_kernel(num_heads, head_dim_padded, d_true, num_ffn_layers,
                         activation_fn, kv_chunk, *refs):
    (x_ref, wqkv_ref, bqkv_ref, wo_ref, bo_ref,
     ln1w_ref, ln1b_ref, ln2w_ref, ln2b_ref) = refs[:9]
    ffn_refs = refs[9:9 + 2 * num_ffn_layers]
    o_ref = refs[9 + 2 * num_ffn_layers]

    Bb, S, Dp = x_ref.shape
    H = num_heads
    hp = head_dim_padded
    G = Bb * H                     # leading batch dim for attention matmuls
    R = Bb * S                     # matmul M (rows) for projections / FFN

    act = _ACTIVATIONS[activation_fn]
    bf16 = jnp.bfloat16
    f32 = jnp.float32

    # Rows ordered (b, s); all row-wise ops run on the flattened (R, Dp) slab.
    x = x_ref[...].astype(f32).reshape(R, Dp)

    # --- fused QKV projection (softmax scale pre-folded into Wq/bq) ---------
    qkv = jnp.dot(x.astype(bf16), wqkv_ref[...],
                  preferred_element_type=f32) + bqkv_ref[...]          # (R, 3*Dp)

    # Head split: head slots are hp lanes wide (host-side column layout).
    # TODO(synk): the concat-based split/merge could become a single retile
    # (einshape) once hd is padded to a full 128-lane slot.
    def split_heads(col0):
        rows = jnp.concatenate(
            [qkv[:, col0 + h * hp: col0 + (h + 1) * hp] for h in range(H)],
            axis=0)                                                    # (G*S, hp)
        return rows.reshape(G, S, hp).astype(bf16)                     # g = h*Bb + b

    q = split_heads(0)
    k = split_heads(Dp)
    v = split_heads(2 * Dp)

    # --- attention ----------------------------------------------------------
    n_kv = max(1, -(-S // kv_chunk))
    if n_kv == 1:
        s = jnp.einsum("gqd,gkd->gqk", q, k, preferred_element_type=f32)
        s = s - jnp.max(s, axis=-1, keepdims=True)
        p = jnp.exp(s)
        p = p * pl.reciprocal(jnp.sum(p, axis=-1, keepdims=True), approx=True)
        ctx = jnp.einsum("gqk,gkd->gqd", p.astype(bf16), v,
                         preferred_element_type=f32)                   # (G, S, hp)
    else:
        # Flash-style online softmax over KV chunks: the live score tensor is
        # (G, S, kv_chunk) instead of (G, S, S).
        m = jnp.full((G, S, 1), -jnp.inf, f32)
        l = jnp.zeros((G, S, 1), f32)
        acc = jnp.zeros((G, S, hp), f32)
        for c in range(n_kv):
            lo = c * kv_chunk
            hi = min(S, lo + kv_chunk)
            kc = k[:, lo:hi, :]
            vc = v[:, lo:hi, :]
            s = jnp.einsum("gqd,gkd->gqk", q, kc, preferred_element_type=f32)
            m_new = jnp.maximum(m, jnp.max(s, axis=-1, keepdims=True))
            alpha = jnp.exp(m - m_new)
            p = jnp.exp(s - m_new)
            l = alpha * l + jnp.sum(p, axis=-1, keepdims=True)
            acc = alpha * acc + jnp.einsum("gqk,gkd->gqd", p.astype(bf16), vc,
                                           preferred_element_type=f32)
            m = m_new
        ctx = acc * pl.reciprocal(l, approx=True)

    # Merge heads back: head h -> columns [h*hp, (h+1)*hp) of the (R, Dp) slab.
    ctx_rows = ctx.reshape(G * S, hp)
    ctx2d = jnp.concatenate(
        [ctx_rows[h * R:(h + 1) * R, :] for h in range(H)], axis=1)    # (R, Dp)

    attn = jnp.dot(ctx2d.astype(bf16), wo_ref[...],
                   preferred_element_type=f32) + bo_ref[...]

    y1 = _layer_norm(x + attn, ln1w_ref[...], ln1b_ref[...], d_true)

    # --- FeedForwardNN: [Linear -> act]* -> Linear --------------------------
    hid = y1
    for i in range(num_ffn_layers):
        w_ref, b_ref = ffn_refs[2 * i], ffn_refs[2 * i + 1]
        hid = jnp.dot(hid.astype(bf16), w_ref[...],
                      preferred_element_type=f32) + b_ref[...]
        if i + 1 < num_ffn_layers:
            hid = act(hid)

    y2 = _layer_norm(y1 + hid, ln2w_ref[...], ln2b_ref[...], d_true)
    o_ref[...] = y2.reshape(Bb, S, Dp).astype(o_ref.dtype)


def _prepare_padded_params(p, D, H, D_pad, hd_pad):
    """Zero-pad + relayout parameters to lane-dense shapes; fold the softmax
    scale into the Q columns of the fused QKV projection."""
    hd = D // H
    scale = 1.0 / math.sqrt(hd)
    f32, bf16 = jnp.float32, jnp.bfloat16

    def head_cols(w, do_scale):
        w = w.astype(f32) * (scale if do_scale else 1.0)
        w3 = w.reshape(D, H, hd)
        w3 = jnp.pad(w3, ((0, D_pad - D), (0, 0), (0, hd_pad - hd)))
        return w3.reshape(D_pad, H * hd_pad)

    def head_cols_bias(b, do_scale):
        b = b.astype(f32) * (scale if do_scale else 1.0)
        b3 = b.reshape(1, H, hd)
        b3 = jnp.pad(b3, ((0, 0), (0, 0), (0, hd_pad - hd)))
        return b3.reshape(1, H * hd_pad)

    wq, wk, wv = (p["wqkv"][:, i * D:(i + 1) * D] for i in range(3))
    bq, bk, bv = (p["bqkv"][:, i * D:(i + 1) * D] for i in range(3))
    wqkv_pad = jnp.concatenate(
        [head_cols(wq, True), head_cols(wk, False), head_cols(wv, False)],
        axis=1).astype(bf16)
    bqkv_pad = jnp.concatenate(
        [head_cols_bias(bq, True), head_cols_bias(bk, False),
         head_cols_bias(bv, False)], axis=1)

    wo3 = p["wo"].astype(f32).reshape(H, hd, D)
    wo_pad = jnp.pad(wo3, ((0, 0), (0, hd_pad - hd),
                           (0, D_pad - D))).reshape(H * hd_pad, D_pad).astype(bf16)
    bo_pad = jnp.pad(p["bo"].astype(f32), ((0, 0), (0, D_pad - D)))

    def pad_vec(v):
        return jnp.pad(v.astype(f32), ((0, 0), (0, D_pad - D)))

    hidden_outs = [w.shape[1] for w, _ in p["ffn"][:-1]]
    pdims = [D_pad] + [_round_up(d, 128) for d in hidden_outs] + [D_pad]
    ffn_pad = []
    for i, (w, b) in enumerate(p["ffn"]):
        fin, fout = w.shape
        pin, pout = pdims[i], pdims[i + 1]
        w_p = jnp.pad(w.astype(f32), ((0, pin - fin), (0, pout - fout))).astype(bf16)
        b_p = jnp.pad(b.astype(f32), ((0, 0), (0, pout - fout)))
        ffn_pad.append((w_p, b_p))

    pp = {
        "wqkv": wqkv_pad, "bqkv": bqkv_pad, "wo": wo_pad, "bo": bo_pad,
        "ln1w": pad_vec(p["ln1w"]), "ln1b": pad_vec(p["ln1b"]),
        "ln2w": pad_vec(p["ln2w"]), "ln2b": pad_vec(p["ln2b"]),
        "ffn": ffn_pad,
    }
    return pp, pdims


def _estimate_vmem(Bb, S, D_pad, H, kv_chunk, f_max, weight_bytes, weight_buffers):
    """Rough per-grid-step VMEM working-set estimate (bytes)."""
    R = Bb * S
    s_k = min(S, kv_chunk)
    act = (R * D_pad * 4 * 6            # f32 row slabs (x, residuals, ctx, attn, y1, y2)
           + R * 3 * D_pad * (4 + 2)    # qkv f32 + q/k/v bf16
           + Bb * H * S * s_k * 6       # live scores f32 + bf16 probs
           + R * f_max * 6              # FFN hidden f32 + bf16 cast
           + 2 * Bb * S * D_pad * 4 * 2)  # double-buffered x / out blocks
    return weight_bytes * weight_buffers + act


def _pick_block_b(B, S, D_pad, H, kv_chunk, f_max, weight_bytes, budget):
    divisors = [d for d in range(1, B + 1) if B % d == 0]

    def fits(bb):
        return _estimate_vmem(bb, S, D_pad, H, kv_chunk, f_max,
                              weight_bytes, 2) <= budget

    fitting = [d for d in divisors if fits(d)] or [1]
    # Keep >= 2 grid points when possible so the "parallel" batch axis can
    # shard across the two TensorCores on v7x; otherwise take the largest block.
    multi = [d for d in fitting if B // d >= 2]
    return max(multi) if multi else max(fitting)


def transformer_encoder_layer(x_sbd, params, num_heads, *, block_b=None,
                              activation_fn="relu", kv_chunk=512,
                              vmem_budget_bytes=28 << 20, vmem_limit_bytes=None,
                              out_dtype=None, single_buffer_weights=True):
    """x_sbd: (S, B, D) seq-first, like the PyTorch module.  Returns (S, B, D)."""
    S, B, D = x_sbd.shape
    H = num_heads
    assert D % H == 0

    # D_pad is a multiple of 128 (lane width) and of H so head slots are uniform.
    lane_lcm = (128 * H) // math.gcd(128, H)
    D_pad = _round_up(D, lane_lcm)
    hd_pad = D_pad // H

    pp, pdims = _prepare_padded_params(params, D, H, D_pad, hd_pad)
    weight_args = [pp["wqkv"], pp["bqkv"], pp["wo"], pp["bo"],
                   pp["ln1w"], pp["ln1b"], pp["ln2w"], pp["ln2b"]]
    for w, b in pp["ffn"]:
        weight_args += [w, b]
    weight_bytes = sum(int(a.size) * a.dtype.itemsize for a in weight_args)
    f_max = max(pdims)

    if block_b is None:
        Bb = _pick_block_b(B, S, D_pad, H, kv_chunk, f_max, weight_bytes,
                           vmem_budget_bytes)
    else:
        Bb = max(1, min(block_b, B))
        while B % Bb:
            Bb -= 1

    # Batch-first relayout + feature padding in ONE XLA copy (they fuse); the
    # kernel then sees lane-dense (Bb*S, D_pad) row slabs with no in-kernel
    # major-dim transposes.  Weights never move per grid step.
    x_b = jnp.pad(jnp.transpose(x_sbd, (1, 0, 2)),
                  ((0, 0), (0, 0), (0, D_pad - D)))

    if vmem_limit_bytes is None:
        est = _estimate_vmem(Bb, S, D_pad, H, kv_chunk, f_max, weight_bytes,
                             1 if single_buffer_weights else 2)
        vmem_limit_bytes = int(min(64 << 20, max(32 << 20, int(1.5 * est))))

    out_dtype = out_dtype or x_sbd.dtype
    num_ffn_layers = len(pp["ffn"])
    kernel = functools.partial(encoder_layer_kernel, H, hd_pad, D,
                               num_ffn_layers, activation_fn, kv_chunk)

    grid = (B // Bb,)
    x_spec = pl.BlockSpec((Bb, S, D_pad), lambda b: (b, 0, 0))
    out_spec = pl.BlockSpec((Bb, S, D_pad), lambda b: (b, 0, 0))

    def run(single_buffer):
        w_specs = []
        for a in weight_args:
            if single_buffer:
                # Grid-invariant weights: one VMEM buffer instead of two.
                w_specs.append(pl.BlockSpec(a.shape, lambda b: (0, 0),
                                            pipeline_mode=pl.Buffered(1)))
            else:
                w_specs.append(pl.BlockSpec(a.shape, lambda b: (0, 0)))
        return pl.pallas_call(
            kernel,
            out_shape=jax.ShapeDtypeStruct((B, S, D_pad), out_dtype),
            grid=grid,
            in_specs=[x_spec] + w_specs,
            out_specs=out_spec,
            compiler_params=pltpu.CompilerParams(
                dimension_semantics=("parallel",),
                vmem_limit_bytes=vmem_limit_bytes),
        )(x_b, *weight_args)

    if single_buffer_weights:
        try:
            out = run(True)
        except Exception:   # graceful fallback if single-buffering is rejected
            out = run(False)
    else:
        out = run(False)

    return jnp.transpose(out[:, :, :D], (1, 0, 2))      # back to (S, B, D)


def reference_forward(x_sbd, p, num_heads, activation_fn="relu"):
    """Pure-JAX f32 reference with identical math (eval mode, unpadded)."""
    x = jnp.transpose(x_sbd, (1, 0, 2)).astype(jnp.float32)  # (B, S, D)
    B, S, D = x.shape
    hd = D // num_heads

    qkv = x @ p["wqkv"] + p["bqkv"][0]
    q = qkv[..., :D].reshape(B, S, num_heads, hd)
    k = qkv[..., D:2 * D].reshape(B, S, num_heads, hd)
    v = qkv[..., 2 * D:].reshape(B, S, num_heads, hd)
    s = jnp.einsum("bqhd,bkhd->bhqk", q, k) / jnp.sqrt(hd)
    a = jax.nn.softmax(s, axis=-1)
    ctx = jnp.einsum("bhqk,bkhd->bqhd", a, v).reshape(B, S, D)
    attn = ctx @ p["wo"] + p["bo"][0]

    def ln(y, w, b):
        m = y.mean(-1, keepdims=True)
        var = ((y - m) ** 2).mean(-1, keepdims=True)
        return (y - m) / jnp.sqrt(var + 1e-5) * w[0] + b[0]

    act = _ACTIVATIONS[activation_fn]
    y1 = ln(x + attn, p["ln1w"], p["ln1b"])
    h = y1
    n = len(p["ffn"])
    for i, (w, b) in enumerate(p["ffn"]):
        h = h @ w + b[0]
        if i + 1 < n:
            h = act(h)
    y2 = ln(y1 + h, p["ln2w"], p["ln2b"])
    return jnp.transpose(y2, (1, 0, 2))


def make_params(key, dim_model, hidden_dims):
    dims = [dim_model] + list(hidden_dims) + [dim_model]
    n_ffn = len(dims) - 1
    ks = jax.random.split(key, 4 + 2 * n_ffn)
    f32 = jnp.float32
    rnd = lambda k, shp: 0.1 * jax.random.normal(k, shp, dtype=f32)
    p = {
        "wqkv": rnd(ks[0], (dim_model, 3 * dim_model)),
        "bqkv": rnd(ks[1], (1, 3 * dim_model)),
        "wo": rnd(ks[2], (dim_model, dim_model)),
        "bo": rnd(ks[3], (1, dim_model)),
        "ln1w": jnp.ones((1, dim_model), f32), "ln1b": jnp.zeros((1, dim_model), f32),
        "ln2w": jnp.ones((1, dim_model), f32), "ln2b": jnp.zeros((1, dim_model), f32),
    }
    ffn = []
    for i in range(n_ffn):
        ffn.append((rnd(ks[4 + 2 * i], (dims[i], dims[i + 1])),
                    rnd(ks[5 + 2 * i], (1, dims[i + 1]))))
    p["ffn"] = ffn
    return p


if __name__ == "__main__":
    SEQ, BATCH, DIM, HEADS = 8, 4, 32, 4
    HIDDEN_DIMS = (64,)

    key = jax.random.PRNGKey(0)
    k_x, k_p = jax.random.split(key)
    x = jax.random.normal(k_x, (SEQ, BATCH, DIM), dtype=jnp.float32)  # (S, B, D)
    params = make_params(k_p, DIM, HIDDEN_DIMS)

    ref = reference_forward(x, params, HEADS)

    out = transformer_encoder_layer(x, params, HEADS)
    out = jax.block_until_ready(out)
    assert out.shape == (SEQ, BATCH, DIM)
    max_diff = float(jnp.max(jnp.abs(out - ref)))
    # bf16 matmul inputs + approx reciprocal -> relaxed tolerance vs f32 reference.
    assert jnp.allclose(out, ref, atol=5e-2, rtol=5e-2), f"max abs diff {max_diff}"

    # Also validate the flash-style KV-chunked attention path (kv_chunk < S).
    out2 = jax.block_until_ready(
        transformer_encoder_layer(x, params, HEADS, kv_chunk=4))
    max_diff2 = float(jnp.max(jnp.abs(out2 - ref)))
    assert jnp.allclose(out2, ref, atol=5e-2, rtol=5e-2), f"max abs diff {max_diff2}"

    print("KERNEL_OK")
</pallas_src>

<mosaic_0001>
module attributes {stable_mosaic.version = 11 : i64} {
  func.func @encoder_layer_kernel(%arg0: i32, %arg1: memref<2x8x128xf32, #tpu.memory_space<vmem>>, %arg2: memref<128x384xbf16, #tpu.memory_space<vmem>>, %arg3: memref<1x384xf32, #tpu.memory_space<vmem>>, %arg4: memref<128x128xbf16, #tpu.memory_space<vmem>>, %arg5: memref<1x128xf32, #tpu.memory_space<vmem>>, %arg6: memref<1x128xf32, #tpu.memory_space<vmem>>, %arg7: memref<1x128xf32, #tpu.memory_space<vmem>>, %arg8: memref<1x128xf32, #tpu.memory_space<vmem>>, %arg9: memref<1x128xf32, #tpu.memory_space<vmem>>, %arg10: memref<128x128xbf16, #tpu.memory_space<vmem>>, %arg11: memref<1x128xf32, #tpu.memory_space<vmem>>, %arg12: memref<128x128xbf16, #tpu.memory_space<vmem>>, %arg13: memref<1x128xf32, #tpu.memory_space<vmem>>, %arg14: memref<2x8x128xf32, #tpu.memory_space<vmem>>) attributes {dimension_semantics = [#tpu.dimension_semantics<parallel>], iteration_bounds = array<i64: 2>, scalar_prefetch = 0 : i64, scratch_operands = 0 : i64, tpu.core_type = #tpu.core_type<tc>, window_params = [{transform_indices = @transform_0, window_bounds = array<i64: 2, 8, 128>}, {pipeline_mode = #tpu.pipeline_mode<synchronous>, transform_indices = @transform_1, window_bounds = array<i64: 128, 384>}, {pipeline_mode = #tpu.pipeline_mode<synchronous>, transform_indices = @transform_2, window_bounds = array<i64: 1, 384>}, {pipeline_mode = #tpu.pipeline_mode<synchronous>, transform_indices = @transform_3, window_bounds = array<i64: 128, 128>}, {pipeline_mode = #tpu.pipeline_mode<synchronous>, transform_indices = @transform_4, window_bounds = array<i64: 1, 128>}, {pipeline_mode = #tpu.pipeline_mode<synchronous>, transform_indices = @transform_5, window_bounds = array<i64: 1, 128>}, {pipeline_mode = #tpu.pipeline_mode<synchronous>, transform_indices = @transform_6, window_bounds = array<i64: 1, 128>}, {pipeline_mode = #tpu.pipeline_mode<synchronous>, transform_indices = @transform_7, window_bounds = array<i64: 1, 128>}, {pipeline_mode = #tpu.pipeline_mode<synchronous>, transform_indices = @transform_8, window_bounds = array<i64: 1, 128>}, {pipeline_mode = #tpu.pipeline_mode<synchronous>, transform_indices = @transform_9, window_bounds = array<i64: 128, 128>}, {pipeline_mode = #tpu.pipeline_mode<synchronous>, transform_indices = @transform_10, window_bounds = array<i64: 1, 128>}, {pipeline_mode = #tpu.pipeline_mode<synchronous>, transform_indices = @transform_11, window_bounds = array<i64: 128, 128>}, {pipeline_mode = #tpu.pipeline_mode<synchronous>, transform_indices = @transform_12, window_bounds = array<i64: 1, 128>}, {transform_indices = @transform_13, window_bounds = array<i64: 2, 8, 128>}]} {
    %c0 = arith.constant 0 : index
    %c0_0 = arith.constant 0 : index
    %c0_1 = arith.constant 0 : index
    %0 = vector.load %arg1[%c0, %c0_0, %c0_1] : memref<2x8x128xf32, #tpu.memory_space<vmem>>, vector<2x8x128xf32>
    %1 = vector.shape_cast %0 : vector<2x8x128xf32> to vector<16x128xf32>
    %2 = arith.truncf %1 : vector<16x128xf32> to vector<16x128xbf16>
    %c0_2 = arith.constant 0 : index
    %c0_3 = arith.constant 0 : index
    %3 = vector.load %arg2[%c0_2, %c0_3] : memref<128x384xbf16, #tpu.memory_space<vmem>>, vector<128x384xbf16>
    %cst = arith.constant dense<0.000000e+00> : vector<16x384xf32>
    %4 = tpu.matmul %2, %3, %cst {dimension_numbers = #tpu.dot_dimension_numbers<[1], [0], [0], [1], [0, 0, 1, 1], [], []>} : vector<16x128xbf16>, vector<128x384xbf16>, vector<16x384xf32> -> vector<16x384xf32>
    %c0_4 = arith.constant 0 : index
    %c0_5 = arith.constant 0 : index
    %5 = vector.load %arg3[%c0_4, %c0_5] : memref<1x384xf32, #tpu.memory_space<vmem>>, vector<1x384xf32>
    %6 = vector.broadcast %5 : vector<1x384xf32> to vector<16x384xf32>
    %7 = arith.addf %4, %6 : vector<16x384xf32>
    %8 = vector.extract_strided_slice %7 {offsets = [0, 0], sizes = [16, 32], strides = [1, 1]} : vector<16x384xf32> to vector<16x32xf32>
    %9 = vector.extract_strided_slice %7 {offsets = [0, 32], sizes = [16, 32], strides = [1, 1]} : vector<16x384xf32> to vector<16x32xf32>
    %10 = vector.extract_strided_slice %7 {offsets = [0, 64], sizes = [16, 32], strides = [1, 1]} : vector<16x384xf32> to vector<16x32xf32>
    %11 = vector.extract_strided_slice %7 {offsets = [0, 96], sizes = [16, 32], strides = [1, 1]} : vector<16x384xf32> to vector<16x32xf32>
    %12 = tpu.concatenate %8, %9, %10, %11 in 0 : vector<16x32xf32>, vector<16x32xf32>, vector<16x32xf32>, vector<16x32xf32> -> vector<64x32xf32>
    %13 = vector.shape_cast %12 : vector<64x32xf32> to vector<8x8x32xf32>
    %14 = arith.truncf %13 : vector<8x8x32xf32> to vector<8x8x32xbf16>
    %15 = vector.extract_strided_slice %7 {offsets = [0, 128], sizes = [16, 32], strides = [1, 1]} : vector<16x384xf32> to vector<16x32xf32>
    %16 = vector.extract_strided_slice %7 {offsets = [0, 160], sizes = [16, 32], strides = [1, 1]} : vector<16x384xf32> to vector<16x32xf32>
    %17 = vector.extract_strided_slice %7 {offsets = [0, 192], sizes = [16, 32], strides = [1, 1]} : vector<16x384xf32> to vector<16x32xf32>
    %18 = vector.extract_strided_slice %7 {offsets = [0, 224], sizes = [16, 32], strides = [1, 1]} : vector<16x384xf32> to vector<16x32xf32>
    %19 = tpu.concatenate %15, %16, %17, %18 in 0 : vector<16x32xf32>, vector<16x32xf32>, vector<16x32xf32>, vector<16x32xf32> -> vector<64x32xf32>
    %20 = vector.shape_cast %19 : vector<64x32xf32> to vector<8x8x32xf32>
    %21 = arith.truncf %20 : vector<8x8x32xf32> to vector<8x8x32xbf16>
    %22 = vector.extract_strided_slice %7 {offsets = [0, 256], sizes = [16, 32], strides = [1, 1]} : vector<16x384xf32> to vector<16x32xf32>
    %23 = vector.extract_strided_slice %7 {offsets = [0, 288], sizes = [16, 32], strides = [1, 1]} : vector<16x384xf32> to vector<16x32xf32>
    %24 = vector.extract_strided_slice %7 {offsets = [0, 320], sizes = [16, 32], strides = [1, 1]} : vector<16x384xf32> to vector<16x32xf32>
    %25 = vector.extract_strided_slice %7 {offsets = [0, 352], sizes = [16, 32], strides = [1, 1]} : vector<16x384xf32> to vector<16x32xf32>
    %26 = tpu.concatenate %22, %23, %24, %25 in 0 : vector<16x32xf32>, vector<16x32xf32>, vector<16x32xf32>, vector<16x32xf32> -> vector<64x32xf32>
    %27 = vector.shape_cast %26 : vector<64x32xf32> to vector<8x8x32xf32>
    %28 = arith.truncf %27 : vector<8x8x32xf32> to vector<8x8x32xbf16>
    "tpu.trace_start"() <{level = 10 : i32, message = "gqd,gkd->gqk"}> : () -> ()
    %cst_6 = arith.constant dense<0.000000e+00> : vector<8x8x8xf32>
    %29 = tpu.matmul %14, %21, %cst_6 {dimension_numbers = #tpu.dot_dimension_numbers<[2], [2], [1], [1], [0, 0, 0, 1, 1, 1], [0], [0]>} : vector<8x8x32xbf16>, vector<8x8x32xbf16>, vector<8x8x8xf32> -> vector<8x8x8xf32>
    "tpu.trace_stop"() : () -> ()
    %cst_7 = arith.constant dense<0xFF800000> : vector<8x8xf32>
    %30 = vector.multi_reduction <maximumf>, %29, %cst_7 [2] : vector<8x8x8xf32> to vector<8x8xf32>
    %31 = vector.shape_cast %30 : vector<8x8xf32> to vector<8x8x1xf32>
    %32 = vector.broadcast %31 : vector<8x8x1xf32> to vector<8x8x8xf32>
    %33 = arith.subf %29, %32 : vector<8x8x8xf32>
    %34 = math.exp %33 : vector<8x8x8xf32>
    %cst_8 = arith.constant dense<0.000000e+00> : vector<8x8xf32>
    %35 = vector.multi_reduction <add>, %34, %cst_8 [2] : vector<8x8x8xf32> to vector<8x8xf32>
    %36 = vector.shape_cast %35 : vector<8x8xf32> to vector<8x8x1xf32>
    %37 = tpu.reciprocal %36 {approx = true} : vector<8x8x1xf32> -> vector<8x8x1xf32>
    %38 = vector.broadcast %37 : vector<8x8x1xf32> to vector<8x8x8xf32>
    %39 = arith.mulf %34, %38 : vector<8x8x8xf32>
    %40 = arith.truncf %39 : vector<8x8x8xf32> to vector<8x8x8xbf16>
    "tpu.trace_start"() <{level = 10 : i32, message = "gqk,gkd->gqd"}> : () -> ()
    %cst_9 = arith.constant dense<0.000000e+00> : vector<8x8x32xf32>
    %41 = tpu.matmul %40, %28, %cst_9 {dimension_numbers = #tpu.dot_dimension_numbers<[2], [1], [1], [2], [0, 0, 0, 1, 1, 2], [0], [0]>} : vector<8x8x8xbf16>, vector<8x8x32xbf16>, vector<8x8x32xf32> -> vector<8x8x32xf32>
    "tpu.trace_stop"() : () -> ()
    %42 = vector.shape_cast %41 : vector<8x8x32xf32> to vector<64x32xf32>
    %43 = vector.extract_strided_slice %42 {offsets = [0, 0], sizes = [16, 32], strides = [1, 1]} : vector<64x32xf32> to vector<16x32xf32>
    %44 = vector.extract_strided_slice %42 {offsets = [16, 0], sizes = [16, 32], strides = [1, 1]} : vector<64x32xf32> to vector<16x32xf32>
    %45 = vector.extract_strided_slice %42 {offsets = [32, 0], sizes = [16, 32], strides = [1, 1]} : vector<64x32xf32> to vector<16x32xf32>
    %46 = vector.extract_strided_slice %42 {offsets = [48, 0], sizes = [16, 32], strides = [1, 1]} : vector<64x32xf32> to vector<16x32xf32>
    %47 = tpu.concatenate %43, %44, %45, %46 in 1 : vector<16x32xf32>, vector<16x32xf32>, vector<16x32xf32>, vector<16x32xf32> -> vector<16x128xf32>
    %48 = arith.truncf %47 : vector<16x128xf32> to vector<16x128xbf16>
    %c0_10 = arith.constant 0 : index
    %c0_11 = arith.constant 0 : index
    %49 = vector.load %arg4[%c0_10, %c0_11] : memref<128x128xbf16, #tpu.memory_space<vmem>>, vector<128x128xbf16>
    %cst_12 = arith.constant dense<0.000000e+00> : vector<16x128xf32>
    %50 = tpu.matmul %48, %49, %cst_12 {dimension_numbers = #tpu.dot_dimension_numbers<[1], [0], [0], [1], [0, 0, 1, 1], [], []>} : vector<16x128xbf16>, vector<128x128xbf16>, vector<16x128xf32> -> vector<16x128xf32>
    %c0_13 = arith.constant 0 : index
    %c0_14 = arith.constant 0 : index
    %51 = vector.load %arg5[%c0_13, %c0_14] : memref<1x128xf32, #tpu.memory_space<vmem>>, vector<1x128xf32>
    %52 = vector.broadcast %51 : vector<1x128xf32> to vector<16x128xf32>
    %53 = arith.addf %50, %52 : vector<16x128xf32>
    %54 = arith.addf %1, %53 : vector<16x128xf32>
    %c0_15 = arith.constant 0 : index
    %c0_16 = arith.constant 0 : index
    %55 = vector.load %arg6[%c0_15, %c0_16] : memref<1x128xf32, #tpu.memory_space<vmem>>, vector<1x128xf32>
    %c0_17 = arith.constant 0 : index
    %c0_18 = arith.constant 0 : index
    %56 = vector.load %arg7[%c0_17, %c0_18] : memref<1x128xf32, #tpu.memory_space<vmem>>, vector<1x128xf32>
    %cst_19 = arith.constant dense<0.000000e+00> : vector<16xf32>
    %57 = vector.multi_reduction <add>, %54, %cst_19 [1] : vector<16x128xf32> to vector<16xf32>
    %58 = vector.shape_cast %57 : vector<16xf32> to vector<16x1xf32>
    %cst_20 = arith.constant 3.125000e-02 : f32
    %59 = vector.broadcast %cst_20 : f32 to vector<16x1xf32>
    %60 = arith.mulf %58, %59 : vector<16x1xf32>
    %61 = vector.broadcast %60 : vector<16x1xf32> to vector<16x128xf32>
    %62 = arith.subf %54, %61 : vector<16x128xf32>
    %63 = tpu.iota {dimensions = array<i32: 1>} : vector<1x128xi32>
    %c32_i32 = arith.constant 32 : i32
    %64 = vector.broadcast %c32_i32 : i32 to vector<1x128xi32>
    %65 = arith.cmpi slt, %63, %64 : vector<1x128xi32>
    %cst_21 = arith.constant 0.000000e+00 : f32
    %66 = vector.shape_cast %65 : vector<1x128xi1> to vector<1x128xi1>
    %67 = vector.broadcast %66 : vector<1x128xi1> to vector<16x128xi1>
    %68 = vector.broadcast %cst_21 : f32 to vector<16x128xf32>
    %69 = arith.select %67, %62, %68 : vector<16x128xi1>, vector<16x128xf32>
    %70 = arith.mulf %69, %69 : vector<16x128xf32>
    %cst_22 = arith.constant dense<0.000000e+00> : vector<16xf32>
    %71 = vector.multi_reduction <add>, %70, %cst_22 [1] : vector<16x128xf32> to vector<16xf32>
    %72 = vector.shape_cast %71 : vector<16xf32> to vector<16x1xf32>
    %cst_23 = arith.constant 3.125000e-02 : f32
    %73 = vector.broadcast %cst_23 : f32 to vector<16x1xf32>
    %74 = arith.mulf %72, %73 : vector<16x1xf32>
    %cst_24 = arith.constant 9.99999974E-6 : f32
    %75 = vector.broadcast %cst_24 : f32 to vector<16x1xf32>
    %76 = arith.addf %74, %75 : vector<16x1xf32>
    %77 = math.rsqrt %76 : vector<16x1xf32>
    %78 = vector.broadcast %77 : vector<16x1xf32> to vector<16x128xf32>
    %79 = arith.mulf %69, %78 : vector<16x128xf32>
    %80 = vector.broadcast %55 : vector<1x128xf32> to vector<16x128xf32>
    %81 = arith.mulf %79, %80 : vector<16x128xf32>
    %82 = vector.broadcast %56 : vector<1x128xf32> to vector<16x128xf32>
    %83 = arith.addf %81, %82 : vector<16x128xf32>
    %84 = arith.truncf %83 : vector<16x128xf32> to vector<16x128xbf16>
    %c0_25 = arith.constant 0 : index
    %c0_26 = arith.constant 0 : index
    %85 = vector.load %arg10[%c0_25, %c0_26] : memref<128x128xbf16, #tpu.memory_space<vmem>>, vector<128x128xbf16>
    %cst_27 = arith.constant dense<0.000000e+00> : vector<16x128xf32>
    %86 = tpu.matmul %84, %85, %cst_27 {dimension_numbers = #tpu.dot_dimension_numbers<[1], [0], [0], [1], [0, 0, 1, 1], [], []>} : vector<16x128xbf16>, vector<128x128xbf16>, vector<16x128xf32> -> vector<16x128xf32>
    %c0_28 = arith.constant 0 : index
    %c0_29 = arith.constant 0 : index
    %87 = vector.load %arg11[%c0_28, %c0_29] : memref<1x128xf32, #tpu.memory_space<vmem>>, vector<1x128xf32>
    %88 = vector.broadcast %87 : vector<1x128xf32> to vector<16x128xf32>
    %89 = arith.addf %86, %88 : vector<16x128xf32>
    %cst_30 = arith.constant 0.000000e+00 : f32
    %90 = vector.broadcast %cst_30 : f32 to vector<16x128xf32>
    %91 = arith.maximumf %89, %90 : vector<16x128xf32>
    %92 = arith.truncf %91 : vector<16x128xf32> to vector<16x128xbf16>
    %c0_31 = arith.constant 0 : index
    %c0_32 = arith.constant 0 : index
    %93 = vector.load %arg12[%c0_31, %c0_32] : memref<128x128xbf16, #tpu.memory_space<vmem>>, vector<128x128xbf16>
    %cst_33 = arith.constant dense<0.000000e+00> : vector<16x128xf32>
    %94 = tpu.matmul %92, %93, %cst_33 {dimension_numbers = #tpu.dot_dimension_numbers<[1], [0], [0], [1], [0, 0, 1, 1], [], []>} : vector<16x128xbf16>, vector<128x128xbf16>, vector<16x128xf32> -> vector<16x128xf32>
    %c0_34 = arith.constant 0 : index
    %c0_35 = arith.constant 0 : index
    %95 = vector.load %arg13[%c0_34, %c0_35] : memref<1x128xf32, #tpu.memory_space<vmem>>, vector<1x128xf32>
    %96 = vector.broadcast %95 : vector<1x128xf32> to vector<16x128xf32>
    %97 = arith.addf %94, %96 : vector<16x128xf32>
    %98 = arith.addf %83, %97 : vector<16x128xf32>
    %c0_36 = arith.constant 0 : index
    %c0_37 = arith.constant 0 : index
    %99 = vector.load %arg8[%c0_36, %c0_37] : memref<1x128xf32, #tpu.memory_space<vmem>>, vector<1x128xf32>
    %c0_38 = arith.constant 0 : index
    %c0_39 = arith.constant 0 : index
    %100 = vector.load %arg9[%c0_38, %c0_39] : memref<1x128xf32, #tpu.memory_space<vmem>>, vector<1x128xf32>
    %cst_40 = arith.constant dense<0.000000e+00> : vector<16xf32>
    %101 = vector.multi_reduction <add>, %98, %cst_40 [1] : vector<16x128xf32> to vector<16xf32>
    %102 = vector.shape_cast %101 : vector<16xf32> to vector<16x1xf32>
    %cst_41 = arith.constant 3.125000e-02 : f32
    %103 = vector.broadcast %cst_41 : f32 to vector<16x1xf32>
    %104 = arith.mulf %102, %103 : vector<16x1xf32>
    %105 = vector.broadcast %104 : vector<16x1xf32> to vector<16x128xf32>
    %106 = arith.subf %98, %105 : vector<16x128xf32>
    %107 = tpu.iota {dimensions = array<i32: 1>} : vector<1x128xi32>
    %c32_i32_42 = arith.constant 32 : i32
    %108 = vector.broadcast %c32_i32_42 : i32 to vector<1x128xi32>
    %109 = arith.cmpi slt, %107, %108 : vector<1x128xi32>
    %cst_43 = arith.constant 0.000000e+00 : f32
    %110 = vector.shape_cast %109 : vector<1x128xi1> to vector<1x128xi1>
    %111 = vector.broadcast %110 : vector<1x128xi1> to vector<16x128xi1>
    %112 = vector.broadcast %cst_43 : f32 to vector<16x128xf32>
    %113 = arith.select %111, %106, %112 : vector<16x128xi1>, vector<16x128xf32>
    %114 = arith.mulf %113, %113 : vector<16x128xf32>
    %cst_44 = arith.constant dense<0.000000e+00> : vector<16xf32>
    %115 = vector.multi_reduction <add>, %114, %cst_44 [1] : vector<16x128xf32> to vector<16xf32>
    %116 = vector.shape_cast %115 : vector<16xf32> to vector<16x1xf32>
    %cst_45 = arith.constant 3.125000e-02 : f32
    %117 = vector.broadcast %cst_45 : f32 to vector<16x1xf32>
    %118 = arith.mulf %116, %117 : vector<16x1xf32>
    %cst_46 = arith.constant 9.99999974E-6 : f32
    %119 = vector.broadcast %cst_46 : f32 to vector<16x1xf32>
    %120 = arith.addf %118, %119 : vector<16x1xf32>
    %121 = math.rsqrt %120 : vector<16x1xf32>
    %122 = vector.broadcast %121 : vector<16x1xf32> to vector<16x128xf32>
    %123 = arith.mulf %113, %122 : vector<16x128xf32>
    %124 = vector.broadcast %99 : vector<1x128xf32> to vector<16x128xf32>
    %125 = arith.mulf %123, %124 : vector<16x128xf32>
    %126 = vector.broadcast %100 : vector<1x128xf32> to vector<16x128xf32>
    %127 = arith.addf %125, %126 : vector<16x128xf32>
    %128 = vector.shape_cast %127 : vector<16x128xf32> to vector<2x8x128xf32>
    %c0_47 = arith.constant 0 : index
    %c0_48 = arith.constant 0 : index
    %c0_49 = arith.constant 0 : index
    %129 = vector.load %arg14[%c0_47, %c0_48, %c0_49] : memref<2x8x128xf32, #tpu.memory_space<vmem>>, vector<2x8x128xf32>
    tpu.vector_store %arg14[%c0_47, %c0_48, %c0_49], %128 {strides = array<i32>} : memref<2x8x128xf32, #tpu.memory_space<vmem>>, vector<2x8x128xf32>,
    return
  }
  func.func @transform_0(%arg0: i32) -> (i32, i32, i32) {
    %c0_i32 = arith.constant 0 : i32
    %c0_i32_0 = arith.constant 0 : i32
    %c0_i32_1 = arith.constant 0 : i32
    return %arg0, %c0_i32, %c0_i32_0 : i32, i32, i32
  }
  func.func @transform_1(%arg0: i32) -> (i32, i32) {
    %c0_i32 = arith.constant 0 : i32
    %c0_i32_0 = arith.constant 0 : i32
    %c0_i32_1 = arith.constant 0 : i32
    return %c0_i32, %c0_i32_0 : i32, i32
  }
  func.func @transform_2(%arg0: i32) -> (i32, i32) {
    %c0_i32 = arith.constant 0 : i32
    %c0_i32_0 = arith.constant 0 : i32
    %c0_i32_1 = arith.constant 0 : i32
    return %c0_i32, %c0_i32_0 : i32, i32
  }
  func.func @transform_3(%arg0: i32) -> (i32, i32) {
    %c0_i32 = arith.constant 0 : i32
    %c0_i32_0 = arith.constant 0 : i32
    %c0_i32_1 = arith.constant 0 : i32
    return %c0_i32, %c0_i32_0 : i32, i32
  }
  func.func @transform_4(%arg0: i32) -> (i32, i32) {
    %c0_i32 = arith.constant 0 : i32
    %c0_i32_0 = arith.constant 0 : i32
    %c0_i32_1 = arith.constant 0 : i32
    return %c0_i32, %c0_i32_0 : i32, i32
  }
  func.func @transform_5(%arg0: i32) -> (i32, i32) {
    %c0_i32 = arith.constant 0 : i32
    %c0_i32_0 = arith.constant 0 : i32
    %c0_i32_1 = arith.constant 0 : i32
    return %c0_i32, %c0_i32_0 : i32, i32
  }
  func.func @transform_6(%arg0: i32) -> (i32, i32) {
    %c0_i32 = arith.constant 0 : i32
    %c0_i32_0 = arith.constant 0 : i32
    %c0_i32_1 = arith.constant 0 : i32
    return %c0_i32, %c0_i32_0 : i32, i32
  }
  func.func @transform_7(%arg0: i32) -> (i32, i32) {
    %c0_i32 = arith.constant 0 : i32
    %c0_i32_0 = arith.constant 0 : i32
    %c0_i32_1 = arith.constant 0 : i32
    return %c0_i32, %c0_i32_0 : i32, i32
  }
  func.func @transform_8(%arg0: i32) -> (i32, i32) {
    %c0_i32 = arith.constant 0 : i32
    %c0_i32_0 = arith.constant 0 : i32
    %c0_i32_1 = arith.constant 0 : i32
    return %c0_i32, %c0_i32_0 : i32, i32
  }
  func.func @transform_9(%arg0: i32) -> (i32, i32) {
    %c0_i32 = arith.constant 0 : i32
    %c0_i32_0 = arith.constant 0 : i32
    %c0_i32_1 = arith.constant 0 : i32
    return %c0_i32, %c0_i32_0 : i32, i32
  }
  func.func @transform_10(%arg0: i32) -> (i32, i32) {
    %c0_i32 = arith.constant 0 : i32
    %c0_i32_0 = arith.constant 0 : i32
    %c0_i32_1 = arith.constant 0 : i32
    return %c0_i32, %c0_i32_0 : i32, i32
  }
  func.func @transform_11(%arg0: i32) -> (i32, i32) {
    %c0_i32 = arith.constant 0 : i32
    %c0_i32_0 = arith.constant 0 : i32
    %c0_i32_1 = arith.constant 0 : i32
    return %c0_i32, %c0_i32_0 : i32, i32
  }
  func.func @transform_12(%arg0: i32) -> (i32, i32) {
    %c0_i32 = arith.constant 0 : i32
    %c0_i32_0 = arith.constant 0 : i32
    %c0_i32_1 = arith.constant 0 : i32
    return %c0_i32, %c0_i32_0 : i32, i32
  }
  func.func @transform_13(%arg0: i32) -> (i32, i32, i32) {
    %c0_i32 = arith.constant 0 : i32
    %c0_i32_0 = arith.constant 0 : i32
    %c0_i32_1 = arith.constant 0 : i32
    return %arg0, %c0_i32, %c0_i32_0 : i32, i32, i32
  }
}

module attributes {stable_mosaic.version = 11 : i64} {
  func.func @encoder_layer_kernel(%arg0: i32, %arg1: memref<2x8x128xf32, #tpu.memory_space<vmem>>, %arg2: memref<128x384xbf16, #tpu.memory_space<vmem>>, %arg3: memref<1x384xf32, #tpu.memory_space<vmem>>, %arg4: memref<128x128xbf16, #tpu.memory_space<vmem>>, %arg5: memref<1x128xf32, #tpu.memory_space<vmem>>, %arg6: memref<1x128xf32, #tpu.memory_space<vmem>>, %arg7: memref<1x128xf32, #tpu.memory_space<vmem>>, %arg8: memref<1x128xf32, #tpu.memory_space<vmem>>, %arg9: memref<1x128xf32, #tpu.memory_space<vmem>>, %arg10: memref<128x128xbf16, #tpu.memory_space<vmem>>, %arg11: memref<1x128xf32, #tpu.memory_space<vmem>>, %arg12: memref<128x128xbf16, #tpu.memory_space<vmem>>, %arg13: memref<1x128xf32, #tpu.memory_space<vmem>>, %arg14: memref<2x8x128xf32, #tpu.memory_space<vmem>>) attributes {dimension_semantics = [#tpu.dimension_semantics<parallel>], iteration_bounds = array<i64: 2>, scalar_prefetch = 0 : i64, scratch_operands = 0 : i64, tpu.core_type = #tpu.core_type<tc>, window_params = [{transform_indices = @transform_0, window_bounds = array<i64: 2, 8, 128>}, {pipeline_mode = #tpu.pipeline_mode<synchronous>, transform_indices = @transform_1, window_bounds = array<i64: 128, 384>}, {pipeline_mode = #tpu.pipeline_mode<synchronous>, transform_indices = @transform_2, window_bounds = array<i64: 1, 384>}, {pipeline_mode = #tpu.pipeline_mode<synchronous>, transform_indices = @transform_3, window_bounds = array<i64: 128, 128>}, {pipeline_mode = #tpu.pipeline_mode<synchronous>, transform_indices = @transform_4, window_bounds = array<i64: 1, 128>}, {pipeline_mode = #tpu.pipeline_mode<synchronous>, transform_indices = @transform_5, window_bounds = array<i64: 1, 128>}, {pipeline_mode = #tpu.pipeline_mode<synchronous>, transform_indices = @transform_6, window_bounds = array<i64: 1, 128>}, {pipeline_mode = #tpu.pipeline_mode<synchronous>, transform_indices = @transform_7, window_bounds = array<i64: 1, 128>}, {pipeline_mode = #tpu.pipeline_mode<synchronous>, transform_indices = @transform_8, window_bounds = array<i64: 1, 128>}, {pipeline_mode = #tpu.pipeline_mode<synchronous>, transform_indices = @transform_9, window_bounds = array<i64: 128, 128>}, {pipeline_mode = #tpu.pipeline_mode<synchronous>, transform_indices = @transform_10, window_bounds = array<i64: 1, 128>}, {pipeline_mode = #tpu.pipeline_mode<synchronous>, transform_indices = @transform_11, window_bounds = array<i64: 128, 128>}, {pipeline_mode = #tpu.pipeline_mode<synchronous>, transform_indices = @transform_12, window_bounds = array<i64: 1, 128>}, {transform_indices = @transform_13, window_bounds = array<i64: 2, 8, 128>}]} {
    %c0 = arith.constant 0 : index
    %c0_0 = arith.constant 0 : index
    %c0_1 = arith.constant 0 : index
    %0 = vector.load %arg1[%c0, %c0_0, %c0_1] : memref<2x8x128xf32, #tpu.memory_space<vmem>>, vector<2x8x128xf32>
    %1 = vector.shape_cast %0 : vector<2x8x128xf32> to vector<16x128xf32>
    %2 = arith.truncf %1 : vector<16x128xf32> to vector<16x128xbf16>
    %c0_2 = arith.constant 0 : index
    %c0_3 = arith.constant 0 : index
    %3 = vector.load %arg2[%c0_2, %c0_3] : memref<128x384xbf16, #tpu.memory_space<vmem>>, vector<128x384xbf16>
    %cst = arith.constant dense<0.000000e+00> : vector<16x384xf32>
    %4 = tpu.matmul %2, %3, %cst {dimension_numbers = #tpu.dot_dimension_numbers<[1], [0], [0], [1], [0, 0, 1, 1], [], []>} : vector<16x128xbf16>, vector<128x384xbf16>, vector<16x384xf32> -> vector<16x384xf32>
    %c0_4 = arith.constant 0 : index
    %c0_5 = arith.constant 0 : index
    %5 = vector.load %arg3[%c0_4, %c0_5] : memref<1x384xf32, #tpu.memory_space<vmem>>, vector<1x384xf32>
    %6 = vector.broadcast %5 : vector<1x384xf32> to vector<16x384xf32>
    %7 = arith.addf %4, %6 : vector<16x384xf32>
    %8 = vector.extract_strided_slice %7 {offsets = [0, 0], sizes = [16, 32], strides = [1, 1]} : vector<16x384xf32> to vector<16x32xf32>
    %9 = vector.extract_strided_slice %7 {offsets = [0, 32], sizes = [16, 32], strides = [1, 1]} : vector<16x384xf32> to vector<16x32xf32>
    %10 = vector.extract_strided_slice %7 {offsets = [0, 64], sizes = [16, 32], strides = [1, 1]} : vector<16x384xf32> to vector<16x32xf32>
    %11 = vector.extract_strided_slice %7 {offsets = [0, 96], sizes = [16, 32], strides = [1, 1]} : vector<16x384xf32> to vector<16x32xf32>
    %12 = tpu.concatenate %8, %9, %10, %11 in 0 : vector<16x32xf32>, vector<16x32xf32>, vector<16x32xf32>, vector<16x32xf32> -> vector<64x32xf32>
    %13 = vector.shape_cast %12 : vector<64x32xf32> to vector<8x8x32xf32>
    %14 = arith.truncf %13 : vector<8x8x32xf32> to vector<8x8x32xbf16>
    %15 = vector.extract_strided_slice %7 {offsets = [0, 128], sizes = [16, 32], strides = [1, 1]} : vector<16x384xf32> to vector<16x32xf32>
    %16 = vector.extract_strided_slice %7 {offsets = [0, 160], sizes = [16, 32], strides = [1, 1]} : vector<16x384xf32> to vector<16x32xf32>
    %17 = vector.extract_strided_slice %7 {offsets = [0, 192], sizes = [16, 32], strides = [1, 1]} : vector<16x384xf32> to vector<16x32xf32>
    %18 = vector.extract_strided_slice %7 {offsets = [0, 224], sizes = [16, 32], strides = [1, 1]} : vector<16x384xf32> to vector<16x32xf32>
    %19 = tpu.concatenate %15, %16, %17, %18 in 0 : vector<16x32xf32>, vector<16x32xf32>, vector<16x32xf32>, vector<16x32xf32> -> vector<64x32xf32>
    %20 = vector.shape_cast %19 : vector<64x32xf32> to vector<8x8x32xf32>
    %21 = arith.truncf %20 : vector<8x8x32xf32> to vector<8x8x32xbf16>
    %22 = vector.extract_strided_slice %7 {offsets = [0, 256], sizes = [16, 32], strides = [1, 1]} : vector<16x384xf32> to vector<16x32xf32>
    %23 = vector.extract_strided_slice %7 {offsets = [0, 288], sizes = [16, 32], strides = [1, 1]} : vector<16x384xf32> to vector<16x32xf32>
    %24 = vector.extract_strided_slice %7 {offsets = [0, 320], sizes = [16, 32], strides = [1, 1]} : vector<16x384xf32> to vector<16x32xf32>
    %25 = vector.extract_strided_slice %7 {offsets = [0, 352], sizes = [16, 32], strides = [1, 1]} : vector<16x384xf32> to vector<16x32xf32>
    %26 = tpu.concatenate %22, %23, %24, %25 in 0 : vector<16x32xf32>, vector<16x32xf32>, vector<16x32xf32>, vector<16x32xf32> -> vector<64x32xf32>
    %27 = vector.shape_cast %26 : vector<64x32xf32> to vector<8x8x32xf32>
    %28 = arith.truncf %27 : vector<8x8x32xf32> to vector<8x8x32xbf16>
    "tpu.trace_start"() <{level = 10 : i32, message = "gqd,gkd->gqk"}> : () -> ()
    %cst_6 = arith.constant dense<0.000000e+00> : vector<8x8x8xf32>
    %29 = tpu.matmul %14, %21, %cst_6 {dimension_numbers = #tpu.dot_dimension_numbers<[2], [2], [1], [1], [0, 0, 0, 1, 1, 1], [0], [0]>} : vector<8x8x32xbf16>, vector<8x8x32xbf16>, vector<8x8x8xf32> -> vector<8x8x8xf32>
    "tpu.trace_stop"() : () -> ()
    %cst_7 = arith.constant dense<0xFF800000> : vector<8x8xf32>
    %30 = vector.multi_reduction <maximumf>, %29, %cst_7 [2] : vector<8x8x8xf32> to vector<8x8xf32>
    %31 = vector.shape_cast %30 : vector<8x8xf32> to vector<8x8x1xf32>
    %32 = vector.broadcast %31 : vector<8x8x1xf32> to vector<8x8x8xf32>
    %33 = arith.subf %29, %32 : vector<8x8x8xf32>
    %34 = math.exp %33 : vector<8x8x8xf32>
    %cst_8 = arith.constant dense<0.000000e+00> : vector<8x8xf32>
    %35 = vector.multi_reduction <add>, %34, %cst_8 [2] : vector<8x8x8xf32> to vector<8x8xf32>
    %36 = vector.shape_cast %35 : vector<8x8xf32> to vector<8x8x1xf32>
    %37 = tpu.reciprocal %36 {approx = true} : vector<8x8x1xf32> -> vector<8x8x1xf32>
    %38 = vector.broadcast %37 : vector<8x8x1xf32> to vector<8x8x8xf32>
    %39 = arith.mulf %34, %38 : vector<8x8x8xf32>
    %40 = arith.truncf %39 : vector<8x8x8xf32> to vector<8x8x8xbf16>
    "tpu.trace_start"() <{level = 10 : i32, message = "gqk,gkd->gqd"}> : () -> ()
    %cst_9 = arith.constant dense<0.000000e+00> : vector<8x8x32xf32>
    %41 = tpu.matmul %40, %28, %cst_9 {dimension_numbers = #tpu.dot_dimension_numbers<[2], [1], [1], [2], [0, 0, 0, 1, 1, 2], [0], [0]>} : vector<8x8x8xbf16>, vector<8x8x32xbf16>, vector<8x8x32xf32> -> vector<8x8x32xf32>
    "tpu.trace_stop"() : () -> ()
    %42 = vector.shape_cast %41 : vector<8x8x32xf32> to vector<64x32xf32>
    %43 = vector.extract_strided_slice %42 {offsets = [0, 0], sizes = [16, 32], strides = [1, 1]} : vector<64x32xf32> to vector<16x32xf32>
    %44 = vector.extract_strided_slice %42 {offsets = [16, 0], sizes = [16, 32], strides = [1, 1]} : vector<64x32xf32> to vector<16x32xf32>
    %45 = vector.extract_strided_slice %42 {offsets = [32, 0], sizes = [16, 32], strides = [1, 1]} : vector<64x32xf32> to vector<16x32xf32>
    %46 = vector.extract_strided_slice %42 {offsets = [48, 0], sizes = [16, 32], strides = [1, 1]} : vector<64x32xf32> to vector<16x32xf32>
    %47 = tpu.concatenate %43, %44, %45, %46 in 1 : vector<16x32xf32>, vector<16x32xf32>, vector<16x32xf32>, vector<16x32xf32> -> vector<16x128xf32>
    %48 = arith.truncf %47 : vector<16x128xf32> to vector<16x128xbf16>
    %c0_10 = arith.constant 0 : index
    %c0_11 = arith.constant 0 : index
    %49 = vector.load %arg4[%c0_10, %c0_11] : memref<128x128xbf16, #tpu.memory_space<vmem>>, vector<128x128xbf16>
    %cst_12 = arith.constant dense<0.000000e+00> : vector<16x128xf32>
    %50 = tpu.matmul %48, %49, %cst_12 {dimension_numbers = #tpu.dot_dimension_numbers<[1], [0], [0], [1], [0, 0, 1, 1], [], []>} : vector<16x128xbf16>, vector<128x128xbf16>, vector<16x128xf32> -> vector<16x128xf32>
    %c0_13 = arith.constant 0 : index
    %c0_14 = arith.constant 0 : index
    %51 = vector.load %arg5[%c0_13, %c0_14] : memref<1x128xf32, #tpu.memory_space<vmem>>, vector<1x128xf32>
    %52 = vector.broadcast %51 : vector<1x128xf32> to vector<16x128xf32>
    %53 = arith.addf %50, %52 : vector<16x128xf32>
    %54 = arith.addf %1, %53 : vector<16x128xf32>
    %c0_15 = arith.constant 0 : index
    %c0_16 = arith.constant 0 : index
    %55 = vector.load %arg6[%c0_15, %c0_16] : memref<1x128xf32, #tpu.memory_space<vmem>>, vector<1x128xf32>
    %c0_17 = arith.constant 0 : index
    %c0_18 = arith.constant 0 : index
    %56 = vector.load %arg7[%c0_17, %c0_18] : memref<1x128xf32, #tpu.memory_space<vmem>>, vector<1x128xf32>
    %cst_19 = arith.constant dense<0.000000e+00> : vector<16xf32>
    %57 = vector.multi_reduction <add>, %54, %cst_19 [1] : vector<16x128xf32> to vector<16xf32>
    %58 = vector.shape_cast %57 : vector<16xf32> to vector<16x1xf32>
    %cst_20 = arith.constant 3.125000e-02 : f32
    %59 = vector.broadcast %cst_20 : f32 to vector<16x1xf32>
    %60 = arith.mulf %58, %59 : vector<16x1xf32>
    %61 = vector.broadcast %60 : vector<16x1xf32> to vector<16x128xf32>
    %62 = arith.subf %54, %61 : vector<16x128xf32>
    %63 = tpu.iota {dimensions = array<i32: 1>} : vector<1x128xi32>
    %c32_i32 = arith.constant 32 : i32
    %64 = vector.broadcast %c32_i32 : i32 to vector<1x128xi32>
    %65 = arith.cmpi slt, %63, %64 : vector<1x128xi32>
    %cst_21 = arith.constant 0.000000e+00 : f32
    %66 = vector.shape_cast %65 : vector<1x128xi1> to vector<1x128xi1>
    %67 = vector.broadcast %66 : vector<1x128xi1> to vector<16x128xi1>
    %68 = vector.broadcast %cst_21 : f32 to vector<16x128xf32>
    %69 = arith.select %67, %62, %68 : vector<16x128xi1>, vector<16x128xf32>
    %70 = arith.mulf %69, %69 : vector<16x128xf32>
    %cst_22 = arith.constant dense<0.000000e+00> : vector<16xf32>
    %71 = vector.multi_reduction <add>, %70, %cst_22 [1] : vector<16x128xf32> to vector<16xf32>
    %72 = vector.shape_cast %71 : vector<16xf32> to vector<16x1xf32>
    %cst_23 = arith.constant 3.125000e-02 : f32
    %73 = vector.broadcast %cst_23 : f32 to vector<16x1xf32>
    %74 = arith.mulf %72, %73 : vector<16x1xf32>
    %cst_24 = arith.constant 9.99999974E-6 : f32
    %75 = vector.broadcast %cst_24 : f32 to vector<16x1xf32>
    %76 = arith.addf %74, %75 : vector<16x1xf32>
    %77 = math.rsqrt %76 : vector<16x1xf32>
    %78 = vector.broadcast %77 : vector<16x1xf32> to vector<16x128xf32>
    %79 = arith.mulf %69, %78 : vector<16x128xf32>
    %80 = vector.broadcast %55 : vector<1x128xf32> to vector<16x128xf32>
    %81 = arith.mulf %79, %80 : vector<16x128xf32>
    %82 = vector.broadcast %56 : vector<1x128xf32> to vector<16x128xf32>
    %83 = arith.addf %81, %82 : vector<16x128xf32>
    %84 = arith.truncf %83 : vector<16x128xf32> to vector<16x128xbf16>
    %c0_25 = arith.constant 0 : index
    %c0_26 = arith.constant 0 : index
    %85 = vector.load %arg10[%c0_25, %c0_26] : memref<128x128xbf16, #tpu.memory_space<vmem>>, vector<128x128xbf16>
    %cst_27 = arith.constant dense<0.000000e+00> : vector<16x128xf32>
    %86 = tpu.matmul %84, %85, %cst_27 {dimension_numbers = #tpu.dot_dimension_numbers<[1], [0], [0], [1], [0, 0, 1, 1], [], []>} : vector<16x128xbf16>, vector<128x128xbf16>, vector<16x128xf32> -> vector<16x128xf32>
    %c0_28 = arith.constant 0 : index
    %c0_29 = arith.constant 0 : index
    %87 = vector.load %arg11[%c0_28, %c0_29] : memref<1x128xf32, #tpu.memory_space<vmem>>, vector<1x128xf32>
    %88 = vector.broadcast %87 : vector<1x128xf32> to vector<16x128xf32>
    %89 = arith.addf %86, %88 : vector<16x128xf32>
    %cst_30 = arith.constant 0.000000e+00 : f32
    %90 = vector.broadcast %cst_30 : f32 to vector<16x128xf32>
    %91 = arith.maximumf %89, %90 : vector<16x128xf32>
    %92 = arith.truncf %91 : vector<16x128xf32> to vector<16x128xbf16>
    %c0_31 = arith.constant 0 : index
    %c0_32 = arith.constant 0 : index
    %93 = vector.load %arg12[%c0_31, %c0_32] : memref<128x128xbf16, #tpu.memory_space<vmem>>, vector<128x128xbf16>
    %cst_33 = arith.constant dense<0.000000e+00> : vector<16x128xf32>
    %94 = tpu.matmul %92, %93, %cst_33 {dimension_numbers = #tpu.dot_dimension_numbers<[1], [0], [0], [1], [0, 0, 1, 1], [], []>} : vector<16x128xbf16>, vector<128x128xbf16>, vector<16x128xf32> -> vector<16x128xf32>
    %c0_34 = arith.constant 0 : index
    %c0_35 = arith.constant 0 : index
    %95 = vector.load %arg13[%c0_34, %c0_35] : memref<1x128xf32, #tpu.memory_space<vmem>>, vector<1x128xf32>
    %96 = vector.broadcast %95 : vector<1x128xf32> to vector<16x128xf32>
    %97 = arith.addf %94, %96 : vector<16x128xf32>
    %98 = arith.addf %83, %97 : vector<16x128xf32>
    %c0_36 = arith.constant 0 : index
    %c0_37 = arith.constant 0 : index
    %99 = vector.load %arg8[%c0_36, %c0_37] : memref<1x128xf32, #tpu.memory_space<vmem>>, vector<1x128xf32>
    %c0_38 = arith.constant 0 : index
    %c0_39 = arith.constant 0 : index
    %100 = vector.load %arg9[%c0_38, %c0_39] : memref<1x128xf32, #tpu.memory_space<vmem>>, vector<1x128xf32>
    %cst_40 = arith.constant dense<0.000000e+00> : vector<16xf32>
    %101 = vector.multi_reduction <add>, %98, %cst_40 [1] : vector<16x128xf32> to vector<16xf32>
    %102 = vector.shape_cast %101 : vector<16xf32> to vector<16x1xf32>
    %cst_41 = arith.constant 3.125000e-02 : f32
    %103 = vector.broadcast %cst_41 : f32 to vector<16x1xf32>
    %104 = arith.mulf %102, %103 : vector<16x1xf32>
    %105 = vector.broadcast %104 : vector<16x1xf32> to vector<16x128xf32>
    %106 = arith.subf %98, %105 : vector<16x128xf32>
    %107 = tpu.iota {dimensions = array<i32: 1>} : vector<1x128xi32>
    %c32_i32_42 = arith.constant 32 : i32
    %108 = vector.broadcast %c32_i32_42 : i32 to vector<1x128xi32>
    %109 = arith.cmpi slt, %107, %108 : vector<1x128xi32>
    %cst_43 = arith.constant 0.000000e+00 : f32
    %110 = vector.shape_cast %109 : vector<1x128xi1> to vector<1x128xi1>
    %111 = vector.broadcast %110 : vector<1x128xi1> to vector<16x128xi1>
    %112 = vector.broadcast %cst_43 : f32 to vector<16x128xf32>
    %113 = arith.select %111, %106, %112 : vector<16x128xi1>, vector<16x128xf32>
    %114 = arith.mulf %113, %113 : vector<16x128xf32>
    %cst_44 = arith.constant dense<0.000000e+00> : vector<16xf32>
    %115 = vector.multi_reduction <add>, %114, %cst_44 [1] : vector<16x128xf32> to vector<16xf32>
    %116 = vector.shape_cast %115 : vector<16xf32> to vector<16x1xf32>
    %cst_45 = arith.constant 3.125000e-02 : f32
    %117 = vector.broadcast %cst_45 : f32 to vector<16x1xf32>
    %118 = arith.mulf %116, %117 : vector<16x1xf32>
    %cst_46 = arith.constant 9.99999974E-6 : f32
    %119 = vector.broadcast %cst_46 : f32 to vector<16x1xf32>
    %120 = arith.addf %118, %119 : vector<16x1xf32>
    %121 = math.rsqrt %120 : vector<16x1xf32>
    %122 = vector.broadcast %121 : vector<16x1xf32> to vector<16x128xf32>
    %123 = arith.mulf %113, %122 : vector<16x128xf32>
    %124 = vector.broadcast %99 : vector<1x128xf32> to vector<16x128xf32>
    %125 = arith.mulf %123, %124 : vector<16x128xf32>
    %126 = vector.broadcast %100 : vector<1x128xf32> to vector<16x128xf32>
    %127 = arith.addf %125, %126 : vector<16x128xf32>
    %128 = vector.shape_cast %127 : vector<16x128xf32> to vector<2x8x128xf32>
    %c0_47 = arith.constant 0 : index
    %c0_48 = arith.constant 0 : index
    %c0_49 = arith.constant 0 : index
    %129 = vector.load %arg14[%c0_47, %c0_48, %c0_49] : memref<2x8x128xf32, #tpu.memory_space<vmem>>, vector<2x8x128xf32>
    tpu.vector_store %arg14[%c0_47, %c0_48, %c0_49], %128 {strides = array<i32>} : memref<2x8x128xf32, #tpu.memory_space<vmem>>, vector<2x8x128xf32>,
    return
  }
  func.func @transform_0(%arg0: i32) -> (i32, i32, i32) {
    %c0_i32 = arith.constant 0 : i32
    %c0_i32_0 = arith.constant 0 : i32
    %c0_i32_1 = arith.constant 0 : i32
    return %arg0, %c0_i32, %c0_i32_0 : i32, i32, i32
  }
  func.func @transform_1(%arg0: i32) -> (i32, i32) {
    %c0_i32 = arith.constant 0 : i32
    %c0_i32_0 = arith.constant 0 : i32
    %c0_i32_1 = arith.constant 0 : i32
    return %c0_i32, %c0_i32_0 : i32, i32
  }
  func.func @transform_2(%arg0: i32) -> (i32, i32) {
    %c0_i32 = arith.constant 0 : i32
    %c0_i32_0 = arith.constant 0 : i32
    %c0_i32_1 = arith.constant 0 : i32
    return %c0_i32, %c0_i32_0 : i32, i32
  }
  func.func @transform_3(%arg0: i32) -> (i32, i32) {
    %c0_i32 = arith.constant 0 : i32
    %c0_i32_0 = arith.constant 0 : i32
    %c0_i32_1 = arith.constant 0 : i32
    return %c0_i32, %c0_i32_0 : i32, i32
  }
  func.func @transform_4(%arg0: i32) -> (i32, i32) {
    %c0_i32 = arith.constant 0 : i32
    %c0_i32_0 = arith.constant 0 : i32
    %c0_i32_1 = arith.constant 0 : i32
    return %c0_i32, %c0_i32_0 : i32, i32
  }
  func.func @transform_5(%arg0: i32) -> (i32, i32) {
    %c0_i32 = arith.constant 0 : i32
    %c0_i32_0 = arith.constant 0 : i32
    %c0_i32_1 = arith.constant 0 : i32
    return %c0_i32, %c0_i32_0 : i32, i32
  }
  func.func @transform_6(%arg0: i32) -> (i32, i32) {
    %c0_i32 = arith.constant 0 : i32
    %c0_i32_0 = arith.constant 0 : i32
    %c0_i32_1 = arith.constant 0 : i32
    return %c0_i32, %c0_i32_0 : i32, i32
  }
  func.func @transform_7(%arg0: i32) -> (i32, i32) {
    %c0_i32 = arith.constant 0 : i32
    %c0_i32_0 = arith.constant 0 : i32
    %c0_i32_1 = arith.constant 0 : i32
    return %c0_i32, %c0_i32_0 : i32, i32
  }
  func.func @transform_8(%arg0: i32) -> (i32, i32) {
    %c0_i32 = arith.constant 0 : i32
    %c0_i32_0 = arith.constant 0 : i32
    %c0_i32_1 = arith.constant 0 : i32
    return %c0_i32, %c0_i32_0 : i32, i32
  }
  func.func @transform_9(%arg0: i32) -> (i32, i32) {
    %c0_i32 = arith.constant 0 : i32
    %c0_i32_0 = arith.constant 0 : i32
    %c0_i32_1 = arith.constant 0 : i32
    return %c0_i32, %c0_i32_0 : i32, i32
  }
  func.func @transform_10(%arg0: i32) -> (i32, i32) {
    %c0_i32 = arith.constant 0 : i32
    %c0_i32_0 = arith.constant 0 : i32
    %c0_i32_1 = arith.constant 0 : i32
    return %c0_i32, %c0_i32_0 : i32, i32
  }
  func.func @transform_11(%arg0: i32) -> (i32, i32) {
    %c0_i32 = arith.constant 0 : i32
    %c0_i32_0 = arith.constant 0 : i32
    %c0_i32_1 = arith.constant 0 : i32
    return %c0_i32, %c0_i32_0 : i32, i32
  }
  func.func @transform_12(%arg0: i32) -> (i32, i32) {
    %c0_i32 = arith.constant 0 : i32
    %c0_i32_0 = arith.constant 0 : i32
    %c0_i32_1 = arith.constant 0 : i32
    return %c0_i32, %c0_i32_0 : i32, i32
  }
  func.func @transform_13(%arg0: i32) -> (i32, i32, i32) {
    %c0_i32 = arith.constant 0 : i32
    %c0_i32_0 = arith.constant 0 : i32
    %c0_i32_1 = arith.constant 0 : i32
    return %arg0, %c0_i32, %c0_i32_0 : i32, i32, i32
  }
}

</mosaic_0001>

<bundles_post_ra>
// kernel: tpu_custom_call.1
= control target key start
LH: loop header
LB: loop body
LE: loop exit
PB: predicated region body
PF: predicated region fallthrough
CT: control target
= control target key end

     0   :  { %s3649_s0 = inlined_call_operand.hbm [shape: f32[4,8,128], index: 0, kind: input, shape index: {}]   ;;  %s3650_s1 = inlined_call_operand.hbm [shape: bf16[128,384], index: 1, kind: input, shape index: {}]   ;;  %s3651_s2 = inlined_call_operand.vmem [shape: f32[1,384], index: 2, kind: input, shape index: {}]   ;;  %s3652_s3 = inlined_call_operand.hbm [shape: bf16[128,128], index: 3, kind: input, shape index: {}]   ;;  %s3653_s4 = inlined_call_operand.vmem [shape: f32[1,128], index: 4, kind: input, shape index: {}]   ;;  %s3654_s5 = inlined_call_operand.vmem [shape: f32[1,128], index: 5, kind: input, shape index: {}]   ;;  %s3655_s6 = inlined_call_operand.vmem [shape: f32[1,128], index: 6, kind: input, shape index: {}]   ;;  %s3656_s7 = inlined_call_operand.vmem [shape: f32[1,128], index: 7, kind: input, shape index: {}]   ;;  %s3657_s8 = inlined_call_operand.vmem [shape: f32[1,128], index: 8, kind: input, shape index: {}]   ;;  %s3658_s9 = inlined_call_operand.hbm [shape: bf16[128,128], index: 9, kind: input, shape index: {}]   ;;  %s3659_s10 = inlined_call_operand.vmem [shape: f32[1,128], index: 10, kind: input, shape index: {}]   ;;  %s3660_s11 = inlined_call_operand.hbm [shape: bf16[128,128], index: 11, kind: input, shape index: {}]   ;;  %s3661_s12 = inlined_call_operand.vmem [shape: f32[1,128], index: 12, kind: input, shape index: {}]   ;;  %s3662_s13 = inlined_call_operand.hbm [shape: f32[4,8,128], index: 13, kind: output, shape index: {}]  }
   0x1   :  { %3670 = sst [smem:[#allocation18_spill]] %s3650_s1 }
   0x2   :  { %3671 = sst [smem:[#allocation19_spill]] %s3652_s3 }
   0x3   :  { %3672 = sst [smem:[#allocation20_spill]] %s3658_s9 }
   0x4   :  { %3673 = sst [smem:[#allocation21_spill]] %s3660_s11 }
   0x5   :  { %3674 = sst [smem:[#allocation22_spill]] %s3662_s13 }
   0x6   :  { %18 = vsyncpa [#allocation3], 0 }
   0x7   :  { %20 = vsyncpa [#allocation3 + $0x1], 0 }
   0x8   :  { %21 = vsyncpa [#allocation6], 0 }
   0x9   :  { %22 = vsyncpa [#allocation9], 0 }
   0xa   :  { %23 = vsyncpa [#allocation4], 0 }
   0xb   :  { %25 = vsyncpa [#allocation4 + $0x1], 0  ;;  %s3183_s25 = smov 0   ;;  %s3185_s26 = smov 0  }
   0xc   :  { %s3187_s27 = smov 0   ;;  %s3189_s28 = smov 0  }
   0xd LB: > { %3675 = sst [smem:[#allocation16_spill]] %s3079_s25  ;;  %s3204_s29 = sadd.s32 4294967295, %s3091_s28   ;;  %s3091_s28 = sphi %s3189_s28, %s3703_s28   ;;  %s3087_s27 = sphi %s3187_s27, %s3702_s27   ;;  %s3083_s26 = sphi %s3185_s26, %s3701_s26   ;;  %s3079_s25 = sphi %s3183_s25, %s3700_s25  }
   0xe   : > { %s2296_s30 = sadd.s32 4294967294, %s3091_s28   ;;  %p51_p0 = scmp.ne.s32.totalorder %s3083_s26, %s3079_s25 }
   0xf   : > { %p3666_p1 = scmp.eq.s32.totalorder %s3204_s29, 0  ;;  %p333_p3 = scmp.eq.s32.totalorder %s2296_s30, 1 }
  0x10   : > { %p2297_p5 = scmp.ge.s32.totalorder %s3091_s28, 1  ;;  %p340_p7 = scmp.lt.s32.totalorder %s3091_s28, 3 }
  0x11   : > { %p3213_p4 = por %p3666_p1, %p51_p0  ;;  %p3218_p6 = por %p333_p3, %p51_p0 }
  0x12   : > { %p3223_p8 = pnand %p2297_p5, %p340_p7  ;;  %s3093_s17 = smov [#allocation5]  }
  0x13   : > { %s3676_s14 = scalar_select %p3213_p4, 1, 0 }
  0x14   : > { %s3677_s15 = scalar_select %p3218_p6, 1, 0 }
  0x15   : > { %s3679_s16 = scalar_select %p3223_p8, 1, 0 }
  0x16   : > { %3678 = sst [smem:[#allocation17_spill]] %s3677_s15  ;;  %s352_s18 = sshll.u32 %s3093_s17, 4  ;;  %s353_s18 = int_to_ptr.vmem [resolvable:$true] %s352_s18 }
  0x17   : > { %p2655_p9 = pneg %p3223_p8  ;;  %s3094_s20 = smov [#allocation8]  }
  0x18   : > { %s396_s21 = sshll.u32 %s3094_s20, 4  ;;  %s2898_s22 = scalar_lea.vmem %s353_s18, 3072  ;;  %s397_s21 = int_to_ptr.vmem [resolvable:$true] %s396_s21 }
  0x19   : > { %p3232_p11 = pnand %p2655_p9, %p3666_p1  ;;  %p2899_p13 = scmp.ne.s32.totalorder %s353_s18, %s2898_s22 }
  0x1a   : > { %p2906_p5 = scmp.lt.s32.totalorder %s353_s18, %s353_s18  ;;  %p2907_p7 = scmp.lt.s32.totalorder %s2898_s22, %s2898_s22 }
  0x1b   : > { %p2889_p12 = pneg %p3232_p11 }
  0x1c   : > { %p2908_p10 = por %p2907_p7, %p2906_p5 }
  0x1d   : > { %p2901_p0 = pnand %p2899_p13, %p2889_p12 }
  0x1f   : > { %p2902_p3 = pneg %p2901_p0 }
  0x21   : > { %p2909_p2 = pnand %p2908_p10, %p2902_p3 }
  0x23   : > { %2912 = shalt.err (!%p2909_p2)
}
  0x24   : > { %s3095_s23 = smov 192   ;;  %s3096_s24 = smov 12  }
  0x25   : > { %s3681_s1 = sld [smem:[#allocation18_spill]]  ;;  %s3097_s20 = smov [#allocation7]  }
  0x26   : > { %s368_s15 = sshll.u32 %s3097_s20, 4  ;;  %s2924_s25 = scalar_lea.vmem %s397_s21, 1024  ;;  %s369_s15 = int_to_ptr.vmem [resolvable:$true] %s368_s15 }
  0x27   : > { %p2925_p9 = scmp.ne.s32.totalorder %s397_s21, %s2924_s25  ;;  %p2932_p10 = scmp.lt.s32.totalorder %s397_s21, %s397_s21 }
  0x28   : > { %p2933_p2 = scmp.lt.s32.totalorder %s2924_s25, %s2924_s25 }
  0x29   : > { %p2927_p13 = pnand %p2925_p9, %p2889_p12 }
  0x2a   : > { %p2934_p3 = por %p2933_p2, %p2932_p10 }
  0x2b   : > { %2658 = dma.hbm_to_vmem [thread:$0]  (!%p3232_p11), %s3681_s1, 3072, %s353_s18, [#allocation6], %s3095_s23, %s3095_s23, %s3096_s24  }
  0x2c   : > { %p2928_p0 = pneg %p2927_p13 }
  0x2e   : > { %p2935_p5 = pnand %p2934_p3, %p2928_p0 }
  0x30   : > { %2938 = shalt.err (!%p2935_p5)
}
  0x31   : > { %s3098_s22 = smov 64   ;;  %s3099_s13 = smov 4  }
  0x32   : > { %s3682_s9 = sld [smem:[#allocation20_spill]]  ;;  %s2950_s24 = scalar_lea.vmem %s369_s15, 1024 }
  0x33   : > { %p2951_p7 = scmp.ne.s32.totalorder %s369_s15, %s2950_s24  ;;  %p2958_p1 = scmp.lt.s32.totalorder %s369_s15, %s369_s15 }
  0x34   : > { %p2959_p10 = scmp.lt.s32.totalorder %s2950_s24, %s2950_s24 }
  0x35   : > { %p2953_p9 = pnand %p2951_p7, %p2889_p12 }
  0x36   : > { %p2960_p0 = por %p2959_p10, %p2958_p1 }
  0x37   : > { %p2954_p13 = pneg %p2953_p9 }
  0x38   : > { %2664 = dma.hbm_to_vmem [thread:$0]  (!%p3232_p11), %s3682_s9, 1024, %s397_s21, [#allocation9], %s3098_s22, %s3098_s22, %s3099_s13  }
  0x39   : > { %p2961_p2 = pnand %p2960_p0, %p2954_p13 }
  0x3b   : > { %2964 = shalt.err (!%p2961_p2)
}
  0x3c   : > { %s3683_s3 = sld [smem:[#allocation19_spill]]  ;;  %s3100_s21 = smov [#allocation10]  }
  0x3d   : > { %s412_s17 = sshll.u32 %s3100_s21, 4  ;;  %s413_s17 = int_to_ptr.vmem [resolvable:$true] %s412_s17 }
  0x3e   : > { %s2976_s20 = scalar_lea.vmem %s413_s17, 1024  ;;  %p2984_p9 = scmp.lt.s32.totalorder %s413_s17, %s413_s17 }
  0x3f   : > { %p2977_p3 = scmp.ne.s32.totalorder %s413_s17, %s2976_s20  ;;  %p2985_p1 = scmp.lt.s32.totalorder %s2976_s20, %s2976_s20 }
  0x41   : > { %p2979_p5 = pnand %p2977_p3, %p2889_p12  ;;  %p2986_p13 = por %p2985_p1, %p2984_p9 }
  0x42   : > { %2661 = dma.hbm_to_vmem [thread:$0]  (!%p3232_p11), %s3683_s3, 1024, %s369_s15, [#allocation6], %s3098_s22, %s3098_s22, %s3099_s13  }
  0x43   : > { %p2980_p7 = pneg %p2979_p5 }
  0x45   : > { %p2987_p10 = pnand %p2986_p13, %p2980_p7 }
  0x47   : > { %2990 = shalt.err (!%p2987_p10)
}
  0x48   : > { %s3684_s11 = sld [smem:[#allocation21_spill]]  ;;  %s3271_s15 = sadd.s32 1, %s3091_s28  }
  0x49   : > { %s38_s24 = sadd.s32 1, %s3087_s27  ;;  %s35_s19 = ssub.s32 %s3091_s28, %s3271_s15 }
  0x4a   : > { %p45_p12 = scmp.ne.s32.totalorder %s3087_s27, %s3083_s26  ;;  %p36_p0 = scmp.eq.s32.totalorder %s35_s19, 0 }
  0x4b   : > { %p46_p2 = scmp.eq.s32.totalorder %s3091_s28, 0  ;;  %p3685_p3 = scmp.eq.s32.totalorder %s3204_s29, 1 }
  0x4c   : > { %p2680_p7 = scmp.lt.s32.totalorder %s3091_s28, 2  ;;  %s429_s21 = sand.u32 1, %s3087_s27  }
  0x4d   : > { %p3281_p5 = por %p3685_p3, %p45_p12  ;;  %p47_p9 = por %p46_p2, %p45_p12 }
  0x4e   : > { %2667 = dma.hbm_to_vmem [thread:$0]  (!%p3232_p11), %s3684_s11, 1024, %s413_s17, [#allocation9], %s3098_s22, %s3098_s22, %s3099_s13  }
  0x4f   : > { %s3686_s25 = scalar_select %p3281_p5, 1, 0 }
  0x50   : > { %s3287_s30 = scalar_select %p36_p0, %s3087_s27, %s38_s24  }
  0x51   : > { %s2303_s20 = sshll.u32 %s429_s21, 4  ;;  %s2389_s13 = sshll.u32 %s3091_s28, 8 }
  0x52   : > { %s3294_s18 = scalar_lea.hbm %s3649_s0, %s2389_s13  ;;  %s433_s23 = scalar_lea.vmem [#allocation2], %s2303_s20 }
  0x53   : > { %s440_s19 = sshll.u32 %s433_s23, 4  ;;  %p3298_p11 = pnand %p2680_p7, %p47_p9  ;;  %s3296_s19 = int_to_ptr.vmem [resolvable:$true] %s440_s19 }
  0x54   : > { %s3302_s24 = scalar_lea.sflag [#allocation3], %s429_s21  ;;  %s2991_s3 = scalar_lea.hbm %s3294_s18, 256 }
  0x55   : > { %p2992_p1 = scmp.ne.s32.totalorder %s3294_s18, %s2991_s3  ;;  %p2993_p13 = pneg %p3298_p11 }
  0x56   : > { %s2996_s20 = scalar_lea.hbm %s3649_s0, 512  ;;  %p2997_p0 = scmp.lt.s32.totalorder %s3294_s18, %s3649_s0 }
  0x57   : > { %p2994_p10 = pnand %p2993_p13, %p2992_p1  ;;  %p2998_p2 = scmp.lt.s32.totalorder %s2996_s20, %s2991_s3 }
  0x59   : > { %p2995_p12 = pneg %p2994_p10  ;;  %p2999_p3 = por %p2998_p2, %p2997_p0 }
  0x5b   : > { %p3000_p7 = pnand %p2999_p3, %p2995_p12 }
  0x5d   : > { %3003 = shalt.err (!%p3000_p7)
}
  0x5e   : > { %s3004_s21 = scalar_lea.vmem %s3296_s19, 256  ;;  %s3101_s9 = smov [#allocation2]  }
  0x5f   : > { %p3005_p9 = scmp.ne.s32.totalorder %s3296_s19, %s3004_s21  ;;  %s3009_s11 = sshll.u32 %s3101_s9, 4  ;;  %s3010_s11 = int_to_ptr.vmem [resolvable:$false] %s3009_s11 }
  0x60   : > { %s3011_s13 = scalar_lea.vmem %s3010_s11, 512  ;;  %p3012_p10 = scmp.lt.s32.totalorder %s3296_s19, %s3010_s11 }
  0x61   : > { %p3007_p6 = pnand %p3005_p9, %p2993_p13  ;;  %p3013_p5 = scmp.lt.s32.totalorder %s3011_s13, %s3004_s21 }
  0x63   : > { %p3008_p1 = pneg %p3007_p6  ;;  %p3014_p4 = por %p3013_p5, %p3012_p10 }
  0x65   : > { %p3015_p8 = pnand %p3014_p4, %p3008_p1 }
  0x67   : > { %3018 = shalt.err (!%p3015_p8)
}
  0x68   : > { %s3102_s3 = smov 128   ;;  %s3103_s22 = smov 8  }
  0x69   : > { %2671 = dma.hbm_to_vmem [thread:$0]  (!%p3298_p11), %s3294_s18, 256, %s3296_s19, %s3302_s24, %s3102_s3, %s3102_s3, %s3103_s22  }
  0x6a   : > { %p3688_p13 = scmp.ne.s32.totalorder %s3679_s16, 0 }
  0x6b   : > { %s3326_s9 = sand.u32 (!%p3688_p13), 1, %s3083_s26   ;;  %p3689_p4 = scmp.ne.s32.totalorder (!%p3688_p13), %s3676_s14, 0 }
  0x6c   : > { %452 = sbr.rel (%p3688_p13) target bundleno = 2602 (0xa2a), region = 72  ;;  %s2307_s11 = sshll.u32 (!%p3688_p13), %s3326_s9, 4 }
  0x6d   : > { %s455_s20 = scalar_lea.sflag (!%p3688_p13), [#allocation3], %s3326_s9  ;;  %s3332_s17 = scalar_lea.vmem (!%p3688_p13), [#allocation2], %s2307_s11 }
  0x71   : > { %3062 = dma.done.wait (%p3689_p4), %s455_s20, 256  }
  0x72   : > { %3064 = vsyncadd (%p3689_p4), %s455_s20, 4294967040  ;;  %p3690_p6 = scmp.eq.s32.totalorder %s3204_s29, 0 }
  0x74   : > { %3066 = dma.done.wait (%p3690_p6), [#allocation6], 4096   ;;  %p3691_p8 = pmov %p3690_p6 }
  0x75   : > { %p3692_p5 = pmov %p3690_p6 }
  0x76   : > { %3068 = vsyncadd (%p3691_p8), [#allocation6], 4294963200 }
  0x77   : > { %3070 = dma.done.wait (%p3692_p5), [#allocation9], 2048   ;;  %p3693_p11 = pmov %p3692_p5 }
  0x78   : > { %v3104_v0 = vmov 0   ;;  %v3105_v1 = vmov 0.0   ;;  %v2791_v2 = vld [vmem:[#allocation5 + $0xac] ss:$12 sps:$4 sm:$0xff]   ;;  %v2793_v3 = vld [vmem:[#allocation5 + $0xa8] ss:$12 sps:$4 sm:$0xff]   ;;  %v557_v29 = vlaneseq }
  0x79   : > { %3072 = vsyncadd (%p3693_p11), [#allocation9], 4294965248  ;;  %732 = vmatprep.mubr.bf16.mxu0 %v3104_v0  ;;  %2459 = vmatprep.subr.bf16.mxu1 %v3105_v1  ;;  %v2794_v4 = vld [vmem:[#allocation5 + $0x94] ss:$12 sps:$4 sm:$0xff]   ;;  %v2796_v5 = vld [vmem:[#allocation5 + $0x90] ss:$12 sps:$4 sm:$0xff]  }
  0x7a   : > { %700 = vmatprep.subr.bf16.mxu0 %v2791_v2  ;;  %v2797_v6 = vld [vmem:[#allocation5 + $0x7c] ss:$12 sps:$4 sm:$0xff]   ;;  %v2799_v7 = vld [vmem:[#allocation5 + $0x78] ss:$12 sps:$4 sm:$0xff]   ;;  %v2802_v9 = vld [vmem:[#allocation5 + $0x60] ss:$12 sps:$4 sm:$0xff]  }
  0x7b   : > { %701 = vmatpush1.bf16.msra.mxu0 %v2793_v3  ;;  %v2800_v8 = vld [vmem:[#allocation5 + $0x64] ss:$12 sps:$4 sm:$0xff]   ;;  %v2803_v10 = vld [vmem:[#allocation5 + $0x4c] ss:$12 sps:$4 sm:$0xff]   ;;  %v2805_v13 = vld [vmem:[#allocation5 + $0x48] ss:$12 sps:$4 sm:$0xff]  }
  0x7c   : > { %702 = vmatprep.subr.bf16.mxu0 %v2794_v4  ;;  %v2815_v11 = vld [vmem:[#allocation5 + $0xb0] ss:$12 sps:$4 sm:$0xff]   ;;  %v2816_v12 = vld [vmem:[#allocation5 + $0x98] ss:$12 sps:$4 sm:$0xff]   ;;  %v2806_v14 = vld [vmem:[#allocation5 + $0x34] ss:$12 sps:$4 sm:$0xff]  }
  0x7d   : > { %2460 = vmatpush3.bf16.msra.mxu1 %v2815_v11  ;;  %v2808_v15 = vld [vmem:[#allocation5 + $0x30] ss:$12 sps:$4 sm:$0xff]   ;;  %v2817_v16 = vld [vmem:[#allocation5 + $0x80] ss:$12 sps:$4 sm:$0xff]   ;;  %v2818_v18 = vld [vmem:[#allocation5 + $0x68] ss:$12 sps:$4 sm:$0xff]  }
  0x7e   : > { %2461 = vmatprep.subr.bf16.mxu1 %v3105_v1  ;;  %v2809_v17 = vld [vmem:[#allocation5 + $0x1c] ss:$12 sps:$4 sm:$0xff]   ;;  %v2811_v19 = vld [vmem:[#allocation5 + $0x18] ss:$12 sps:$4 sm:$0xff]   ;;  %v2814_v22 = vld [vmem:[#allocation5] ss:$12 sps:$4 sm:$0xff]  }
  0x7f   : > { %703 = vmatpush1.bf16.msra.mxu0 %v2796_v5  ;;  %v2812_v20 = vld [vmem:[#allocation5 + $0x4] ss:$12 sps:$4 sm:$0xff]   ;;  %v3354_v24 = vld [vmem:[%s3332_s17 + $0x8] sm:$0xff]  ;;  %vm3106_vm0 = vmmov 0   ;;  %v3371_v30 = vshrl.u32 %v557_v29, 7  ;;  %vm868_vm1 = vcmask 261120  }
  0x80   : > { %704 = vmatprep.subr.bf16.mxu0 %v2797_v6  ;;  %v2819_v21 = vld [vmem:[#allocation5 + $0x50] ss:$12 sps:$4 sm:$0xff]   ;;  %v2820_v25 = vld [vmem:[#allocation5 + $0x38] ss:$12 sps:$4 sm:$0xff]   ;;  %v2821_v27 = vld [vmem:[#allocation5 + $0x20] ss:$12 sps:$4 sm:$0xff]   ;;  %2475 = vmatprep.mubr.msk.bf16.mxu1 %vm3106_vm0, %v3105_v1 }
  0x81   : > { %2462 = vmatpush3.bf16.msra.mxu1 %v2816_v12  ;;  %v3351_v23 = vld [vmem:[%s3332_s17] sm:$0xff]  ;;  %v563_v31 = vsub.s32 1, %v3371_v30  ;;  %v559_v33 = vsub.s32 0, %v3371_v30  ;;  %s3107_s16 = smov 96   ;;  %s3108_s18 = smov 64   ;;  %v567_v11 = vsub.s32 2, %v3371_v30 }
  0x82   : > { %2463 = vmatprep.subr.bf16.mxu1 %v3105_v1  ;;  %v522_v26 = vpack.c.bf16 %v3354_v24, %v3351_v23  ;;  %v2822_v28 = vld [vmem:[#allocation5 + $0x8] ss:$12 sps:$4 sm:$0xff]   ;;  %v3377_v32 = vld [vmem:[%s3651_s2] sm:$0x7]  ;;  %s3109_s19 = smov 32   ;;  %vm1337_vm2 = vcmask 1043456  }
  0x83   : > { %705 = vmatpush1.bf16.msra.mxu0 %v2799_v7  ;;  %v564_v34 = vrot.slane %v3377_v32, %v563_v31  ;;  %v560_v37 = vrot.slane %v3377_v32, %v559_v33  ;;  %vm1237_vm3 = vcmask 64512   ;;  %vm1729_vm4 = vcmask 523264   ;;  %s2390_s23 = sshll.u32 %s3204_s29, 8  ;;  %s516_s21 = scalar_lea.vmem [#allocation11], %s2307_s11 }
  0x84   : > { %706 = vmatprep.subr.bf16.mxu0 %v2800_v8  ;;  %vm1732_vm5 = vcmask 785408   ;;  %s2185_s13 = sshll.u32 %s516_s21, 4  ;;  %s3694_s20 = sld [smem:[#allocation22_spill]]  ;;  %s3606_s13 = int_to_ptr.vmem [resolvable:$true] %s2185_s13 }
  0x85   : > { %2464 = vmatpush3.bf16.msra.mxu1 %v2817_v16  ;;  %s2172_s1 = scalar_lea.sflag [#allocation4], %s3326_s9  ;;  %s3019_s14 = scalar_lea.vmem %s3606_s13, 256 }
  0x86   : > { %2465 = vmatprep.subr.bf16.mxu1 %v3105_v1  ;;  %p3020_p12 = scmp.ne.s32.totalorder %s3606_s13, %s3019_s14  ;;  %p3695_p0 = scmp.ne.s32.totalorder %s3686_s25, 0 }
  0x87   : > { %707 = vmatpush1.bf16.msra.mxu0 %v2802_v9  ;;  %s3110_s29 = smov [#allocation11]  }
  0x88   : > { %708 = vmatprep.subr.bf16.mxu0 %v2803_v10  ;;  %p3021_p2 = pnand %p3020_p12, %p3695_p0  ;;  %s3023_s11 = sshll.u32 %s3110_s29, 4  ;;  %s3024_s11 = int_to_ptr.vmem [resolvable:$false] %s3023_s11 }
  0x89   : > { %2466 = vmatpush3.bf16.msra.mxu1 %v2818_v18  ;;  %p3026_p7 = scmp.lt.s32.totalorder %s3606_s13, %s3024_s11 }
  0x8a   : > { %2467 = vmatprep.subr.bf16.mxu1 %v3105_v1  ;;  %s3604_s17 = scalar_lea.hbm %s3694_s20, %s2390_s23  ;;  %p3022_p3 = pneg %p3021_p2 }
  0x8b   : > { %709 = vmatpush1.bf16.msra.mxu0 %v2805_v13 }
  0x8c   : > { %710 = vmatprep.subr.bf16.mxu0 %v2806_v14 }
  0x8d   : > { %2468 = vmatpush3.bf16.msra.mxu1 %v2819_v21 }
  0x8e   : > { %2469 = vmatprep.subr.bf16.mxu1 %v3105_v1 }
  0x8f   : > { %711 = vmatpush1.bf16.msra.mxu0 %v2808_v15  ;;  %v568_v15 = vrot.slane %v3377_v32, %v567_v11 }
  0x90   : > { %712 = vmatprep.subr.bf16.mxu0 %v2809_v17 }
  0x91   : > { %2470 = vmatpush3.bf16.msra.mxu1 %v2820_v25 }
  0x92   : > { %2471 = vmatprep.subr.bf16.mxu1 %v3105_v1 }
  0x93   : > { %713 = vmatpush1.bf16.msra.mxu0 %v2811_v19 }
  0x94   : > { %714 = vmatprep.subr.bf16.mxu0 %v2812_v20 }
  0x95   : > { %2472 = vmatpush3.bf16.msra.mxu1 %v2821_v27 }
  0x96   : > { %2473 = vmatprep.subr.bf16.mxu1 %v3105_v1 }
  0x97   : > { %715 = vmatpush1.bf16.msra.mxu0 %v2814_v22 }
  0x98   : > { %2503 = vmatprep.subr.bf16.mxu0 %v3105_v1 }
  0x99   : > { %2474 = vmatpush3.bf16.msra.mxu1 %v2822_v28 }
  0x9a   : > { %733 = vmatmul.mubr.bf16.vlgmr.msra.gmra.mxu0 %v522_v26  ;;  %2479 = vmatprep.subr.bf16.mxu1 %v3105_v1 }
  0x9b   : > { %2505 = vmatprep.mubr.msk.bf16.mxu0 %vm3106_vm0, %v3105_v1 }
  0x9c   : > { %2476 = vmatmul.mubr.bf16.vlgmr.msra.gmra.mxu1 %v522_v26 }
  0x9d   : > { %2481 = vmatprep.mubr.msk.bf16.mxu1 %vm3106_vm0, %v3105_v1 }
 0x15a   : > { %v734_v35 = vpop.f32.mrf.mxu0 }
 0x15b   : > { %v735_v43 = vadd.f32 %v734_v35, %v560_v37 }
 0x15c   : > { %v736_v36 = vpop.f32.mrf.mxu0  ;;  %v777_v53 = vpop.f32.mrf.mxu1 }
 0x15d   : > { %v737_v38 = vadd.f32 %v736_v36, %v564_v34  ;;  %v804_v50 = vpack.c.bf16 %v735_v43, %v735_v43  ;;  %v3412_v22 = vadd.f32 %v777_v53, %v568_v15 }
 0x15e   : > { %v738_v39 = vpop.f32.mrf.mxu0  ;;  %v2477_v54 = vpop.f32.mrf.mxu1 }
 0x15f   : > { %v739_v40 = vadd.f32 %v738_v39, %v560_v37  ;;  %814 = vrot.lane.b32.xlu0 %v737_v38, %s3107_s16  ;;  %v832_v41 = vpack.c.bf16 %v737_v38, %v737_v38  ;;  %v860_v30 = vpack.c.bf16 %v3412_v22, %v3412_v22 }
 0x160   : > { %v740_v42 = vpop.f32.mrf.mxu0  ;;  %v780_v55 = vpop.f32.mrf.mxu1 }
 0x161   : > { %v741_v44 = vadd.f32 %v740_v42, %v564_v34  ;;  %788 = vrot.lane.b32.xlu1 %v739_v40, %s3107_s16  ;;  %v873_v45 = vsel %vm868_vm1, %v832_v41, 0  ;;  %v2746_v49 = vpack.i.bf16 %v739_v40, %v735_v43  ;;  %v805_v52 = vpack.c.bf16 %v739_v40, %v739_v40 }
 0x162   : > { %2480 = vmatpush3.bf16.xpose.msra.mxu1 %v873_v45  ;;  %v2478_v56 = vpop.f32.mrf.mxu1  ;;  %v3424_v32 = vadd.f32 %v780_v55, %v568_v15  ;;  %v1339_v35 = vsel %vm1337_vm2, %v860_v30, 0 }
 0x163   : > { %v2741_v46 = vpack.i.bf16 %v741_v44, %v737_v38  ;;  %v2736_v47 = vpack.i.bf16 %v741_v44, %v735_v43  ;;  %2485 = vmatprep.subr.bf16.mxu1 %v3105_v1  ;;  %v833_v48 = vpack.c.bf16 %v741_v44, %v741_v44 }
 0x164   : > { %v861_v37 = vpack.c.bf16 %v3424_v32, %v3424_v32 }
 0x165   : > { %2742 = vrot.lane.b32.xlu1 %v2741_v46, %s3108_s18  ;;  %2737 = vrot.lane.b32.xlu0 %v2736_v47, %s3107_s16  ;;  %v919_v51 = vsel %vm868_vm1, %v833_v48, 0 }
 0x166   : > { %v1385_v39 = vsel %vm1337_vm2, %v861_v37, 0 }
 0x169   : > { %2752 = vrot.lane.b32.xlu1 %v2741_v46, %s3109_s19  ;;  %2747 = vrot.lane.b32.xlu0 %v2746_v49, %s3108_s18 }
 0x16a   : > { %2482 = vmatmul.mubr.msk.bf16.vlgmr.msra.gmra.mxu1 %vm868_vm1, %v804_v50 }
 0x16b   : > { %2486 = vmatpush3.bf16.xpose.msra.mxu1 %v919_v51  ;;  %2487 = vmatprep.mubr.msk.bf16.mxu1 %vm3106_vm0, %v3105_v1 }
 0x16c   : > { %2491 = vmatprep.subr.bf16.mxu1 %v3105_v1 }
 0x16d   : > { %2757 = vrot.lane.b32.xlu0 %v2746_v49, %s3109_s19 }
 0x172   : > { %2488 = vmatmul.mubr.msk.bf16.vlgmr.msra.gmra.mxu1 %vm868_vm1, %v805_v52 }
 0x173   : > { %2493 = vmatprep.mubr.msk.bf16.mxu1 %vm3106_vm0, %v3105_v1 }
 0x1d1   : > { %v815_v57 = vpop.permute.xlu0 %814 }
 0x1d2   : > { %v834_v58 = vpack.c.bf16 %v815_v57, %v815_v57 }
 0x1d3   : > { %v789_v59 = vpop.permute.xlu1 %788 }
 0x1d4   : > { %v965_v60 = vsel %vm868_vm1, %v834_v58, 0  ;;  %v807_v17 = vpack.c.bf16 %v789_v59, %v789_v59 }
 0x1d5   : > { %2492 = vmatpush3.bf16.xpose.msra.mxu1 %v965_v60 }
 0x1d6   : > { %2497 = vmatprep.subr.bf16.mxu1 %v3105_v1 }
 0x1d7   : > { %v2743_v61 = vpop.permute.xlu1 %2742  ;;  %v2738_v62 = vpop.permute.xlu0 %2737 }
 0x1d8   : > { %v2744_v63 = vunpack.i.l.bf16 %v2743_v61  ;;  %v2740_v0 = vunpack.i.h.bf16 %v2738_v62  ;;  %v2739_v2 = vunpack.i.l.bf16 %v2738_v62  ;;  %v2745_v7 = vunpack.i.h.bf16 %v2743_v61 }
 0x1da   : > { %v836_v3 = vpack.c.bf16 %v2744_v63, %v2744_v63  ;;  %v835_v4 = vpack.c.bf16 %v2740_v0, %v2740_v0  ;;  %v806_v5 = vpack.c.bf16 %v2739_v2, %v2739_v2  ;;  %v837_v14 = vpack.c.bf16 %v2745_v7, %v2745_v7 }
 0x1db   : > { %v2753_v6 = vpop.permute.xlu1 %2752  ;;  %v2748_v8 = vpop.permute.xlu0 %2747 }
 0x1dc   : > { %2494 = vmatmul.mubr.msk.bf16.vlgmr.msra.gmra.mxu1 %vm868_vm1, %v806_v5  ;;  %v1011_v9 = vsel %vm868_vm1, %v835_v4, 0  ;;  %v1057_v10 = vsel %vm868_vm1, %v836_v3, 0  ;;  %v2754_v12 = vunpack.i.l.bf16 %v2753_v6  ;;  %v2749_v13 = vunpack.i.l.bf16 %v2748_v8 }
 0x1dd   : > { %2499 = vmatprep.mubr.msk.bf16.mxu1 %vm3106_vm0, %v3105_v1  ;;  %2498 = vmatpush3.bf16.xpose.msra.mxu1 %v1011_v9  ;;  %v2755_v19 = vunpack.i.h.bf16 %v2753_v6  ;;  %v1103_v21 = vsel %vm868_vm1, %v837_v14, 0  ;;  %v2750_v26 = vunpack.i.h.bf16 %v2748_v8 }
 0x1de   : > { %2504 = vmatpush3.bf16.xpose.msra.mxu0 %v1057_v10  ;;  %2509 = vmatprep.subr.bf16.mxu1 %v3105_v1  ;;  %v838_v16 = vpack.c.bf16 %v2754_v12, %v2754_v12  ;;  %v808_v18 = vpack.c.bf16 %v2749_v13, %v2749_v13 }
 0x1df   : > { %2515 = vmatprep.subr.bf16.mxu0 %v3105_v1  ;;  %v2758_v20 = vpop.permute.xlu0 %2757  ;;  %v839_v28 = vpack.c.bf16 %v2755_v19, %v2755_v19  ;;  %v809_v31 = vpack.c.bf16 %v2750_v26, %v2750_v26 }
 0x1e0   : > { %v1149_v25 = vsel %vm868_vm1, %v838_v16, 0  ;;  %v2759_v27 = vunpack.i.l.bf16 %v2758_v20  ;;  %v2760_v36 = vunpack.i.h.bf16 %v2758_v20 }
 0x1e1   : > { %v1195_v34 = vsel %vm868_vm1, %v839_v28, 0 }
 0x1e2   : > { %v810_v33 = vpack.c.bf16 %v2759_v27, %v2759_v27  ;;  %v811_v38 = vpack.c.bf16 %v2760_v36, %v2760_v36 }
 0x1e4   : > { %2500 = vmatmul.mubr.msk.bf16.vlgmr.msra.gmra.mxu1 %vm868_vm1, %v807_v17 }
 0x1e5   : > { %2506 = vmatmul.mubr.msk.bf16.vlgmr.msra.gmra.mxu0 %vm868_vm1, %v808_v18  ;;  %2510 = vmatpush3.bf16.xpose.msra.mxu1 %v1103_v21 }
 0x1e6   : > { %2516 = vmatpush3.bf16.xpose.msra.mxu0 %v1149_v25  ;;  %2511 = vmatprep.mubr.msk.bf16.mxu1 %vm3106_vm0, %v3105_v1 }
 0x1e7   : > { %2517 = vmatprep.mubr.msk.bf16.mxu0 %vm3106_vm0, %v3105_v1  ;;  %2521 = vmatprep.subr.bf16.mxu1 %v3105_v1 }
 0x1e8   : > { %2527 = vmatprep.subr.bf16.mxu0 %v3105_v1 }
 0x1ec   : > { %2512 = vmatmul.mubr.msk.bf16.vlgmr.msra.gmra.mxu1 %vm868_vm1, %v809_v31 }
 0x1ed   : > { %2518 = vmatmul.mubr.msk.bf16.vlgmr.msra.gmra.mxu0 %vm868_vm1, %v810_v33  ;;  %2522 = vmatpush3.bf16.xpose.msra.mxu1 %v1195_v34 }
 0x1ee   : > { %2523 = vmatprep.mubr.msk.bf16.mxu1 %vm3106_vm0, %v3105_v1  ;;  %2533 = vmatprep.subr.bf16.mxu1 %v3105_v1 }
 0x1ef   : > { %2528 = vmatpush3.bf16.msra.mxu0 %v1339_v35  ;;  %2529 = vmatprep.mubr.msk.bf16.mxu0 %vm3106_vm0, %v3105_v1 }
 0x1f0   : > { %2539 = vmatprep.subr.bf16.mxu0 %v3105_v1 }
 0x1f4   : > { %2524 = vmatmul.mubr.msk.bf16.vlgmr.msra.gmra.mxu1 %vm868_vm1, %v811_v38 }
 0x1f5   : > { %2534 = vmatpush3.bf16.msra.mxu1 %v1385_v39  ;;  %2535 = vmatprep.mubr.msk.bf16.mxu1 %vm3106_vm0, %v3105_v1 }
 0x1f6   : > { %2545 = vmatprep.subr.bf16.mxu1 %v3105_v1 }
 0x22a   : > { %v909_v40 = vpop.f32.mrf.mxu1 }
 0x22b   : > { %v1238_v41 = vsel %vm1237_vm3, %v909_v40, -inf }
 0x22c   : > { %1239 = vmax.xlane.f32.xlu1 %v1238_v41  ;;  %v2483_v42 = vpop.f32.mrf.mxu1 }
 0x22e   : > { %v912_v43 = vpop.f32.mrf.mxu1 }
 0x230   : > { %v2484_v44 = vpop.f32.mrf.mxu1 }
 0x232   : > { %v955_v45 = vpop.f32.mrf.mxu1 }
 0x233   : > { %v1241_v46 = vsel %vm1237_vm3, %v955_v45, -inf }
 0x234   : > { %1242 = vmax.xlane.f32.xlu0 %v1241_v46  ;;  %v2489_v47 = vpop.f32.mrf.mxu1 }
 0x236   : > { %v958_v48 = vpop.f32.mrf.mxu1 }
 0x238   : > { %v2490_v49 = vpop.f32.mrf.mxu1 }
 0x29c   : > { %v1001_v50 = vpop.f32.mrf.mxu1 }
 0x29d   : > { %v1244_v51 = vsel %vm1237_vm3, %v1001_v50, -inf }
 0x29e   : > { %1245 = vmax.xlane.f32.xlu0 %v1244_v51  ;;  %v2495_v52 = vpop.f32.mrf.mxu1 }
 0x2a0   : > { %v1004_v53 = vpop.f32.mrf.mxu1 }
 0x2a2   : > { %v2496_v54 = vpop.f32.mrf.mxu1 }
 0x2a3   : > { %v2766_v54 = vpack.i.bf16 %v3424_v32, %v3412_v22 }
 0x2a4   : > { %v1047_v55 = vpop.f32.mrf.mxu1 }
 0x2a5   : > { %v1093_v56 = vpop.f32.mrf.mxu0  ;;  %v1247_v57 = vsel %vm1237_vm3, %v1047_v55, -inf }
 0x2a6   : > { %v1250_v58 = vsel %vm1237_vm3, %v1093_v56, -inf  ;;  %1248 = vmax.xlane.f32.xlu1 %v1247_v57  ;;  %v2501_v59 = vpop.f32.mrf.mxu1 }
 0x2a7   : > { %v2507_v60 = vpop.f32.mrf.mxu0  ;;  %1251 = vmax.xlane.f32.xlu0 %v1250_v58 }
 0x2a8   : > { %v1050_v61 = vpop.f32.mrf.mxu1 }
 0x2a9   : > { %v1096_v62 = vpop.f32.mrf.mxu0 }
 0x2aa   : > { %v2502_v63 = vpop.f32.mrf.mxu1 }
 0x2ab   : > { %v2508_v0 = vpop.f32.mrf.mxu0 }
 0x2ac   : > { %v3448_v2 = vpop.f32.mrf.mxu1 }
 0x2ad   : > { %v1185_v3 = vpop.f32.mrf.mxu0  ;;  %v1253_v4 = vsel %vm1237_vm3, %v3448_v2, -inf }
 0x2ae   : > { %v1256_v5 = vsel %vm1237_vm3, %v1185_v3, -inf  ;;  %1254 = vmax.xlane.f32.xlu1 %v1253_v4  ;;  %v2513_v6 = vpop.f32.mrf.mxu1 }
 0x2af   : > { %v2519_v7 = vpop.f32.mrf.mxu0  ;;  %1257 = vmax.xlane.f32.xlu0 %v1256_v5 }
 0x2b0   : > { %v1142_v8 = vpop.f32.mrf.mxu1 }
 0x2b1   : > { %v1188_v9 = vpop.f32.mrf.mxu0 }
 0x2b2   : > { %v2514_v10 = vpop.f32.mrf.mxu1 }
 0x2b3   : > { %v2520_v11 = vpop.f32.mrf.mxu0 }
 0x2b4   : > { %v3453_v13 = vpop.f32.mrf.mxu1 }
 0x2b5   : > { %v1240_v12 = vpop.xlane.xlu1 %1239  ;;  %v1259_v15 = vsel %vm1237_vm3, %v3453_v13, -inf }
 0x2b6   : > { %v1262_v14 = vsub.f32 %v909_v40, %v1240_v12  ;;  %1260 = vmax.xlane.f32.xlu1 %v1259_v15  ;;  %v2525_v16 = vpop.f32.mrf.mxu1 }
 0x2b8   : > { %v1270_v17 = vmul.f32 1.442695, %v1262_v14  ;;  %v1234_v18 = vpop.f32.mrf.mxu1 }
 0x2ba   : > { %2847 = vpow2.f32 %v1270_v17  ;;  %v2526_v19 = vpop.f32.mrf.mxu1 }
 0x2bd   : > { %v1243_v20 = vpop.xlane.xlu0 %1242 }
 0x2be   : > { %v1263_v21 = vsub.f32 %v955_v45, %v1243_v20 }
 0x2c0   : > { %v1272_v25 = vmul.f32 1.442695, %v1263_v21 }
 0x2c2   : > { %2849 = vpow2.f32 %v1272_v25 }
 0x2c7   : > { %v2848_v26 = vpop.eup %2847 }
 0x2c8   : > { %v1286_v27 = vsel %vm1237_vm3, %v2848_v26, 0.0 }
 0x2c9   : > { %1287 = vadd.xlane.f32.xlu0 %v1286_v27 }
 0x2cf   : > { %v2850_v28 = vpop.eup %2849 }
 0x2d0   : > { %v1289_v30 = vsel %vm1237_vm3, %v2850_v28, 0.0 }
 0x2d1   : > { %1290 = vadd.xlane.f32.xlu1 %v1289_v30 }
 0x327   : > { %v1246_v31 = vpop.xlane.xlu0 %1245 }
 0x328   : > { %v1264_v33 = vsub.f32 %v1001_v50, %v1246_v31 }
 0x32a   : > { %v1274_v34 = vmul.f32 1.442695, %v1264_v33 }
 0x32c   : > { %2851 = vpow2.f32 %v1274_v34 }
 0x32f   : > { %v1249_v35 = vpop.xlane.xlu1 %1248 }
 0x330   : > { %v1252_v36 = vpop.xlane.xlu0 %1251  ;;  %v1265_v37 = vsub.f32 %v1047_v55, %v1249_v35 }
 0x331   : > { %v1266_v38 = vsub.f32 %v1093_v56, %v1252_v36 }
 0x332   : > { %v1276_v39 = vmul.f32 1.442695, %v1265_v37 }
 0x333   : > { %v1278_v40 = vmul.f32 1.442695, %v1266_v38 }
 0x334   : > { %2853 = vpow2.f32 %v1276_v39 }
 0x335   : > { %2855 = vpow2.f32 %v1278_v40 }
 0x337   : > { %v1255_v52 = vpop.xlane.xlu1 %1254 }
 0x338   : > { %v1258_v42 = vpop.xlane.xlu0 %1257  ;;  %v1267_v58 = vsub.f32 %v3448_v2, %v1255_v52 }
 0x339   : > { %v3459_v41 = vpop.eup %2851  ;;  %v1268_v43 = vsub.f32 %v1185_v3, %v1258_v42 }
 0x33a   : > { %v1292_v44 = vsel %vm1237_vm3, %v3459_v41, 0.0  ;;  %v1280_v61 = vmul.f32 1.442695, %v1267_v58 }
 0x33b   : > { %1293 = vadd.xlane.f32.xlu0 %v1292_v44  ;;  %v1282_v45 = vmul.f32 1.442695, %v1268_v43 }
 0x33d   : > { %2857 = vpow2.f32 %v1282_v45 }
 0x33f   : > { %v1261_v55 = vpop.xlane.xlu1 %1260 }
 0x340   : > { %v1269_v62 = vsub.f32 %v3453_v13, %v1261_v55 }
 0x341   : > { %v2854_v46 = vpop.eup %2853 }
 0x342   : > { %v3463_v47 = vpop.eup %2855  ;;  %v1295_v48 = vsel %vm1237_vm3, %v2854_v46, 0.0  ;;  %v1284_v32 = vmul.f32 1.442695, %v1269_v62 }
 0x343   : > { %v1298_v49 = vsel %vm1237_vm3, %v3463_v47, 0.0  ;;  %1296 = vadd.xlane.f32.xlu1 %v1295_v48 }
 0x344   : > { %1299 = vadd.xlane.f32.xlu0 %v1298_v49 }
 0x34a   : > { %v3468_v50 = vpop.eup %2857 }
 0x34b   : > { %v1304_v51 = vsel %vm1237_vm3, %v3468_v50, 0.0 }
 0x34c   : > { %1305 = vadd.xlane.f32.xlu0 %v1304_v51 }
 0x352   : > { %v1288_v53 = vpop.xlane.xlu0 %1287 }
 0x353   : > { %2859 = vrcp.f32 %v1288_v53 }
 0x354   : > { %2767 = vrot.lane.b32.xlu1 %v2766_v54, %s3108_s18 }
 0x35a   : > { %v1291_v56 = vpop.xlane.xlu1 %1290 }
 0x35b   : > { %2861 = vrcp.f32 %v1291_v56 }
 0x35c   : > { %2863 = vpow2.f32 %v1280_v61 }
 0x35d   : > { %2865 = vpow2.f32 %v1284_v32  ;;  %v2823_v32 = vld [vmem:[#allocation7 + $0x38] sm:$0xff]  }
 0x360   : > { %v2860_v57 = vpop.eup %2859 }
 0x361   : > { %v1318_v59 = vmul.f32 %v2860_v57, %v2848_v26 }
 0x362   : > { %2762 = vrot.lane.b32.xlu0 %v2766_v54, %s3107_s16 }
 0x363   : > { %v1326_v60 = vpack.c.bf16 %v1318_v59, %v1318_v59 }
 0x365   : > { %2530 = vmatmul.mubr.msk.bf16.vlgmr.msra.gmra.mxu0 %vm1237_vm3, %v1326_v60 }
 0x366   : > { %2541 = vmatprep.mubr.msk.bf16.mxu0 %vm3106_vm0, %v3105_v1 }
 0x368   : > { %v2862_v22 = vpop.eup %2861 }
 0x369   : > { %v1319_v63 = vmul.f32 %v2862_v22, %v2850_v28  ;;  %v3484_v2 = vpop.eup %2863 }
 0x36a   : > { %v1301_v3 = vsel %vm1237_vm3, %v3484_v2, 0.0  ;;  %v3488_v4 = vpop.eup %2865 }
 0x36b   : > { %v1327_v0 = vpack.c.bf16 %v1319_v63, %v1319_v63  ;;  %v1307_v5 = vsel %vm1237_vm3, %v3488_v4, 0.0  ;;  %v2824_v63 = vld [vmem:[#allocation7 + $0x30] sm:$0xff]  }
 0x36d   : > { %2536 = vmatmul.mubr.msk.bf16.vlgmr.msra.gmra.mxu1 %vm1237_vm3, %v1327_v0  ;;  %v2825_v0 = vld [vmem:[#allocation7 + $0x28] sm:$0xff]  }
 0x36e   : > { %2547 = vmatprep.mubr.msk.bf16.mxu1 %vm3106_vm0, %v3105_v1 }
 0x378   : > { %1302 = vadd.xlane.f32.xlu1 %v1301_v3 }
 0x37c   : > { %1308 = vadd.xlane.f32.xlu1 %v1307_v5 }
 0x38d   : > { %2772 = vrot.lane.b32.xlu1 %v2766_v54, %s3109_s19 }
 0x3c4   : > { %v1294_v6 = vpop.xlane.xlu0 %1293 }
 0x3c5   : > { %2867 = vrcp.f32 %v1294_v6 }
 0x3cc   : > { %v1297_v7 = vpop.xlane.xlu1 %1296 }
 0x3cd   : > { %2869 = vrcp.f32 %v1297_v7  ;;  %v1300_v8 = vpop.xlane.xlu0 %1299  ;;  %v2826_v7 = vld [vmem:[#allocation7 + $0x20] sm:$0xff]  }
 0x3ce   : > { %2871 = vrcp.f32 %v1300_v8 }
 0x3d0   : > { %v2768_v10 = vpop.permute.xlu1 %2767 }
 0x3d1   : > { %v2770_v14 = vunpack.i.h.bf16 %v2768_v10  ;;  %v2769_v15 = vunpack.i.l.bf16 %v2768_v10 }
 0x3d2   : > { %v2868_v11 = vpop.eup %2867 }
 0x3d3   : > { %v1320_v20 = vmul.f32 %v2868_v11, %v3459_v41  ;;  %v865_v25 = vpack.c.bf16 %v2770_v14, %v2770_v14  ;;  %v864_v26 = vpack.c.bf16 %v2769_v15, %v2769_v15 }
 0x3d5   : > { %v1306_v9 = vpop.xlane.xlu0 %1305  ;;  %v1328_v30 = vpack.c.bf16 %v1320_v20, %v1320_v20  ;;  %v1523_v34 = vsel %vm1337_vm2, %v864_v26, 0  ;;  %v1569_v35 = vsel %vm1337_vm2, %v865_v25, 0  ;;  %v2830_v20 = vld [vmem:[#allocation7] sm:$0xff]  }
 0x3d6   : > { %2873 = vrcp.f32 %v1306_v9 }
 0x3d9   : > { %v2763_v12 = vpop.permute.xlu0 %2762 }
 0x3da   : > { %v2870_v13 = vpop.eup %2869  ;;  %v2765_v16 = vunpack.i.h.bf16 %v2763_v12  ;;  %v2764_v17 = vunpack.i.l.bf16 %v2763_v12  ;;  %v2827_v12 = vld [vmem:[#allocation7 + $0x18] sm:$0xff]  }
 0x3db   : > { %v1321_v21 = vmul.f32 %v2870_v13, %v2854_v46  ;;  %v2872_v33 = vpop.eup %2871 }
 0x3dc   : > { %v863_v18 = vpack.c.bf16 %v2765_v16, %v2765_v16  ;;  %v862_v19 = vpack.c.bf16 %v2764_v17, %v2764_v17  ;;  %v1322_v36 = vmul.f32 %v2872_v33, %v3463_v47  ;;  %v2828_v17 = vld [vmem:[#allocation7 + $0x10] sm:$0xff]  }
 0x3dd   : > { %v1329_v31 = vpack.c.bf16 %v1321_v21, %v1321_v21 }
 0x3de   : > { %v1431_v27 = vsel %vm1337_vm2, %v862_v19, 0  ;;  %v1477_v28 = vsel %vm1337_vm2, %v863_v18, 0  ;;  %v1330_v37 = vpack.c.bf16 %v1322_v36, %v1322_v36  ;;  %v2829_v18 = vld [vmem:[#allocation7 + $0x8] sm:$0xff]  }
 0x3df   : > { %2540 = vmatpush3.bf16.msra.mxu0 %v1431_v27  ;;  %2546 = vmatpush3.bf16.msra.mxu1 %v1477_v28 }
 0x3e0   : > { %2551 = vmatprep.subr.bf16.mxu0 %v3105_v1  ;;  %2557 = vmatprep.subr.bf16.mxu1 %v3105_v1 }
 0x3e2   : > { %2542 = vmatmul.mubr.msk.bf16.vlgmr.msra.gmra.mxu0 %vm1237_vm3, %v1328_v30  ;;  %2548 = vmatmul.mubr.msk.bf16.vlgmr.msra.gmra.mxu1 %vm1237_vm3, %v1329_v31 }
 0x3e3   : > { %2552 = vmatpush3.bf16.msra.mxu0 %v1523_v34  ;;  %2558 = vmatpush3.bf16.msra.mxu1 %v1569_v35  ;;  %v2874_v40 = vpop.eup %2873 }
 0x3e4   : > { %2553 = vmatprep.mubr.msk.bf16.mxu0 %vm3106_vm0, %v3105_v1  ;;  %2563 = vmatprep.subr.bf16.mxu0 %v3105_v1  ;;  %v1324_v45 = vmul.f32 %v2874_v40, %v3468_v50 }
 0x3e5   : > { %2559 = vmatprep.mubr.msk.bf16.mxu1 %vm3106_vm0, %v3105_v1  ;;  %2569 = vmatprep.subr.bf16.mxu1 %v3105_v1 }
 0x3e6   : > { %v1332_v49 = vpack.c.bf16 %v1324_v45, %v1324_v45 }
 0x3ea   : > { %2554 = vmatmul.mubr.msk.bf16.vlgmr.msra.gmra.mxu0 %vm1237_vm3, %v1330_v37 }
 0x3eb   : > { %2565 = vmatprep.mubr.msk.bf16.mxu0 %vm3106_vm0, %v3105_v1 }
 0x401   : > { %v1303_v38 = vpop.xlane.xlu1 %1302 }
 0x402   : > { %2875 = vrcp.f32 %v1303_v38 }
 0x405   : > { %v1309_v39 = vpop.xlane.xlu1 %1308 }
 0x406   : > { %2877 = vrcp.f32 %v1309_v39 }
 0x409   : > { %v2773_v41 = vpop.permute.xlu1 %2772 }
 0x40a   : > { %v2774_v42 = vunpack.i.l.bf16 %v2773_v41  ;;  %v2775_v43 = vunpack.i.h.bf16 %v2773_v41 }
 0x40c   : > { %v866_v44 = vpack.c.bf16 %v2774_v42, %v2774_v42  ;;  %v867_v48 = vpack.c.bf16 %v2775_v43, %v2775_v43 }
 0x40e   : > { %v1615_v46 = vsel %vm1337_vm2, %v866_v44, 0  ;;  %v1661_v50 = vsel %vm1337_vm2, %v867_v48, 0 }
 0x40f   : > { %v2876_v47 = vpop.eup %2875  ;;  %2564 = vmatpush3.bf16.msra.mxu0 %v1615_v46 }
 0x410   : > { %v1323_v51 = vmul.f32 %v2876_v47, %v3484_v2  ;;  %2575 = vmatprep.subr.bf16.mxu0 %v3105_v1 }
 0x412   : > { %2566 = vmatmul.mubr.msk.bf16.vlgmr.msra.gmra.mxu0 %vm1237_vm3, %v1332_v49  ;;  %v1331_v52 = vpack.c.bf16 %v1323_v51, %v1323_v51 }
 0x413   : > { %v2878_v53 = vpop.eup %2877  ;;  %2591 = vmatprep.mubr.msk.bf16.mxu0 %vm3106_vm0, %v3105_v1  ;;  %2576 = vmatpush3.bf16.msra.mxu0 %v2823_v32  ;;  %v2831_v32 = vld [vmem:[#allocation8 + $0x38] sm:$0xff]  }
 0x414   : > { %2560 = vmatmul.mubr.msk.bf16.vlgmr.msra.gmra.mxu1 %vm1237_vm3, %v1331_v52  ;;  %v1325_v54 = vmul.f32 %v2878_v53, %v3488_v4  ;;  %2577 = vmatprep.subr.bf16.mxu0 %v3105_v1 }
 0x415   : > { %2570 = vmatpush3.bf16.msra.mxu1 %v1661_v50  ;;  %2571 = vmatprep.mubr.msk.bf16.mxu1 %vm3106_vm0, %v3105_v1 }
 0x416   : > { %2595 = vmatprep.subr.bf16.mxu1 %v3105_v1  ;;  %v1333_v55 = vpack.c.bf16 %v1325_v54, %v1325_v54 }
 0x417   : > { %2578 = vmatpush3.bf16.msra.mxu0 %v2824_v63  ;;  %v3556_v63 = vand.u32 127, %v557_v29  ;;  %v2832_v29 = vld [vmem:[#allocation8 + $0x30] sm:$0xff]  }
 0x418   : > { %2579 = vmatprep.subr.bf16.mxu0 %v3105_v1 }
 0x419   : > { %vm1862_vm6 = vcmp.lt.s32.totalorder %v3556_v63, 32 }
 0x41b   : > { %2580 = vmatpush3.bf16.msra.mxu0 %v2825_v0 }
 0x41c   : > { %2572 = vmatmul.mubr.msk.bf16.vlgmr.msra.gmra.mxu1 %vm1237_vm3, %v1333_v55  ;;  %2581 = vmatprep.subr.bf16.mxu0 %v3105_v1  ;;  %v2353_v55 = vld [vmem:[%s3653_s4] ss:$0 sm:$0xff] }
 0x41d   : > { %2611 = vmatprep.mubr.msk.bf16.mxu1 %vm3106_vm0, %v3105_v1  ;;  %2596 = vmatpush3.bf16.msra.mxu1 %v2831_v32 }
 0x41e   : > { %2597 = vmatprep.subr.bf16.mxu1 %v3105_v1 }
 0x41f   : > { %2582 = vmatpush3.bf16.msra.mxu0 %v2826_v7 }
 0x420   : > { %2583 = vmatprep.subr.bf16.mxu0 %v3105_v1 }
 0x421   : > { %2598 = vmatpush3.bf16.msra.mxu1 %v2832_v29 }
 0x422   : > { %2599 = vmatprep.subr.bf16.mxu1 %v3105_v1 }
 0x423   : > { %2584 = vmatpush3.bf16.msra.mxu0 %v2827_v12  ;;  %v2836_v12 = vld [vmem:[#allocation8 + $0x10] sm:$0xff]  }
 0x424   : > { %2585 = vmatprep.subr.bf16.mxu0 %v3105_v1 }
 0x425   : > { %v3528_v56 = vpop.f32.mrf.mxu0 }
 0x427   : > { %v2531_v57 = vpop.f32.mrf.mxu0  ;;  %2586 = vmatpush3.bf16.msra.mxu0 %v2828_v17  ;;  %v2841_v17 = vld [vmem:[#allocation10 + $0x28] sm:$0xff]  }
 0x428   : > { %2587 = vmatprep.subr.bf16.mxu0 %v3105_v1 }
 0x429   : > { %v1378_v58 = vpop.f32.mrf.mxu0 }
 0x42b   : > { %v2532_v59 = vpop.f32.mrf.mxu0  ;;  %2588 = vmatpush3.bf16.msra.mxu0 %v2829_v18  ;;  %v2842_v18 = vld [vmem:[#allocation10 + $0x20] sm:$0xff]  }
 0x42c   : > { %2589 = vmatprep.subr.bf16.mxu0 %v3105_v1 }
 0x42d   : > { %v3530_v60 = vpop.f32.mrf.mxu1 }
 0x42f   : > { %v2537_v61 = vpop.f32.mrf.mxu1  ;;  %2590 = vmatpush3.bf16.msra.mxu0 %v2830_v20 }
 0x430   : > { %2615 = vmatprep.subr.bf16.mxu0 %v3105_v1 }
 0x431   : > { %v1424_v62 = vpop.f32.mrf.mxu1 }
 0x433   : > { %v2538_v22 = vpop.f32.mrf.mxu1 }
 0x4a2   : > { %v1467_v2 = vpop.f32.mrf.mxu0  ;;  %v1513_v3 = vpop.f32.mrf.mxu1 }
 0x4a3   : > { %v2776_v4 = vpack.i.bf16 %v1513_v3, %v1467_v2 }
 0x4a4   : > { %v2543_v5 = vpop.f32.mrf.mxu0  ;;  %v2549_v6 = vpop.f32.mrf.mxu1 }
 0x4a5   : > { %2777 = vrot.lane.b32.xlu0 %v2776_v4, %s3109_s19 }
 0x4a6   : > { %v1470_v8 = vpop.f32.mrf.mxu0  ;;  %v1516_v9 = vpop.f32.mrf.mxu1 }
 0x4a7   : > { %v2833_v9 = vld [vmem:[#allocation8 + $0x28] sm:$0xff]  }
 0x4a8   : > { %v2544_v10 = vpop.f32.mrf.mxu0  ;;  %v2550_v11 = vpop.f32.mrf.mxu1  ;;  %2600 = vmatpush3.bf16.msra.mxu1 %v2833_v9 }
 0x4a9   : > { %v2834_v10 = vld [vmem:[#allocation8 + $0x20] sm:$0xff]   ;;  %2601 = vmatprep.subr.bf16.mxu1 %v3105_v1  ;;  %v2835_v11 = vld [vmem:[#allocation8 + $0x18] sm:$0xff]  }
 0x4aa   : > { %v1559_v13 = vpop.f32.mrf.mxu0 }
 0x4ac   : > { %v2555_v14 = vpop.f32.mrf.mxu0  ;;  %2602 = vmatpush3.bf16.msra.mxu1 %v2834_v10 }
 0x4ad   : > { %2603 = vmatprep.subr.bf16.mxu1 %v3105_v1  ;;  %v2838_v14 = vld [vmem:[#allocation8] sm:$0xff]  }
 0x4ae   : > { %v1562_v15 = vpop.f32.mrf.mxu0 }
 0x4af   : > { %v2839_v15 = vld [vmem:[#allocation10 + $0x38] sm:$0xff]  }
 0x4b0   : > { %v2556_v16 = vpop.f32.mrf.mxu0  ;;  %2604 = vmatpush3.bf16.msra.mxu1 %v2835_v11 }
 0x4b1   : > { %2605 = vmatprep.subr.bf16.mxu1 %v3105_v1  ;;  %v2840_v16 = vld [vmem:[#allocation10 + $0x30] sm:$0xff]  }
 0x4b4   : > { %2606 = vmatpush3.bf16.msra.mxu1 %v2836_v12 }
 0x4b5   : > { %2607 = vmatprep.subr.bf16.mxu1 %v3105_v1 }
 0x4d2   : > { %v1651_v19 = vpop.f32.mrf.mxu0 }
 0x4d4   : > { %v1605_v21 = vpop.f32.mrf.mxu1  ;;  %v2567_v25 = vpop.f32.mrf.mxu0 }
 0x4d5   : > { %v2781_v26 = vpack.i.bf16 %v1605_v21, %v1559_v13  ;;  %v2837_v13 = vld [vmem:[#allocation8 + $0x8] sm:$0xff]  }
 0x4d6   : > { %v2561_v27 = vpop.f32.mrf.mxu1  ;;  %v1654_v28 = vpop.f32.mrf.mxu0  ;;  %2608 = vmatpush3.bf16.msra.mxu1 %v2837_v13  ;;  %v2382_v13 = vld [vmem:[%s3656_s7] ss:$0 sm:$0xff] }
 0x4d7   : > { %2782 = vrot.lane.b32.xlu1 %v2781_v26, %s3108_s18  ;;  %2609 = vmatprep.subr.bf16.mxu1 %v3105_v1 }
 0x4d8   : > { %v1608_v30 = vpop.f32.mrf.mxu1  ;;  %v2568_v31 = vpop.f32.mrf.mxu0 }
 0x4da   : > { %v2562_v33 = vpop.f32.mrf.mxu1  ;;  %2610 = vmatpush3.bf16.msra.mxu1 %v2838_v14  ;;  %v2383_v14 = vld [vmem:[%s3657_s8] ss:$0 sm:$0xff] }
 0x4db   : > { %v2362_v33 = vld [vmem:[%s3654_s5] ss:$0 sm:$0xff] }
 0x4dc   : > { %v1697_v34 = vpop.f32.mrf.mxu1 }
 0x4dd   : > { %v2786_v35 = vpack.i.bf16 %v1697_v34, %v1651_v19  ;;  %v2843_v19 = vld [vmem:[#allocation10 + $0x18] sm:$0xff]  }
 0x4de   : > { %v2573_v36 = vpop.f32.mrf.mxu1 }
 0x4df   : > { %2787 = vrot.lane.b32.xlu0 %v2786_v35, %s3107_s16  ;;  %s3025_s16 = scalar_lea.vmem %s3024_s11, 512 }
 0x4e0   : > { %v1700_v37 = vpop.f32.mrf.mxu1  ;;  %p3027_p9 = scmp.lt.s32.totalorder %s3025_s16, %s3019_s14 }
 0x4e1   : > { %v2363_v37 = vld [vmem:[%s3655_s6] ss:$0 sm:$0xff] }
 0x4e2   : > { %v2574_v38 = vpop.f32.mrf.mxu1  ;;  %p3028_p1 = por %p3027_p9, %p3026_p7 }
 0x4e4   : > { %p3029_p10 = pnand %p3028_p1, %p3022_p3 }
 0x517   : > { %v2778_v39 = vpop.permute.xlu0 %2777 }
 0x518   : > { %v2780_v41 = vunpack.i.h.bf16 %v2778_v39  ;;  %v2779_v42 = vunpack.i.l.bf16 %v2778_v39 }
 0x51a   : > { %v1728_v46 = vsel %vm868_vm1, %v3530_v60, %v2780_v41  ;;  %v1727_v47 = vsel %vm868_vm1, %v3528_v56, %v2779_v42  ;;  %v2844_v42 = vld [vmem:[#allocation10 + $0x10] sm:$0xff]  }
 0x549   : > { %v2783_v40 = vpop.permute.xlu1 %2782 }
 0x54a   : > { %v2785_v43 = vunpack.i.h.bf16 %v2783_v40  ;;  %v2784_v44 = vunpack.i.l.bf16 %v2783_v40 }
 0x54c   : > { %v1731_v51 = vsel %vm1729_vm4, %v1728_v46, %v2785_v43  ;;  %v1730_v52 = vsel %vm1729_vm4, %v1727_v47, %v2784_v44  ;;  %v2845_v43 = vld [vmem:[#allocation10 + $0x8] sm:$0xff]   ;;  %v2846_v44 = vld [vmem:[#allocation10] sm:$0xff]  }
 0x551   : > { %v2788_v45 = vpop.permute.xlu0 %2787 }
 0x552   : > { %v2790_v48 = vunpack.i.h.bf16 %v2788_v45  ;;  %v2789_v49 = vunpack.i.l.bf16 %v2788_v45  ;;  %v2364_v45 = vld [vmem:[%s3659_s10] ss:$0 sm:$0xff] }
 0x554   : > { %v1734_v53 = vsel %vm1732_vm5, %v1731_v51, %v2790_v48  ;;  %v1733_v50 = vsel %vm1732_vm5, %v1730_v52, %v2789_v49 }
 0x555   : > { %v1735_v54 = vpack.c.bf16 %v1734_v53, %v1733_v50 }
 0x557   : > { %2592 = vmatmul.mubr.bf16.vlgmr.msra.gmra.mxu0 %v1735_v54 }
 0x558   : > { %2631 = vmatprep.mubr.msk.bf16.mxu0 %vm3106_vm0, %v3105_v1  ;;  %2616 = vmatpush3.bf16.msra.mxu0 %v2839_v15 }
 0x559   : > { %2617 = vmatprep.subr.bf16.mxu0 %v3105_v1 }
 0x55c   : > { %2618 = vmatpush3.bf16.msra.mxu0 %v2840_v16 }
 0x55d   : > { %2619 = vmatprep.subr.bf16.mxu0 %v3105_v1 }
 0x560   : > { %2620 = vmatpush3.bf16.msra.mxu0 %v2841_v17 }
 0x561   : > { %2621 = vmatprep.subr.bf16.mxu0 %v3105_v1 }
 0x564   : > { %2622 = vmatpush3.bf16.msra.mxu0 %v2842_v18 }
 0x565   : > { %2623 = vmatprep.subr.bf16.mxu0 %v3105_v1 }
 0x568   : > { %2624 = vmatpush3.bf16.msra.mxu0 %v2843_v19 }
 0x569   : > { %2625 = vmatprep.subr.bf16.mxu0 %v3105_v1 }
 0x56c   : > { %2626 = vmatpush3.bf16.msra.mxu0 %v2844_v42 }
 0x56d   : > { %2627 = vmatprep.subr.bf16.mxu0 %v3105_v1 }
 0x570   : > { %2628 = vmatpush3.bf16.msra.mxu0 %v2845_v43 }
 0x571   : > { %2629 = vmatprep.subr.bf16.mxu0 %v3105_v1  ;;  %v2373_v1 = vld [vmem:[%s3661_s12] ss:$0 sm:$0xff] }
 0x574   : > { %2630 = vmatpush3.bf16.msra.mxu0 %v2846_v44 }
 0x617   : > { %v1841_v57 = vpop.f32.mrf.mxu0 }
 0x618   : > { %v1842_v58 = vadd.f32 %v2353_v55, %v1841_v57 }
 0x619   : > { %v2593_v59 = vpop.f32.mrf.mxu0 }
 0x61a   : > { %v1848_v56 = vadd.f32 %v1842_v58, %v3351_v23 }
 0x61b   : > { %v1844_v60 = vpop.f32.mrf.mxu0 }
 0x61c   : > { %v1845_v61 = vadd.f32 %v2353_v55, %v1844_v60  ;;  %1852 = vadd.xlane.f32.xlu1 %v1848_v56 }
 0x61d   : > { %v2594_v62 = vpop.f32.mrf.mxu0 }
 0x61e   : > { %v1849_v22 = vadd.f32 %v1845_v61, %v3354_v24 }
 0x620   : > { %1854 = vadd.xlane.f32.xlu0 %v1849_v22 }
 0x6a5   : > { %v1853_v0 = vpop.xlane.xlu1 %1852 }
 0x6a6   : > { %v1856_v2 = vmul.f32 0.03125, %v1853_v0 }
 0x6a8   : > { %v1858_v3 = vsub.f32 %v1848_v56, %v1856_v2 }
 0x6a9   : > { %v1855_v23 = vpop.xlane.xlu0 %1854 }
 0x6aa   : > { %v1857_v4 = vmul.f32 0.03125, %v1855_v23  ;;  %v1865_v5 = vsel %vm1862_vm6, %v1858_v3, 0.0 }
 0x6ab   : > { %v1867_v6 = vmul.f32 %v1865_v5, %v1865_v5 }
 0x6ac   : > { %v1859_v24 = vsub.f32 %v1849_v22, %v1857_v4 }
 0x6ad   : > { %1869 = vadd.xlane.f32.xlu0 %v1867_v6 }
 0x6ae   : > { %v1866_v7 = vsel %vm1862_vm6, %v1859_v24, 0.0 }
 0x6af   : > { %v1868_v8 = vmul.f32 %v1866_v7, %v1866_v7 }
 0x6b1   : > { %1871 = vadd.xlane.f32.xlu1 %v1868_v8 }
 0x736   : > { %v1870_v20 = vpop.xlane.xlu0 %1869 }
 0x737   : > { %v1873_v21 = vmul.f32 0.03125, %v1870_v20 }
 0x739   : > { %v1875_v25 = vadd.f32 1e-05, %v1873_v21 }
 0x73a   : > { %v1872_v26 = vpop.xlane.xlu1 %1871 }
 0x73b   : > { %2879 = vrsqrt.f32 %v1875_v25  ;;  %v1874_v27 = vmul.f32 0.03125, %v1872_v26 }
 0x73d   : > { %v1876_v28 = vadd.f32 1e-05, %v1874_v27 }
 0x73f   : > { %2881 = vrsqrt.f32 %v1876_v28 }
 0x748   : > { %v2880_v30 = vpop.eup %2879 }
 0x749   : > { %v1879_v31 = vmul.f32 %v2880_v30, %v1865_v5 }
 0x74b   : > { %v1887_v36 = vmul.f32 %v2362_v33, %v1879_v31 }
 0x74c   : > { %v2882_v34 = vpop.eup %2881 }
 0x74d   : > { %v1880_v35 = vmul.f32 %v2882_v34, %v1866_v7  ;;  %v1895_v39 = vadd.f32 %v2363_v37, %v1887_v36 }
 0x74f   : > { %v1888_v38 = vmul.f32 %v2362_v33, %v1880_v35 }
 0x751   : > { %v1896_v40 = vadd.f32 %v2363_v37, %v1888_v38 }
 0x753   : > { %v1897_v41 = vpack.c.bf16 %v1896_v40, %v1895_v39 }
 0x755   : > { %2612 = vmatmul.mubr.bf16.vlgmr.msra.gmra.mxu1 %v1897_v41 }
 0x815   : > { %v2003_v46 = vpop.f32.mrf.mxu1 }
 0x816   : > { %v2004_v48 = vadd.f32 %v2364_v45, %v2003_v46 }
 0x817   : > { %v2613_v47 = vpop.f32.mrf.mxu1 }
 0x818   : > { %v2010_v53 = vmax.f32 %v2004_v48, 0.0 }
 0x819   : > { %v2006_v49 = vpop.f32.mrf.mxu1 }
 0x81a   : > { %v2007_v51 = vadd.f32 %v2364_v45, %v2006_v49 }
 0x81b   : > { %v2614_v52 = vpop.f32.mrf.mxu1 }
 0x81c   : > { %v2011_v50 = vmax.f32 %v2007_v51, 0.0 }
 0x81e   : > { %v2012_v54 = vpack.c.bf16 %v2011_v50, %v2010_v53 }
 0x820   : > { %2632 = vmatmul.mubr.bf16.vlgmr.msra.gmra.mxu0 %v2012_v54 }
 0x8e0   : > { %v2118_v55 = vpop.f32.mrf.mxu0 }
 0x8e1   : > { %v2119_v57 = vadd.f32 %v2373_v1, %v2118_v55 }
 0x8e2   : > { %v2633_v58 = vpop.f32.mrf.mxu0 }
 0x8e3   : > { %v2125_v59 = vadd.f32 %v2119_v57, %v1895_v39 }
 0x8e4   : > { %v2121_v56 = vpop.f32.mrf.mxu0 }
 0x8e5   : > { %v2122_v60 = vadd.f32 %v2373_v1, %v2121_v56  ;;  %2129 = vadd.xlane.f32.xlu0 %v2125_v59 }
 0x8e6   : > { %v2634_v61 = vpop.f32.mrf.mxu0 }
 0x8e7   : > { %v2126_v62 = vadd.f32 %v2122_v60, %v1896_v40 }
 0x8e9   : > { %2131 = vadd.xlane.f32.xlu1 %v2126_v62 }
 0x96e   : > { %v2130_v22 = vpop.xlane.xlu0 %2129 }
 0x96f   : > { %v2133_v32 = vmul.f32 0.03125, %v2130_v22 }
 0x971   : > { %v2135_v0 = vsub.f32 %v2125_v59, %v2133_v32 }
 0x972   : > { %v2132_v2 = vpop.xlane.xlu1 %2131 }
 0x973   : > { %v2134_v3 = vmul.f32 0.03125, %v2132_v2  ;;  %v2137_v23 = vsel %vm1862_vm6, %v2135_v0, 0.0 }
 0x974   : > { %v2139_v4 = vmul.f32 %v2137_v23, %v2137_v23 }
 0x975   : > { %v2136_v5 = vsub.f32 %v2126_v62, %v2134_v3 }
 0x976   : > { %2141 = vadd.xlane.f32.xlu0 %v2139_v4 }
 0x977   : > { %v2138_v6 = vsel %vm1862_vm6, %v2136_v5, 0.0 }
 0x978   : > { %v2140_v24 = vmul.f32 %v2138_v6, %v2138_v6 }
 0x97a   : > { %2143 = vadd.xlane.f32.xlu1 %v2140_v24 }
 0x9ff   : > { %v2142_v7 = vpop.xlane.xlu0 %2141 }
 0xa00   : > { %v2145_v8 = vmul.f32 0.03125, %v2142_v7 }
 0xa02   : > { %v2147_v29 = vadd.f32 1e-05, %v2145_v8 }
 0xa03   : > { %v2144_v9 = vpop.xlane.xlu1 %2143 }
 0xa04   : > { %2883 = vrsqrt.f32 %v2147_v29  ;;  %v2146_v10 = vmul.f32 0.03125, %v2144_v9 }
 0xa06   : > { %v2148_v11 = vadd.f32 1e-05, %v2146_v10 }
 0xa08   : > { %2885 = vrsqrt.f32 %v2148_v11 }
 0xa11   : > { %v2884_v12 = vpop.eup %2883 }
 0xa12   : > { %v2151_v63 = vmul.f32 %v2884_v12, %v2137_v23 }
 0xa14   : > { %v2159_v15 = vmul.f32 %v2382_v13, %v2151_v63 }
 0xa15   : > { %v2886_v16 = vpop.eup %2885 }
 0xa16   : > { %v2167_v17 = vadd.f32 %v2383_v14, %v2159_v15  ;;  %v2152_v18 = vmul.f32 %v2886_v16, %v2138_v6 }
 0xa18   : > { %v2160_v19 = vmul.f32 %v2382_v13, %v2152_v18  ;;  %2169 = vst [vmem:[%s516_s21] sm:$0xff] %v2167_v17 }
 0xa1a   : > { %v2168_v20 = vadd.f32 %v2383_v14, %v2160_v19 }
 0xa1c   : > { %2170 = vst [vmem:[%s516_s21 + $0x8] sm:$0xff] %v2168_v20 }
 0xa1d   : > { %3032 = shalt.err (!%p3029_p10)
}
 0xa1e   : > { %s3033_s18 = scalar_lea.hbm %s3604_s17, 256  ;;  %s3037_s23 = scalar_lea.hbm %s3694_s20, 512 }
 0xa1f   : > { %p3034_p13 = scmp.ne.s32.totalorder %s3604_s17, %s3033_s18  ;;  %p3038_p8 = scmp.lt.s32.totalorder %s3604_s17, %s3694_s20 }
 0xa20   : > { %p3039_p5 = scmp.lt.s32.totalorder %s3037_s23, %s3033_s18 }
 0xa21   : > { %p3035_p4 = pnand %p3034_p13, %p3695_p0 }
 0xa22   : > { %p3040_p11 = por %p3039_p5, %p3038_p8 }
 0xa23   : > { %p3036_p6 = pneg %p3035_p4 }
 0xa25   : > { %p3041_p12 = pnand %p3040_p11, %p3036_p6 }
 0xa27   : > { %3044 = shalt.err (!%p3041_p12)
}
 0xa28   : > { %s3111_s22 = smov 128   ;;  %s3112_s14 = smov 8  }
 0xa29   : > { %2653 = dma.vmem_to_hbm [thread:$0]  (%p3695_p0), %s3606_s13, 256, %s3604_s17, %s2172_s1, %s3111_s22, %s3111_s22, %s3112_s14  }
 0xa2a PF: > { %s3696_s29 = sld [smem:[#allocation16_spill]]  ;;  %p3699_p3 = scmp.ge.s32.totalorder %s3091_s28, 2 }
 0xa2b   : > { %s3697_s11 = sld [smem:[#allocation17_spill]] }
 0xa30   : > { %s2200_s16 = sand.u32 1, %s3696_s29  }
 0xa31   : > { %p3698_p2 = scmp.ne.s32.totalorder %s3697_s11, 0  ;;  %s2201_s18 = scalar_lea.sflag [#allocation4], %s2200_s16 }
 0xa33   : > { %p2673_p7 = pnand %p3699_p3, %p3698_p2 }
 0xa35   : > { %p2674_p9 = pneg %p2673_p7 }
 0xa37   : > { %3074 = dma.done.wait (%p2674_p9), %s2201_s18, 256  }
 0xa38   : > { %3076 = vsyncadd (%p2674_p9), %s2201_s18, 4294967040  ;;  %p28_p1 = scmp.ge.s32.totalorder %s3271_s15, 4   ;;  %s3700_s25 = smov %s3083_s26 }
 0xa39   : > { %s3701_s26 = smov %s3087_s27  ;;  %s3702_s27 = smov %s3287_s30 }
 0xa3a   : > { %s3703_s28 = smov %s3271_s15  ;;  %30 = sbr.rel (!%p28_p1) target bundleno = 13 (0xd), region = 133 }
 0xa3f   :  { %2206 = vsyncpa [#allocation3], 1 }
 0xa40   :  { %2208 = vsyncpa [#allocation3 + $0x1], 1 }
 0xa41   :  { %2209 = vsyncpa [#allocation6], 1 }
 0xa42   :  { %2210 = vsyncpa [#allocation9], 1 }
 0xa43   :  { %2211 = vsyncpa [#allocation4], 1 }
 0xa44   :  { %2213 = vsyncpa [#allocation4 + $0x1], 1 }

// kernel: tpu_custom_call.1
= control target key start
LH: loop header
LB: loop body
LE: loop exit
PB: predicated region body
PF: predicated region fallthrough
CT: control target
= control target key end

     0   :  { %s3649_s0 = inlined_call_operand.hbm [shape: f32[4,8,128], index: 0, kind: input, shape index: {}]   ;;  %s3650_s1 = inlined_call_operand.hbm [shape: bf16[128,384], index: 1, kind: input, shape index: {}]   ;;  %s3651_s2 = inlined_call_operand.vmem [shape: f32[1,384], index: 2, kind: input, shape index: {}]   ;;  %s3652_s3 = inlined_call_operand.hbm [shape: bf16[128,128], index: 3, kind: input, shape index: {}]   ;;  %s3653_s4 = inlined_call_operand.vmem [shape: f32[1,128], index: 4, kind: input, shape index: {}]   ;;  %s3654_s5 = inlined_call_operand.vmem [shape: f32[1,128], index: 5, kind: input, shape index: {}]   ;;  %s3655_s6 = inlined_call_operand.vmem [shape: f32[1,128], index: 6, kind: input, shape index: {}]   ;;  %s3656_s7 = inlined_call_operand.vmem [shape: f32[1,128], index: 7, kind: input, shape index: {}]   ;;  %s3657_s8 = inlined_call_operand.vmem [shape: f32[1,128], index: 8, kind: input, shape index: {}]   ;;  %s3658_s9 = inlined_call_operand.hbm [shape: bf16[128,128], index: 9, kind: input, shape index: {}]   ;;  %s3659_s10 = inlined_call_operand.vmem [shape: f32[1,128], index: 10, kind: input, shape index: {}]   ;;  %s3660_s11 = inlined_call_operand.hbm [shape: bf16[128,128], index: 11, kind: input, shape index: {}]   ;;  %s3661_s12 = inlined_call_operand.vmem [shape: f32[1,128], index: 12, kind: input, shape index: {}]   ;;  %s3662_s13 = inlined_call_operand.hbm [shape: f32[4,8,128], index: 13, kind: output, shape index: {}]  }
   0x1   :  { %3670 = sst [smem:[#allocation18_spill]] %s3650_s1 }
   0x2   :  { %3671 = sst [smem:[#allocation19_spill]] %s3652_s3 }
   0x3   :  { %3672 = sst [smem:[#allocation20_spill]] %s3658_s9 }
   0x4   :  { %3673 = sst [smem:[#allocation21_spill]] %s3660_s11 }
   0x5   :  { %3674 = sst [smem:[#allocation22_spill]] %s3662_s13 }
   0x6   :  { %18 = vsyncpa [#allocation3], 0 }
   0x7   :  { %20 = vsyncpa [#allocation3 + $0x1], 0 }
   0x8   :  { %21 = vsyncpa [#allocation6], 0 }
   0x9   :  { %22 = vsyncpa [#allocation9], 0 }
   0xa   :  { %23 = vsyncpa [#allocation4], 0 }
   0xb   :  { %25 = vsyncpa [#allocation4 + $0x1], 0  ;;  %s3183_s25 = smov 0   ;;  %s3185_s26 = smov 0  }
   0xc   :  { %s3187_s27 = smov 0   ;;  %s3189_s28 = smov 0  }
   0xd LB: > { %3675 = sst [smem:[#allocation16_spill]] %s3079_s25  ;;  %s3204_s29 = sadd.s32 4294967295, %s3091_s28   ;;  %s3091_s28 = sphi %s3189_s28, %s3703_s28   ;;  %s3087_s27 = sphi %s3187_s27, %s3702_s27   ;;  %s3083_s26 = sphi %s3185_s26, %s3701_s26   ;;  %s3079_s25 = sphi %s3183_s25, %s3700_s25  }
   0xe   : > { %s2296_s30 = sadd.s32 4294967294, %s3091_s28   ;;  %p51_p0 = scmp.ne.s32.totalorder %s3083_s26, %s3079_s25 }
   0xf   : > { %p3666_p1 = scmp.eq.s32.totalorder %s3204_s29, 0  ;;  %p333_p3 = scmp.eq.s32.totalorder %s2296_s30, 1 }
  0x10   : > { %p2297_p5 = scmp.ge.s32.totalorder %s3091_s28, 1  ;;  %p340_p7 = scmp.lt.s32.totalorder %s3091_s28, 3 }
  0x11   : > { %p3213_p4 = por %p3666_p1, %p51_p0  ;;  %p3218_p6 = por %p333_p3, %p51_p0 }
  0x12   : > { %p3223_p8 = pnand %p2297_p5, %p340_p7  ;;  %s3093_s17 = smov [#allocation5]  }
  0x13   : > { %s3676_s14 = scalar_select %p3213_p4, 1, 0 }
  0x14   : > { %s3677_s15 = scalar_select %p3218_p6, 1, 0 }
  0x15   : > { %s3679_s16 = scalar_select %p3223_p8, 1, 0 }
  0x16   : > { %3678 = sst [smem:[#allocation17_spill]] %s3677_s15  ;;  %s352_s18 = sshll.u32 %s3093_s17, 4  ;;  %s353_s18 = int_to_ptr.vmem [resolvable:$true] %s352_s18 }
  0x17   : > { %p2655_p9 = pneg %p3223_p8  ;;  %s3094_s20 = smov [#allocation8]  }
  0x18   : > { %s396_s21 = sshll.u32 %s3094_s20, 4  ;;  %s2898_s22 = scalar_lea.vmem %s353_s18, 3072  ;;  %s397_s21 = int_to_ptr.vmem [resolvable:$true] %s396_s21 }
  0x19   : > { %p3232_p11 = pnand %p2655_p9, %p3666_p1  ;;  %p2899_p13 = scmp.ne.s32.totalorder %s353_s18, %s2898_s22 }
  0x1a   : > { %p2906_p5 = scmp.lt.s32.totalorder %s353_s18, %s353_s18  ;;  %p2907_p7 = scmp.lt.s32.totalorder %s2898_s22, %s2898_s22 }
  0x1b   : > { %p2889_p12 = pneg %p3232_p11 }
  0x1c   : > { %p2908_p10 = por %p2907_p7, %p2906_p5 }
  0x1d   : > { %p2901_p0 = pnand %p2899_p13, %p2889_p12 }
  0x1f   : > { %p2902_p3 = pneg %p2901_p0 }
  0x21   : > { %p2909_p2 = pnand %p2908_p10, %p2902_p3 }
  0x23   : > { %2912 = shalt.err (!%p2909_p2)
}
  0x24   : > { %s3095_s23 = smov 192   ;;  %s3096_s24 = smov 12  }
  0x25   : > { %s3681_s1 = sld [smem:[#allocation18_spill]]  ;;  %s3097_s20 = smov [#allocation7]  }
  0x26   : > { %s368_s15 = sshll.u32 %s3097_s20, 4  ;;  %s2924_s25 = scalar_lea.vmem %s397_s21, 1024  ;;  %s369_s15 = int_to_ptr.vmem [resolvable:$true] %s368_s15 }
  0x27   : > { %p2925_p9 = scmp.ne.s32.totalorder %s397_s21, %s2924_s25  ;;  %p2932_p10 = scmp.lt.s32.totalorder %s397_s21, %s397_s21 }
  0x28   : > { %p2933_p2 = scmp.lt.s32.totalorder %s2924_s25, %s2924_s25 }
  0x29   : > { %p2927_p13 = pnand %p2925_p9, %p2889_p12 }
  0x2a   : > { %p2934_p3 = por %p2933_p2, %p2932_p10 }
  0x2b   : > { %2658 = dma.hbm_to_vmem [thread:$0]  (!%p3232_p11), %s3681_s1, 3072, %s353_s18, [#allocation6], %s3095_s23, %s3095_s23, %s3096_s24  }
  0x2c   : > { %p2928_p0 = pneg %p2927_p13 }
  0x2e   : > { %p2935_p5 = pnand %p2934_p3, %p2928_p0 }
  0x30   : > { %2938 = shalt.err (!%p2935_p5)
}
  0x31   : > { %s3098_s22 = smov 64   ;;  %s3099_s13 = smov 4  }
  0x32   : > { %s3682_s9 = sld [smem:[#allocation20_spill]]  ;;  %s2950_s24 = scalar_lea.vmem %s369_s15, 1024 }
  0x33   : > { %p2951_p7 = scmp.ne.s32.totalorder %s369_s15, %s2950_s24  ;;  %p2958_p1 = scmp.lt.s32.totalorder %s369_s15, %s369_s15 }
  0x34   : > { %p2959_p10 = scmp.lt.s32.totalorder %s2950_s24, %s2950_s24 }
  0x35   : > { %p2953_p9 = pnand %p2951_p7, %p2889_p12 }
  0x36   : > { %p2960_p0 = por %p2959_p10, %p2958_p1 }
  0x37   : > { %p2954_p13 = pneg %p2953_p9 }
  0x38   : > { %2664 = dma.hbm_to_vmem [thread:$0]  (!%p3232_p11), %s3682_s9, 1024, %s397_s21, [#allocation9], %s3098_s22, %s3098_s22, %s3099_s13  }
  0x39   : > { %p2961_p2 = pnand %p2960_p0, %p2954_p13 }
  0x3b   : > { %2964 = shalt.err (!%p2961_p2)
}
  0x3c   : > { %s3683_s3 = sld [smem:[#allocation19_spill]]  ;;  %s3100_s21 = smov [#allocation10]  }
  0x3d   : > { %s412_s17 = sshll.u32 %s3100_s21, 4  ;;  %s413_s17 = int_to_ptr.vmem [resolvable:$true] %s412_s17 }
  0x3e   : > { %s2976_s20 = scalar_lea.vmem %s413_s17, 1024  ;;  %p2984_p9 = scmp.lt.s32.totalorder %s413_s17, %s413_s17 }
  0x3f   : > { %p2977_p3 = scmp.ne.s32.totalorder %s413_s17, %s2976_s20  ;;  %p2985_p1 = scmp.lt.s32.totalorder %s2976_s20, %s2976_s20 }
  0x41   : > { %p2979_p5 = pnand %p2977_p3, %p2889_p12  ;;  %p2986_p13 = por %p2985_p1, %p2984_p9 }
  0x42   : > { %2661 = dma.hbm_to_vmem [thread:$0]  (!%p3232_p11), %s3683_s3, 1024, %s369_s15, [#allocation6], %s3098_s22, %s3098_s22, %s3099_s13  }
  0x43   : > { %p2980_p7 = pneg %p2979_p5 }
  0x45   : > { %p2987_p10 = pnand %p2986_p13, %p2980_p7 }
  0x47   : > { %2990 = shalt.err (!%p2987_p10)
}
  0x48   : > { %s3684_s11 = sld [smem:[#allocation21_spill]]  ;;  %s3271_s15 = sadd.s32 1, %s3091_s28  }
  0x49   : > { %s38_s24 = sadd.s32 1, %s3087_s27  ;;  %s35_s19 = ssub.s32 %s3091_s28, %s3271_s15 }
  0x4a   : > { %p45_p12 = scmp.ne.s32.totalorder %s3087_s27, %s3083_s26  ;;  %p36_p0 = scmp.eq.s32.totalorder %s35_s19, 0 }
  0x4b   : > { %p46_p2 = scmp.eq.s32.totalorder %s3091_s28, 0  ;;  %p3685_p3 = scmp.eq.s32.totalorder %s3204_s29, 1 }
  0x4c   : > { %p2680_p7 = scmp.lt.s32.totalorder %s3091_s28, 2  ;;  %s429_s21 = sand.u32 1, %s3087_s27  }
  0x4d   : > { %p3281_p5 = por %p3685_p3, %p45_p12  ;;  %p47_p9 = por %p46_p2, %p45_p12 }
  0x4e   : > { %2667 = dma.hbm_to_vmem [thread:$0]  (!%p3232_p11), %s3684_s11, 1024, %s413_s17, [#allocation9], %s3098_s22, %s3098_s22, %s3099_s13  }
  0x4f   : > { %s3686_s25 = scalar_select %p3281_p5, 1, 0 }
  0x50   : > { %s3287_s30 = scalar_select %p36_p0, %s3087_s27, %s38_s24  }
  0x51   : > { %s2303_s20 = sshll.u32 %s429_s21, 4  ;;  %s2389_s13 = sshll.u32 %s3091_s28, 8 }
  0x52   : > { %s3294_s18 = scalar_lea.hbm %s3649_s0, %s2389_s13  ;;  %s433_s23 = scalar_lea.vmem [#allocation2], %s2303_s20 }
  0x53   : > { %s440_s19 = sshll.u32 %s433_s23, 4  ;;  %p3298_p11 = pnand %p2680_p7, %p47_p9  ;;  %s3296_s19 = int_to_ptr.vmem [resolvable:$true] %s440_s19 }
  0x54   : > { %s3302_s24 = scalar_lea.sflag [#allocation3], %s429_s21  ;;  %s2991_s3 = scalar_lea.hbm %s3294_s18, 256 }
  0x55   : > { %p2992_p1 = scmp.ne.s32.totalorder %s3294_s18, %s2991_s3  ;;  %p2993_p13 = pneg %p3298_p11 }
  0x56   : > { %s2996_s20 = scalar_lea.hbm %s3649_s0, 512  ;;  %p2997_p0 = scmp.lt.s32.totalorder %s3294_s18, %s3649_s0 }
  0x57   : > { %p2994_p10 = pnand %p2993_p13, %p2992_p1  ;;  %p2998_p2 = scmp.lt.s32.totalorder %s2996_s20, %s2991_s3 }
  0x59   : > { %p2995_p12 = pneg %p2994_p10  ;;  %p2999_p3 = por %p2998_p2, %p2997_p0 }
  0x5b   : > { %p3000_p7 = pnand %p2999_p3, %p2995_p12 }
  0x5d   : > { %3003 = shalt.err (!%p3000_p7)
}
  0x5e   : > { %s3004_s21 = scalar_lea.vmem %s3296_s19, 256  ;;  %s3101_s9 = smov [#allocation2]  }
  0x5f   : > { %p3005_p9 = scmp.ne.s32.totalorder %s3296_s19, %s3004_s21  ;;  %s3009_s11 = sshll.u32 %s3101_s9, 4  ;;  %s3010_s11 = int_to_ptr.vmem [resolvable:$false] %s3009_s11 }
  0x60   : > { %s3011_s13 = scalar_lea.vmem %s3010_s11, 512  ;;  %p3012_p10 = scmp.lt.s32.totalorder %s3296_s19, %s3010_s11 }
  0x61   : > { %p3007_p6 = pnand %p3005_p9, %p2993_p13  ;;  %p3013_p5 = scmp.lt.s32.totalorder %s3011_s13, %s3004_s21 }
  0x63   : > { %p3008_p1 = pneg %p3007_p6  ;;  %p3014_p4 = por %p3013_p5, %p3012_p10 }
  0x65   : > { %p3015_p8 = pnand %p3014_p4, %p3008_p1 }
  0x67   : > { %3018 = shalt.err (!%p3015_p8)
}
  0x68   : > { %s3102_s3 = smov 128   ;;  %s3103_s22 = smov 8  }
  0x69   : > { %2671 = dma.hbm_to_vmem [thread:$0]  (!%p3298_p11), %s3294_s18, 256, %s3296_s19, %s3302_s24, %s3102_s3, %s3102_s3, %s3103_s22  }
  0x6a   : > { %p3688_p13 = scmp.ne.s32.totalorder %s3679_s16, 0 }
  0x6b   : > { %s3326_s9 = sand.u32 (!%p3688_p13), 1, %s3083_s26   ;;  %p3689_p4 = scmp.ne.s32.totalorder (!%p3688_p13), %s3676_s14, 0 }
  0x6c   : > { %452 = sbr.rel (%p3688_p13) target bundleno = 2602 (0xa2a), region = 72  ;;  %s2307_s11 = sshll.u32 (!%p3688_p13), %s3326_s9, 4 }
  0x6d   : > { %s455_s20 = scalar_lea.sflag (!%p3688_p13), [#allocation3], %s3326_s9  ;;  %s3332_s17 = scalar_lea.vmem (!%p3688_p13), [#allocation2], %s2307_s11 }
  0x71   : > { %3062 = dma.done.wait (%p3689_p4), %s455_s20, 256  }
  0x72   : > { %3064 = vsyncadd (%p3689_p4), %s455_s20, 4294967040  ;;  %p3690_p6 = scmp.eq.s32.totalorder %s3204_s29, 0 }
  0x74   : > { %3066 = dma.done.wait (%p3690_p6), [#allocation6], 4096   ;;  %p3691_p8 = pmov %p3690_p6 }
  0x75   : > { %p3692_p5 = pmov %p3690_p6 }
  0x76   : > { %3068 = vsyncadd (%p3691_p8), [#allocation6], 4294963200 }
  0x77   : > { %3070 = dma.done.wait (%p3692_p5), [#allocation9], 2048   ;;  %p3693_p11 = pmov %p3692_p5 }
  0x78   : > { %v3104_v0 = vmov 0   ;;  %v3105_v1 = vmov 0.0   ;;  %v2791_v2 = vld [vmem:[#allocation5 + $0xac] ss:$12 sps:$4 sm:$0xff]   ;;  %v2793_v3 = vld [vmem:[#allocation5 + $0xa8] ss:$12 sps:$4 sm:$0xff]   ;;  %v557_v29 = vlaneseq }
  0x79   : > { %3072 = vsyncadd (%p3693_p11), [#allocation9], 4294965248  ;;  %732 = vmatprep.mubr.bf16.mxu0 %v3104_v0  ;;  %2459 = vmatprep.subr.bf16.mxu1 %v3105_v1  ;;  %v2794_v4 = vld [vmem:[#allocation5 + $0x94] ss:$12 sps:$4 sm:$0xff]   ;;  %v2796_v5 = vld [vmem:[#allocation5 + $0x90] ss:$12 sps:$4 sm:$0xff]  }
  0x7a   : > { %700 = vmatprep.subr.bf16.mxu0 %v2791_v2  ;;  %v2797_v6 = vld [vmem:[#allocation5 + $0x7c] ss:$12 sps:$4 sm:$0xff]   ;;  %v2799_v7 = vld [vmem:[#allocation5 + $0x78] ss:$12 sps:$4 sm:$0xff]   ;;  %v2802_v9 = vld [vmem:[#allocation5 + $0x60] ss:$12 sps:$4 sm:$0xff]  }
  0x7b   : > { %701 = vmatpush1.bf16.msra.mxu0 %v2793_v3  ;;  %v2800_v8 = vld [vmem:[#allocation5 + $0x64] ss:$12 sps:$4 sm:$0xff]   ;;  %v2803_v10 = vld [vmem:[#allocation5 + $0x4c] ss:$12 sps:$4 sm:$0xff]   ;;  %v2805_v13 = vld [vmem:[#allocation5 + $0x48] ss:$12 sps:$4 sm:$0xff]  }
  0x7c   : > { %702 = vmatprep.subr.bf16.mxu0 %v2794_v4  ;;  %v2815_v11 = vld [vmem:[#allocation5 + $0xb0] ss:$12 sps:$4 sm:$0xff]   ;;  %v2816_v12 = vld [vmem:[#allocation5 + $0x98] ss:$12 sps:$4 sm:$0xff]   ;;  %v2806_v14 = vld [vmem:[#allocation5 + $0x34] ss:$12 sps:$4 sm:$0xff]  }
  0x7d   : > { %2460 = vmatpush3.bf16.msra.mxu1 %v2815_v11  ;;  %v2808_v15 = vld [vmem:[#allocation5 + $0x30] ss:$12 sps:$4 sm:$0xff]   ;;  %v2817_v16 = vld [vmem:[#allocation5 + $0x80] ss:$12 sps:$4 sm:$0xff]   ;;  %v2818_v18 = vld [vmem:[#allocation5 + $0x68] ss:$12 sps:$4 sm:$0xff]  }
  0x7e   : > { %2461 = vmatprep.subr.bf16.mxu1 %v3105_v1  ;;  %v2809_v17 = vld [vmem:[#allocation5 + $0x1c] ss:$12 sps:$4 sm:$0xff]   ;;  %v2811_v19 = vld [vmem:[#allocation5 + $0x18] ss:$12 sps:$4 sm:$0xff]   ;;  %v2814_v22 = vld [vmem:[#allocation5] ss:$12 sps:$4 sm:$0xff]  }
  0x7f   : > { %703 = vmatpush1.bf16.msra.mxu0 %v2796_v5  ;;  %v2812_v20 = vld [vmem:[#allocation5 + $0x4] ss:$12 sps:$4 sm:$0xff]   ;;  %v3354_v24 = vld [vmem:[%s3332_s17 + $0x8] sm:$0xff]  ;;  %vm3106_vm0 = vmmov 0   ;;  %v3371_v30 = vshrl.u32 %v557_v29, 7  ;;  %vm868_vm1 = vcmask 261120  }
  0x80   : > { %704 = vmatprep.subr.bf16.mxu0 %v2797_v6  ;;  %v2819_v21 = vld [vmem:[#allocation5 + $0x50] ss:$12 sps:$4 sm:$0xff]   ;;  %v2820_v25 = vld [vmem:[#allocation5 + $0x38] ss:$12 sps:$4 sm:$0xff]   ;;  %v2821_v27 = vld [vmem:[#allocation5 + $0x20] ss:$12 sps:$4 sm:$0xff]   ;;  %2475 = vmatprep.mubr.msk.bf16.mxu1 %vm3106_vm0, %v3105_v1 }
  0x81   : > { %2462 = vmatpush3.bf16.msra.mxu1 %v2816_v12  ;;  %v3351_v23 = vld [vmem:[%s3332_s17] sm:$0xff]  ;;  %v563_v31 = vsub.s32 1, %v3371_v30  ;;  %v559_v33 = vsub.s32 0, %v3371_v30  ;;  %s3107_s16 = smov 96   ;;  %s3108_s18 = smov 64   ;;  %v567_v11 = vsub.s32 2, %v3371_v30 }
  0x82   : > { %2463 = vmatprep.subr.bf16.mxu1 %v3105_v1  ;;  %v522_v26 = vpack.c.bf16 %v3354_v24, %v3351_v23  ;;  %v2822_v28 = vld [vmem:[#allocation5 + $0x8] ss:$12 sps:$4 sm:$0xff]   ;;  %v3377_v32 = vld [vmem:[%s3651_s2] sm:$0x7]  ;;  %s3109_s19 = smov 32   ;;  %vm1337_vm2 = vcmask 1043456  }
  0x83   : > { %705 = vmatpush1.bf16.msra.mxu0 %v2799_v7  ;;  %v564_v34 = vrot.slane %v3377_v32, %v563_v31  ;;  %v560_v37 = vrot.slane %v3377_v32, %v559_v33  ;;  %vm1237_vm3 = vcmask 64512   ;;  %vm1729_vm4 = vcmask 523264   ;;  %s2390_s23 = sshll.u32 %s3204_s29, 8  ;;  %s516_s21 = scalar_lea.vmem [#allocation11], %s2307_s11 }
  0x84   : > { %706 = vmatprep.subr.bf16.mxu0 %v2800_v8  ;;  %vm1732_vm5 = vcmask 785408   ;;  %s2185_s13 = sshll.u32 %s516_s21, 4  ;;  %s3694_s20 = sld [smem:[#allocation22_spill]]  ;;  %s3606_s13 = int_to_ptr.vmem [resolvable:$true] %s2185_s13 }
  0x85   : > { %2464 = vmatpush3.bf16.msra.mxu1 %v2817_v16  ;;  %s2172_s1 = scalar_lea.sflag [#allocation4], %s3326_s9  ;;  %s3019_s14 = scalar_lea.vmem %s3606_s13, 256 }
  0x86   : > { %2465 = vmatprep.subr.bf16.mxu1 %v3105_v1  ;;  %p3020_p12 = scmp.ne.s32.totalorder %s3606_s13, %s3019_s14  ;;  %p3695_p0 = scmp.ne.s32.totalorder %s3686_s25, 0 }
  0x87   : > { %707 = vmatpush1.bf16.msra.mxu0 %v2802_v9  ;;  %s3110_s29 = smov [#allocation11]  }
  0x88   : > { %708 = vmatprep.subr.bf16.mxu0 %v2803_v10  ;;  %p3021_p2 = pnand %p3020_p12, %p3695_p0  ;;  %s3023_s11 = sshll.u32 %s3110_s29, 4  ;;  %s3024_s11 = int_to_ptr.vmem [resolvable:$false] %s3023_s11 }
  0x89   : > { %2466 = vmatpush3.bf16.msra.mxu1 %v2818_v18  ;;  %p3026_p7 = scmp.lt.s32.totalorder %s3606_s13, %s3024_s11 }
  0x8a   : > { %2467 = vmatprep.subr.bf16.mxu1 %v3105_v1  ;;  %s3604_s17 = scalar_lea.hbm %s3694_s20, %s2390_s23  ;;  %p3022_p3 = pneg %p3021_p2 }
  0x8b   : > { %709 = vmatpush1.bf16.msra.mxu0 %v2805_v13 }
  0x8c   : > { %710 = vmatprep.subr.bf16.mxu0 %v2806_v14 }
  0x8d   : > { %2468 = vmatpush3.bf16.msra.mxu1 %v2819_v21 }
  0x8e   : > { %2469 = vmatprep.subr.bf16.mxu1 %v3105_v1 }
  0x8f   : > { %711 = vmatpush1.bf16.msra.mxu0 %v2808_v15  ;;  %v568_v15 = vrot.slane %v3377_v32, %v567_v11 }
  0x90   : > { %712 = vmatprep.subr.bf16.mxu0 %v2809_v17 }
  0x91   : > { %2470 = vmatpush3.bf16.msra.mxu1 %v2820_v25 }
  0x92   : > { %2471 = vmatprep.subr.bf16.mxu1 %v3105_v1 }
  0x93   : > { %713 = vmatpush1.bf16.msra.mxu0 %v2811_v19 }
  0x94   : > { %714 = vmatprep.subr.bf16.mxu0 %v2812_v20 }
  0x95   : > { %2472 = vmatpush3.bf16.msra.mxu1 %v2821_v27 }
  0x96   : > { %2473 = vmatprep.subr.bf16.mxu1 %v3105_v1 }
  0x97   : > { %715 = vmatpush1.bf16.msra.mxu0 %v2814_v22 }
  0x98   : > { %2503 = vmatprep.subr.bf16.mxu0 %v3105_v1 }
  0x99   : > { %2474 = vmatpush3.bf16.msra.mxu1 %v2822_v28 }
  0x9a   : > { %733 = vmatmul.mubr.bf16.vlgmr.msra.gmra.mxu0 %v522_v26  ;;  %2479 = vmatprep.subr.bf16.mxu1 %v3105_v1 }
  0x9b   : > { %2505 = vmatprep.mubr.msk.bf16.mxu0 %vm3106_vm0, %v3105_v1 }
  0x9c   : > { %2476 = vmatmul.mubr.bf16.vlgmr.msra.gmra.mxu1 %v522_v26 }
  0x9d   : > { %2481 = vmatprep.mubr.msk.bf16.mxu1 %vm3106_vm0, %v3105_v1 }
 0x15a   : > { %v734_v35 = vpop.f32.mrf.mxu0 }
 0x15b   : > { %v735_v43 = vadd.f32 %v734_v35, %v560_v37 }
 0x15c   : > { %v736_v36 = vpop.f32.mrf.mxu0  ;;  %v777_v53 = vpop.f32.mrf.mxu1 }
 0x15d   : > { %v737_v38 = vadd.f32 %v736_v36, %v564_v34  ;;  %v804_v50 = vpack.c.bf16 %v735_v43, %v735_v43  ;;  %v3412_v22 = vadd.f32 %v777_v53, %v568_v15 }
 0x15e   : > { %v738_v39 = vpop.f32.mrf.mxu0  ;;  %v2477_v54 = vpop.f32.mrf.mxu1 }
 0x15f   : > { %v739_v40 = vadd.f32 %v738_v39, %v560_v37  ;;  %814 = vrot.lane.b32.xlu0 %v737_v38, %s3107_s16  ;;  %v832_v41 = vpack.c.bf16 %v737_v38, %v737_v38  ;;  %v860_v30 = vpack.c.bf16 %v3412_v22, %v3412_v22 }
 0x160   : > { %v740_v42 = vpop.f32.mrf.mxu0  ;;  %v780_v55 = vpop.f32.mrf.mxu1 }
 0x161   : > { %v741_v44 = vadd.f32 %v740_v42, %v564_v34  ;;  %788 = vrot.lane.b32.xlu1 %v739_v40, %s3107_s16  ;;  %v873_v45 = vsel %vm868_vm1, %v832_v41, 0  ;;  %v2746_v49 = vpack.i.bf16 %v739_v40, %v735_v43  ;;  %v805_v52 = vpack.c.bf16 %v739_v40, %v739_v40 }
 0x162   : > { %2480 = vmatpush3.bf16.xpose.msra.mxu1 %v873_v45  ;;  %v2478_v56 = vpop.f32.mrf.mxu1  ;;  %v3424_v32 = vadd.f32 %v780_v55, %v568_v15  ;;  %v1339_v35 = vsel %vm1337_vm2, %v860_v30, 0 }
 0x163   : > { %v2741_v46 = vpack.i.bf16 %v741_v44, %v737_v38  ;;  %v2736_v47 = vpack.i.bf16 %v741_v44, %v735_v43  ;;  %2485 = vmatprep.subr.bf16.mxu1 %v3105_v1  ;;  %v833_v48 = vpack.c.bf16 %v741_v44, %v741_v44 }
 0x164   : > { %v861_v37 = vpack.c.bf16 %v3424_v32, %v3424_v32 }
 0x165   : > { %2742 = vrot.lane.b32.xlu1 %v2741_v46, %s3108_s18  ;;  %2737 = vrot.lane.b32.xlu0 %v2736_v47, %s3107_s16  ;;  %v919_v51 = vsel %vm868_vm1, %v833_v48, 0 }
 0x166   : > { %v1385_v39 = vsel %vm1337_vm2, %v861_v37, 0 }
 0x169   : > { %2752 = vrot.lane.b32.xlu1 %v2741_v46, %s3109_s19  ;;  %2747 = vrot.lane.b32.xlu0 %v2746_v49, %s3108_s18 }
 0x16a   : > { %2482 = vmatmul.mubr.msk.bf16.vlgmr.msra.gmra.mxu1 %vm868_vm1, %v804_v50 }
 0x16b   : > { %2486 = vmatpush3.bf16.xpose.msra.mxu1 %v919_v51  ;;  %2487 = vmatprep.mubr.msk.bf16.mxu1 %vm3106_vm0, %v3105_v1 }
 0x16c   : > { %2491 = vmatprep.subr.bf16.mxu1 %v3105_v1 }
 0x16d   : > { %2757 = vrot.lane.b32.xlu0 %v2746_v49, %s3109_s19 }
 0x172   : > { %2488 = vmatmul.mubr.msk.bf16.vlgmr.msra.gmra.mxu1 %vm868_vm1, %v805_v52 }
 0x173   : > { %2493 = vmatprep.mubr.msk.bf16.mxu1 %vm3106_vm0, %v3105_v1 }
 0x1d1   : > { %v815_v57 = vpop.permute.xlu0 %814 }
 0x1d2   : > { %v834_v58 = vpack.c.bf16 %v815_v57, %v815_v57 }
 0x1d3   : > { %v789_v59 = vpop.permute.xlu1 %788 }
 0x1d4   : > { %v965_v60 = vsel %vm868_vm1, %v834_v58, 0  ;;  %v807_v17 = vpack.c.bf16 %v789_v59, %v789_v59 }
 0x1d5   : > { %2492 = vmatpush3.bf16.xpose.msra.mxu1 %v965_v60 }
 0x1d6   : > { %2497 = vmatprep.subr.bf16.mxu1 %v3105_v1 }
 0x1d7   : > { %v2743_v61 = vpop.permute.xlu1 %2742  ;;  %v2738_v62 = vpop.permute.xlu0 %2737 }
 0x1d8   : > { %v2744_v63 = vunpack.i.l.bf16 %v2743_v61  ;;  %v2740_v0 = vunpack.i.h.bf16 %v2738_v62  ;;  %v2739_v2 = vunpack.i.l.bf16 %v2738_v62  ;;  %v2745_v7 = vunpack.i.h.bf16 %v2743_v61 }
 0x1da   : > { %v836_v3 = vpack.c.bf16 %v2744_v63, %v2744_v63  ;;  %v835_v4 = vpack.c.bf16 %v2740_v0, %v2740_v0  ;;  %v806_v5 = vpack.c.bf16 %v2739_v2, %v2739_v2  ;;  %v837_v14 = vpack.c.bf16 %v2745_v7, %v2745_v7 }
 0x1db   : > { %v2753_v6 = vpop.permute.xlu1 %2752  ;;  %v2748_v8 = vpop.permute.xlu0 %2747 }
 0x1dc   : > { %2494 = vmatmul.mubr.msk.bf16.vlgmr.msra.gmra.mxu1 %vm868_vm1, %v806_v5  ;;  %v1011_v9 = vsel %vm868_vm1, %v835_v4, 0  ;;  %v1057_v10 = vsel %vm868_vm1, %v836_v3, 0  ;;  %v2754_v12 = vunpack.i.l.bf16 %v2753_v6  ;;  %v2749_v13 = vunpack.i.l.bf16 %v2748_v8 }
 0x1dd   : > { %2499 = vmatprep.mubr.msk.bf16.mxu1 %vm3106_vm0, %v3105_v1  ;;  %2498 = vmatpush3.bf16.xpose.msra.mxu1 %v1011_v9  ;;  %v2755_v19 = vunpack.i.h.bf16 %v2753_v6  ;;  %v1103_v21 = vsel %vm868_vm1, %v837_v14, 0  ;;  %v2750_v26 = vunpack.i.h.bf16 %v2748_v8 }
 0x1de   : > { %2504 = vmatpush3.bf16.xpose.msra.mxu0 %v1057_v10  ;;  %2509 = vmatprep.subr.bf16.mxu1 %v3105_v1  ;;  %v838_v16 = vpack.c.bf16 %v2754_v12, %v2754_v12  ;;  %v808_v18 = vpack.c.bf16 %v2749_v13, %v2749_v13 }
 0x1df   : > { %2515 = vmatprep.subr.bf16.mxu0 %v3105_v1  ;;  %v2758_v20 = vpop.permute.xlu0 %2757  ;;  %v839_v28 = vpack.c.bf16 %v2755_v19, %v2755_v19  ;;  %v809_v31 = vpack.c.bf16 %v2750_v26, %v2750_v26 }
 0x1e0   : > { %v1149_v25 = vsel %vm868_vm1, %v838_v16, 0  ;;  %v2759_v27 = vunpack.i.l.bf16 %v2758_v20  ;;  %v2760_v36 = vunpack.i.h.bf16 %v2758_v20 }
 0x1e1   : > { %v1195_v34 = vsel %vm868_vm1, %v839_v28, 0 }
 0x1e2   : > { %v810_v33 = vpack.c.bf16 %v2759_v27, %v2759_v27  ;;  %v811_v38 = vpack.c.bf16 %v2760_v36, %v2760_v36 }
 0x1e4   : > { %2500 = vmatmul.mubr.msk.bf16.vlgmr.msra.gmra.mxu1 %vm868_vm1, %v807_v17 }
 0x1e5   : > { %2506 = vmatmul.mubr.msk.bf16.vlgmr.msra.gmra.mxu0 %vm868_vm1, %v808_v18  ;;  %2510 = vmatpush3.bf16.xpose.msra.mxu1 %v1103_v21 }
 0x1e6   : > { %2516 = vmatpush3.bf16.xpose.msra.mxu0 %v1149_v25  ;;  %2511 = vmatprep.mubr.msk.bf16.mxu1 %vm3106_vm0, %v3105_v1 }
 0x1e7   : > { %2517 = vmatprep.mubr.msk.bf16.mxu0 %vm3106_vm0, %v3105_v1  ;;  %2521 = vmatprep.subr.bf16.mxu1 %v3105_v1 }
 0x1e8   : > { %2527 = vmatprep.subr.bf16.mxu0 %v3105_v1 }
 0x1ec   : > { %2512 = vmatmul.mubr.msk.bf16.vlgmr.msra.gmra.mxu1 %vm868_vm1, %v809_v31 }
 0x1ed   : > { %2518 = vmatmul.mubr.msk.bf16.vlgmr.msra.gmra.mxu0 %vm868_vm1, %v810_v33  ;;  %2522 = vmatpush3.bf16.xpose.msra.mxu1 %v1195_v34 }
 0x1ee   : > { %2523 = vmatprep.mubr.msk.bf16.mxu1 %vm3106_vm0, %v3105_v1  ;;  %2533 = vmatprep.subr.bf16.mxu1 %v3105_v1 }
 0x1ef   : > { %2528 = vmatpush3.bf16.msra.mxu0 %v1339_v35  ;;  %2529 = vmatprep.mubr.msk.bf16.mxu0 %vm3106_vm0, %v3105_v1 }
 0x1f0   : > { %2539 = vmatprep.subr.bf16.mxu0 %v3105_v1 }
 0x1f4   : > { %2524 = vmatmul.mubr.msk.bf16.vlgmr.msra.gmra.mxu1 %vm868_vm1, %v811_v38 }
 0x1f5   : > { %2534 = vmatpush3.bf16.msra.mxu1 %v1385_v39  ;;  %2535 = vmatprep.mubr.msk.bf16.mxu1 %vm3106_vm0, %v3105_v1 }
 0x1f6   : > { %2545 = vmatprep.subr.bf16.mxu1 %v3105_v1 }
 0x22a   : > { %v909_v40 = vpop.f32.mrf.mxu1 }
 0x22b   : > { %v1238_v41 = vsel %vm1237_vm3, %v909_v40, -inf }
 0x22c   : > { %1239 = vmax.xlane.f32.xlu1 %v1238_v41  ;;  %v2483_v42 = vpop.f32.mrf.mxu1 }
 0x22e   : > { %v912_v43 = vpop.f32.mrf.mxu1 }
 0x230   : > { %v2484_v44 = vpop.f32.mrf.mxu1 }
 0x232   : > { %v955_v45 = vpop.f32.mrf.mxu1 }
 0x233   : > { %v1241_v46 = vsel %vm1237_vm3, %v955_v45, -inf }
 0x234   : > { %1242 = vmax.xlane.f32.xlu0 %v1241_v46  ;;  %v2489_v47 = vpop.f32.mrf.mxu1 }
 0x236   : > { %v958_v48 = vpop.f32.mrf.mxu1 }
 0x238   : > { %v2490_v49 = vpop.f32.mrf.mxu1 }
 0x29c   : > { %v1001_v50 = vpop.f32.mrf.mxu1 }
 0x29d   : > { %v1244_v51 = vsel %vm1237_vm3, %v1001_v50, -inf }
 0x29e   : > { %1245 = vmax.xlane.f32.xlu0 %v1244_v51  ;;  %v2495_v52 = vpop.f32.mrf.mxu1 }
 0x2a0   : > { %v1004_v53 = vpop.f32.mrf.mxu1 }
 0x2a2   : > { %v2496_v54 = vpop.f32.mrf.mxu1 }
 0x2a3   : > { %v2766_v54 = vpack.i.bf16 %v3424_v32, %v3412_v22 }
 0x2a4   : > { %v1047_v55 = vpop.f32.mrf.mxu1 }
 0x2a5   : > { %v1093_v56 = vpop.f32.mrf.mxu0  ;;  %v1247_v57 = vsel %vm1237_vm3, %v1047_v55, -inf }
 0x2a6   : > { %v1250_v58 = vsel %vm1237_vm3, %v1093_v56, -inf  ;;  %1248 = vmax.xlane.f32.xlu1 %v1247_v57  ;;  %v2501_v59 = vpop.f32.mrf.mxu1 }
 0x2a7   : > { %v2507_v60 = vpop.f32.mrf.mxu0  ;;  %1251 = vmax.xlane.f32.xlu0 %v1250_v58 }
 0x2a8   : > { %v1050_v61 = vpop.f32.mrf.mxu1 }
 0x2a9   : > { %v1096_v62 = vpop.f32.mrf.mxu0 }
 0x2aa   : > { %v2502_v63 = vpop.f32.mrf.mxu1 }
 0x2ab   : > { %v2508_v0 = vpop.f32.mrf.mxu0 }
 0x2ac   : > { %v3448_v2 = vpop.f32.mrf.mxu1 }
 0x2ad   : > { %v1185_v3 = vpop.f32.mrf.mxu0  ;;  %v1253_v4 = vsel %vm1237_vm3, %v3448_v2, -inf }
 0x2ae   : > { %v1256_v5 = vsel %vm1237_vm3, %v1185_v3, -inf  ;;  %1254 = vmax.xlane.f32.xlu1 %v1253_v4  ;;  %v2513_v6 = vpop.f32.mrf.mxu1 }
 0x2af   : > { %v2519_v7 = vpop.f32.mrf.mxu0  ;;  %1257 = vmax.xlane.f32.xlu0 %v1256_v5 }
 0x2b0   : > { %v1142_v8 = vpop.f32.mrf.mxu1 }
 0x2b1   : > { %v1188_v9 = vpop.f32.mrf.mxu0 }
 0x2b2   : > { %v2514_v10 = vpop.f32.mrf.mxu1 }
 0x2b3   : > { %v2520_v11 = vpop.f32.mrf.mxu0 }
 0x2b4   : > { %v3453_v13 = vpop.f32.mrf.mxu1 }
 0x2b5   : > { %v1240_v12 = vpop.xlane.xlu1 %1239  ;;  %v1259_v15 = vsel %vm1237_vm3, %v3453_v13, -inf }
 0x2b6   : > { %v1262_v14 = vsub.f32 %v909_v40, %v1240_v12  ;;  %1260 = vmax.xlane.f32.xlu1 %v1259_v15  ;;  %v2525_v16 = vpop.f32.mrf.mxu1 }
 0x2b8   : > { %v1270_v17 = vmul.f32 1.442695, %v1262_v14  ;;  %v1234_v18 = vpop.f32.mrf.mxu1 }
 0x2ba   : > { %2847 = vpow2.f32 %v1270_v17  ;;  %v2526_v19 = vpop.f32.mrf.mxu1 }
 0x2bd   : > { %v1243_v20 = vpop.xlane.xlu0 %1242 }
 0x2be   : > { %v1263_v21 = vsub.f32 %v955_v45, %v1243_v20 }
 0x2c0   : > { %v1272_v25 = vmul.f32 1.442695, %v1263_v21 }
 0x2c2   : > { %2849 = vpow2.f32 %v1272_v25 }
 0x2c7   : > { %v2848_v26 = vpop.eup %2847 }
 0x2c8   : > { %v1286_v27 = vsel %vm1237_vm3, %v2848_v26, 0.0 }
 0x2c9   : > { %1287 = vadd.xlane.f32.xlu0 %v1286_v27 }
 0x2cf   : > { %v2850_v28 = vpop.eup %2849 }
 0x2d0   : > { %v1289_v30 = vsel %vm1237_vm3, %v2850_v28, 0.0 }
 0x2d1   : > { %1290 = vadd.xlane.f32.xlu1 %v1289_v30 }
 0x327   : > { %v1246_v31 = vpop.xlane.xlu0 %1245 }
 0x328   : > { %v1264_v33 = vsub.f32 %v1001_v50, %v1246_v31 }
 0x32a   : > { %v1274_v34 = vmul.f32 1.442695, %v1264_v33 }
 0x32c   : > { %2851 = vpow2.f32 %v1274_v34 }
 0x32f   : > { %v1249_v35 = vpop.xlane.xlu1 %1248 }
 0x330   : > { %v1252_v36 = vpop.xlane.xlu0 %1251  ;;  %v1265_v37 = vsub.f32 %v1047_v55, %v1249_v35 }
 0x331   : > { %v1266_v38 = vsub.f32 %v1093_v56, %v1252_v36 }
 0x332   : > { %v1276_v39 = vmul.f32 1.442695, %v1265_v37 }
 0x333   : > { %v1278_v40 = vmul.f32 1.442695, %v1266_v38 }
 0x334   : > { %2853 = vpow2.f32 %v1276_v39 }
 0x335   : > { %2855 = vpow2.f32 %v1278_v40 }
 0x337   : > { %v1255_v52 = vpop.xlane.xlu1 %1254 }
 0x338   : > { %v1258_v42 = vpop.xlane.xlu0 %1257  ;;  %v1267_v58 = vsub.f32 %v3448_v2, %v1255_v52 }
 0x339   : > { %v3459_v41 = vpop.eup %2851  ;;  %v1268_v43 = vsub.f32 %v1185_v3, %v1258_v42 }
 0x33a   : > { %v1292_v44 = vsel %vm1237_vm3, %v3459_v41, 0.0  ;;  %v1280_v61 = vmul.f32 1.442695, %v1267_v58 }
 0x33b   : > { %1293 = vadd.xlane.f32.xlu0 %v1292_v44  ;;  %v1282_v45 = vmul.f32 1.442695, %v1268_v43 }
 0x33d   : > { %2857 = vpow2.f32 %v1282_v45 }
 0x33f   : > { %v1261_v55 = vpop.xlane.xlu1 %1260 }
 0x340   : > { %v1269_v62 = vsub.f32 %v3453_v13, %v1261_v55 }
 0x341   : > { %v2854_v46 = vpop.eup %2853 }
 0x342   : > { %v3463_v47 = vpop.eup %2855  ;;  %v1295_v48 = vsel %vm1237_vm3, %v2854_v46, 0.0  ;;  %v1284_v32 = vmul.f32 1.442695, %v1269_v62 }
 0x343   : > { %v1298_v49 = vsel %vm1237_vm3, %v3463_v47, 0.0  ;;  %1296 = vadd.xlane.f32.xlu1 %v1295_v48 }
 0x344   : > { %1299 = vadd.xlane.f32.xlu0 %v1298_v49 }
 0x34a   : > { %v3468_v50 = vpop.eup %2857 }
 0x34b   : > { %v1304_v51 = vsel %vm1237_vm3, %v3468_v50, 0.0 }
 0x34c   : > { %1305 = vadd.xlane.f32.xlu0 %v1304_v51 }
 0x352   : > { %v1288_v53 = vpop.xlane.xlu0 %1287 }
 0x353   : > { %2859 = vrcp.f32 %v1288_v53 }
 0x354   : > { %2767 = vrot.lane.b32.xlu1 %v2766_v54, %s3108_s18 }
 0x35a   : > { %v1291_v56 = vpop.xlane.xlu1 %1290 }
 0x35b   : > { %2861 = vrcp.f32 %v1291_v56 }
 0x35c   : > { %2863 = vpow2.f32 %v1280_v61 }
 0x35d   : > { %2865 = vpow2.f32 %v1284_v32  ;;  %v2823_v32 = vld [vmem:[#allocation7 + $0x38] sm:$0xff]  }
 0x360   : > { %v2860_v57 = vpop.eup %2859 }
 0x361   : > { %v1318_v59 = vmul.f32 %v2860_v57, %v2848_v26 }
 0x362   : > { %2762 = vrot.lane.b32.xlu0 %v2766_v54, %s3107_s16 }
 0x363   : > { %v1326_v60 = vpack.c.bf16 %v1318_v59, %v1318_v59 }
 0x365   : > { %2530 = vmatmul.mubr.msk.bf16.vlgmr.msra.gmra.mxu0 %vm1237_vm3, %v1326_v60 }
 0x366   : > { %2541 = vmatprep.mubr.msk.bf16.mxu0 %vm3106_vm0, %v3105_v1 }
 0x368   : > { %v2862_v22 = vpop.eup %2861 }
 0x369   : > { %v1319_v63 = vmul.f32 %v2862_v22, %v2850_v28  ;;  %v3484_v2 = vpop.eup %2863 }
 0x36a   : > { %v1301_v3 = vsel %vm1237_vm3, %v3484_v2, 0.0  ;;  %v3488_v4 = vpop.eup %2865 }
 0x36b   : > { %v1327_v0 = vpack.c.bf16 %v1319_v63, %v1319_v63  ;;  %v1307_v5 = vsel %vm1237_vm3, %v3488_v4, 0.0  ;;  %v2824_v63 = vld [vmem:[#allocation7 + $0x30] sm:$0xff]  }
 0x36d   : > { %2536 = vmatmul.mubr.msk.bf16.vlgmr.msra.gmra.mxu1 %vm1237_vm3, %v1327_v0  ;;  %v2825_v0 = vld [vmem:[#allocation7 + $0x28] sm:$0xff]  }
 0x36e   : > { %2547 = vmatprep.mubr.msk.bf16.mxu1 %vm3106_vm0, %v3105_v1 }
 0x378   : > { %1302 = vadd.xlane.f32.xlu1 %v1301_v3 }
 0x37c   : > { %1308 = vadd.xlane.f32.xlu1 %v1307_v5 }
 0x38d   : > { %2772 = vrot.lane.b32.xlu1 %v2766_v54, %s3109_s19 }
 0x3c4   : > { %v1294_v6 = vpop.xlane.xlu0 %1293 }
 0x3c5   : > { %2867 = vrcp.f32 %v1294_v6 }
 0x3cc   : > { %v1297_v7 = vpop.xlane.xlu1 %1296 }
 0x3cd   : > { %2869 = vrcp.f32 %v1297_v7  ;;  %v1300_v8 = vpop.xlane.xlu0 %1299  ;;  %v2826_v7 = vld [vmem:[#allocation7 + $0x20] sm:$0xff]  }
 0x3ce   : > { %2871 = vrcp.f32 %v1300_v8 }
 0x3d0   : > { %v2768_v10 = vpop.permute.xlu1 %2767 }
 0x3d1   : > { %v2770_v14 = vunpack.i.h.bf16 %v2768_v10  ;;  %v2769_v15 = vunpack.i.l.bf16 %v2768_v10 }
 0x3d2   : > { %v2868_v11 = vpop.eup %2867 }
 0x3d3   : > { %v1320_v20 = vmul.f32 %v2868_v11, %v3459_v41  ;;  %v865_v25 = vpack.c.bf16 %v2770_v14, %v2770_v14  ;;  %v864_v26 = vpack.c.bf16 %v2769_v15, %v2769_v15 }
 0x3d5   : > { %v1306_v9 = vpop.xlane.xlu0 %1305  ;;  %v1328_v30 = vpack.c.bf16 %v1320_v20, %v1320_v20  ;;  %v1523_v34 = vsel %vm1337_vm2, %v864_v26, 0  ;;  %v1569_v35 = vsel %vm1337_vm2, %v865_v25, 0  ;;  %v2830_v20 = vld [vmem:[#allocation7] sm:$0xff]  }
 0x3d6   : > { %2873 = vrcp.f32 %v1306_v9 }
 0x3d9   : > { %v2763_v12 = vpop.permute.xlu0 %2762 }
 0x3da   : > { %v2870_v13 = vpop.eup %2869  ;;  %v2765_v16 = vunpack.i.h.bf16 %v2763_v12  ;;  %v2764_v17 = vunpack.i.l.bf16 %v2763_v12  ;;  %v2827_v12 = vld [vmem:[#allocation7 + $0x18] sm:$0xff]  }
 0x3db   : > { %v1321_v21 = vmul.f32 %v2870_v13, %v2854_v46  ;;  %v2872_v33 = vpop.eup %2871 }
 0x3dc   : > { %v863_v18 = vpack.c.bf16 %v2765_v16, %v2765_v16  ;;  %v862_v19 = vpack.c.bf16 %v2764_v17, %v2764_v17  ;;  %v1322_v36 = vmul.f32 %v2872_v33, %v3463_v47  ;;  %v2828_v17 = vld [vmem:[#allocation7 + $0x10] sm:$0xff]  }
 0x3dd   : > { %v1329_v31 = vpack.c.bf16 %v1321_v21, %v1321_v21 }
 0x3de   : > { %v1431_v27 = vsel %vm1337_vm2, %v862_v19, 0  ;;  %v1477_v28 = vsel %vm1337_vm2, %v863_v18, 0  ;;  %v1330_v37 = vpack.c.bf16 %v1322_v36, %v1322_v36  ;;  %v2829_v18 = vld [vmem:[#allocation7 + $0x8] sm:$0xff]  }
 0x3df   : > { %2540 = vmatpush3.bf16.msra.mxu0 %v1431_v27  ;;  %2546 = vmatpush3.bf16.msra.mxu1 %v1477_v28 }
 0x3e0   : > { %2551 = vmatprep.subr.bf16.mxu0 %v3105_v1  ;;  %2557 = vmatprep.subr.bf16.mxu1 %v3105_v1 }
 0x3e2   : > { %2542 = vmatmul.mubr.msk.bf16.vlgmr.msra.gmra.mxu0 %vm1237_vm3, %v1328_v30  ;;  %2548 = vmatmul.mubr.msk.bf16.vlgmr.msra.gmra.mxu1 %vm1237_vm3, %v1329_v31 }
 0x3e3   : > { %2552 = vmatpush3.bf16.msra.mxu0 %v1523_v34  ;;  %2558 = vmatpush3.bf16.msra.mxu1 %v1569_v35  ;;  %v2874_v40 = vpop.eup %2873 }
 0x3e4   : > { %2553 = vmatprep.mubr.msk.bf16.mxu0 %vm3106_vm0, %v3105_v1  ;;  %2563 = vmatprep.subr.bf16.mxu0 %v3105_v1  ;;  %v1324_v45 = vmul.f32 %v2874_v40, %v3468_v50 }
 0x3e5   : > { %2559 = vmatprep.mubr.msk.bf16.mxu1 %vm3106_vm0, %v3105_v1  ;;  %2569 = vmatprep.subr.bf16.mxu1 %v3105_v1 }
 0x3e6   : > { %v1332_v49 = vpack.c.bf16 %v1324_v45, %v1324_v45 }
 0x3ea   : > { %2554 = vmatmul.mubr.msk.bf16.vlgmr.msra.gmra.mxu0 %vm1237_vm3, %v1330_v37 }
 0x3eb   : > { %2565 = vmatprep.mubr.msk.bf16.mxu0 %vm3106_vm0, %v3105_v1 }
 0x401   : > { %v1303_v38 = vpop.xlane.xlu1 %1302 }
 0x402   : > { %2875 = vrcp.f32 %v1303_v38 }
 0x405   : > { %v1309_v39 = vpop.xlane.xlu1 %1308 }
 0x406   : > { %2877 = vrcp.f32 %v1309_v39 }
 0x409   : > { %v2773_v41 = vpop.permute.xlu1 %2772 }
 0x40a   : > { %v2774_v42 = vunpack.i.l.bf16 %v2773_v41  ;;  %v2775_v43 = vunpack.i.h.bf16 %v2773_v41 }
 0x40c   : > { %v866_v44 = vpack.c.bf16 %v2774_v42, %v2774_v42  ;;  %v867_v48 = vpack.c.bf16 %v2775_v43, %v2775_v43 }
 0x40e   : > { %v1615_v46 = vsel %vm1337_vm2, %v866_v44, 0  ;;  %v1661_v50 = vsel %vm1337_vm2, %v867_v48, 0 }
 0x40f   : > { %v2876_v47 = vpop.eup %2875  ;;  %2564 = vmatpush3.bf16.msra.mxu0 %v1615_v46 }
 0x410   : > { %v1323_v51 = vmul.f32 %v2876_v47, %v3484_v2  ;;  %2575 = vmatprep.subr.bf16.mxu0 %v3105_v1 }
 0x412   : > { %2566 = vmatmul.mubr.msk.bf16.vlgmr.msra.gmra.mxu0 %vm1237_vm3, %v1332_v49  ;;  %v1331_v52 = vpack.c.bf16 %v1323_v51, %v1323_v51 }
 0x413   : > { %v2878_v53 = vpop.eup %2877  ;;  %2591 = vmatprep.mubr.msk.bf16.mxu0 %vm3106_vm0, %v3105_v1  ;;  %2576 = vmatpush3.bf16.msra.mxu0 %v2823_v32  ;;  %v2831_v32 = vld [vmem:[#allocation8 + $0x38] sm:$0xff]  }
 0x414   : > { %2560 = vmatmul.mubr.msk.bf16.vlgmr.msra.gmra.mxu1 %vm1237_vm3, %v1331_v52  ;;  %v1325_v54 = vmul.f32 %v2878_v53, %v3488_v4  ;;  %2577 = vmatprep.subr.bf16.mxu0 %v3105_v1 }
 0x415   : > { %2570 = vmatpush3.bf16.msra.mxu1 %v1661_v50  ;;  %2571 = vmatprep.mubr.msk.bf16.mxu1 %vm3106_vm0, %v3105_v1 }
 0x416   : > { %2595 = vmatprep.subr.bf16.mxu1 %v3105_v1  ;;  %v1333_v55 = vpack.c.bf16 %v1325_v54, %v1325_v54 }
 0x417   : > { %2578 = vmatpush3.bf16.msra.mxu0 %v2824_v63  ;;  %v3556_v63 = vand.u32 127, %v557_v29  ;;  %v2832_v29 = vld [vmem:[#allocation8 + $0x30] sm:$0xff]  }
 0x418   : > { %2579 = vmatprep.subr.bf16.mxu0 %v3105_v1 }
 0x419   : > { %vm1862_vm6 = vcmp.lt.s32.totalorder %v3556_v63, 32 }
 0x41b   : > { %2580 = vmatpush3.bf16.msra.mxu0 %v2825_v0 }
 0x41c   : > { %2572 = vmatmul.mubr.msk.bf16.vlgmr.msra.gmra.mxu1 %vm1237_vm3, %v1333_v55  ;;  %2581 = vmatprep.subr.bf16.mxu0 %v3105_v1  ;;  %v2353_v55 = vld [vmem:[%s3653_s4] ss:$0 sm:$0xff] }
 0x41d   : > { %2611 = vmatprep.mubr.msk.bf16.mxu1 %vm3106_vm0, %v3105_v1  ;;  %2596 = vmatpush3.bf16.msra.mxu1 %v2831_v32 }
 0x41e   : > { %2597 = vmatprep.subr.bf16.mxu1 %v3105_v1 }
 0x41f   : > { %2582 = vmatpush3.bf16.msra.mxu0 %v2826_v7 }
 0x420   : > { %2583 = vmatprep.subr.bf16.mxu0 %v3105_v1 }
 0x421   : > { %2598 = vmatpush3.bf16.msra.mxu1 %v2832_v29 }
 0x422   : > { %2599 = vmatprep.subr.bf16.mxu1 %v3105_v1 }
 0x423   : > { %2584 = vmatpush3.bf16.msra.mxu0 %v2827_v12  ;;  %v2836_v12 = vld [vmem:[#allocation8 + $0x10] sm:$0xff]  }
 0x424   : > { %2585 = vmatprep.subr.bf16.mxu0 %v3105_v1 }
 0x425   : > { %v3528_v56 = vpop.f32.mrf.mxu0 }
 0x427   : > { %v2531_v57 = vpop.f32.mrf.mxu0  ;;  %2586 = vmatpush3.bf16.msra.mxu0 %v2828_v17  ;;  %v2841_v17 = vld [vmem:[#allocation10 + $0x28] sm:$0xff]  }
 0x428   : > { %2587 = vmatprep.subr.bf16.mxu0 %v3105_v1 }
 0x429   : > { %v1378_v58 = vpop.f32.mrf.mxu0 }
 0x42b   : > { %v2532_v59 = vpop.f32.mrf.mxu0  ;;  %2588 = vmatpush3.bf16.msra.mxu0 %v2829_v18  ;;  %v2842_v18 = vld [vmem:[#allocation10 + $0x20] sm:$0xff]  }
 0x42c   : > { %2589 = vmatprep.subr.bf16.mxu0 %v3105_v1 }
 0x42d   : > { %v3530_v60 = vpop.f32.mrf.mxu1 }
 0x42f   : > { %v2537_v61 = vpop.f32.mrf.mxu1  ;;  %2590 = vmatpush3.bf16.msra.mxu0 %v2830_v20 }
 0x430   : > { %2615 = vmatprep.subr.bf16.mxu0 %v3105_v1 }
 0x431   : > { %v1424_v62 = vpop.f32.mrf.mxu1 }
 0x433   : > { %v2538_v22 = vpop.f32.mrf.mxu1 }
 0x4a2   : > { %v1467_v2 = vpop.f32.mrf.mxu0  ;;  %v1513_v3 = vpop.f32.mrf.mxu1 }
 0x4a3   : > { %v2776_v4 = vpack.i.bf16 %v1513_v3, %v1467_v2 }
 0x4a4   : > { %v2543_v5 = vpop.f32.mrf.mxu0  ;;  %v2549_v6 = vpop.f32.mrf.mxu1 }
 0x4a5   : > { %2777 = vrot.lane.b32.xlu0 %v2776_v4, %s3109_s19 }
 0x4a6   : > { %v1470_v8 = vpop.f32.mrf.mxu0  ;;  %v1516_v9 = vpop.f32.mrf.mxu1 }
 0x4a7   : > { %v2833_v9 = vld [vmem:[#allocation8 + $0x28] sm:$0xff]  }
 0x4a8   : > { %v2544_v10 = vpop.f32.mrf.mxu0  ;;  %v2550_v11 = vpop.f32.mrf.mxu1  ;;  %2600 = vmatpush3.bf16.msra.mxu1 %v2833_v9 }
 0x4a9   : > { %v2834_v10 = vld [vmem:[#allocation8 + $0x20] sm:$0xff]   ;;  %2601 = vmatprep.subr.bf16.mxu1 %v3105_v1  ;;  %v2835_v11 = vld [vmem:[#allocation8 + $0x18] sm:$0xff]  }
 0x4aa   : > { %v1559_v13 = vpop.f32.mrf.mxu0 }
 0x4ac   : > { %v2555_v14 = vpop.f32.mrf.mxu0  ;;  %2602 = vmatpush3.bf16.msra.mxu1 %v2834_v10 }
 0x4ad   : > { %2603 = vmatprep.subr.bf16.mxu1 %v3105_v1  ;;  %v2838_v14 = vld [vmem:[#allocation8] sm:$0xff]  }
 0x4ae   : > { %v1562_v15 = vpop.f32.mrf.mxu0 }
 0x4af   : > { %v2839_v15 = vld [vmem:[#allocation10 + $0x38] sm:$0xff]  }
 0x4b0   : > { %v2556_v16 = vpop.f32.mrf.mxu0  ;;  %2604 = vmatpush3.bf16.msra.mxu1 %v2835_v11 }
 0x4b1   : > { %2605 = vmatprep.subr.bf16.mxu1 %v3105_v1  ;;  %v2840_v16 = vld [vmem:[#allocation10 + $0x30] sm:$0xff]  }
 0x4b4   : > { %2606 = vmatpush3.bf16.msra.mxu1 %v2836_v12 }
 0x4b5   : > { %2607 = vmatprep.subr.bf16.mxu1 %v3105_v1 }
 0x4d2   : > { %v1651_v19 = vpop.f32.mrf.mxu0 }
 0x4d4   : > { %v1605_v21 = vpop.f32.mrf.mxu1  ;;  %v2567_v25 = vpop.f32.mrf.mxu0 }
 0x4d5   : > { %v2781_v26 = vpack.i.bf16 %v1605_v21, %v1559_v13  ;;  %v2837_v13 = vld [vmem:[#allocation8 + $0x8] sm:$0xff]  }
 0x4d6   : > { %v2561_v27 = vpop.f32.mrf.mxu1  ;;  %v1654_v28 = vpop.f32.mrf.mxu0  ;;  %2608 = vmatpush3.bf16.msra.mxu1 %v2837_v13  ;;  %v2382_v13 = vld [vmem:[%s3656_s7] ss:$0 sm:$0xff] }
 0x4d7   : > { %2782 = vrot.lane.b32.xlu1 %v2781_v26, %s3108_s18  ;;  %2609 = vmatprep.subr.bf16.mxu1 %v3105_v1 }
 0x4d8   : > { %v1608_v30 = vpop.f32.mrf.mxu1  ;;  %v2568_v31 = vpop.f32.mrf.mxu0 }
 0x4da   : > { %v2562_v33 = vpop.f32.mrf.mxu1  ;;  %2610 = vmatpush3.bf16.msra.mxu1 %v2838_v14  ;;  %v2383_v14 = vld [vmem:[%s3657_s8] ss:$0 sm:$0xff] }
 0x4db   : > { %v2362_v33 = vld [vmem:[%s3654_s5] ss:$0 sm:$0xff] }
 0x4dc   : > { %v1697_v34 = vpop.f32.mrf.mxu1 }
 0x4dd   : > { %v2786_v35 = vpack.i.bf16 %v1697_v34, %v1651_v19  ;;  %v2843_v19 = vld [vmem:[#allocation10 + $0x18] sm:$0xff]  }
 0x4de   : > { %v2573_v36 = vpop.f32.mrf.mxu1 }
 0x4df   : > { %2787 = vrot.lane.b32.xlu0 %v2786_v35, %s3107_s16  ;;  %s3025_s16 = scalar_lea.vmem %s3024_s11, 512 }
 0x4e0   : > { %v1700_v37 = vpop.f32.mrf.mxu1  ;;  %p3027_p9 = scmp.lt.s32.totalorder %s3025_s16, %s3019_s14 }
 0x4e1   : > { %v2363_v37 = vld [vmem:[%s3655_s6] ss:$0 sm:$0xff] }
 0x4e2   : > { %v2574_v38 = vpop.f32.mrf.mxu1  ;;  %p3028_p1 = por %p3027_p9, %p3026_p7 }
 0x4e4   : > { %p3029_p10 = pnand %p3028_p1, %p3022_p3 }
 0x517   : > { %v2778_v39 = vpop.permute.xlu0 %2777 }
 0x518   : > { %v2780_v41 = vunpack.i.h.bf16 %v2778_v39  ;;  %v2779_v42 = vunpack.i.l.bf16 %v2778_v39 }
 0x51a   : > { %v1728_v46 = vsel %vm868_vm1, %v3530_v60, %v2780_v41  ;;  %v1727_v47 = vsel %vm868_vm1, %v3528_v56, %v2779_v42  ;;  %v2844_v42 = vld [vmem:[#allocation10 + $0x10] sm:$0xff]  }
 0x549   : > { %v2783_v40 = vpop.permute.xlu1 %2782 }
 0x54a   : > { %v2785_v43 = vunpack.i.h.bf16 %v2783_v40  ;;  %v2784_v44 = vunpack.i.l.bf16 %v2783_v40 }
 0x54c   : > { %v1731_v51 = vsel %vm1729_vm4, %v1728_v46, %v2785_v43  ;;  %v1730_v52 = vsel %vm1729_vm4, %v1727_v47, %v2784_v44  ;;  %v2845_v43 = vld [vmem:[#allocation10 + $0x8] sm:$0xff]   ;;  %v2846_v44 = vld [vmem:[#allocation10] sm:$0xff]  }
 0x551   : > { %v2788_v45 = vpop.permute.xlu0 %2787 }
 0x552   : > { %v2790_v48 = vunpack.i.h.bf16 %v2788_v45  ;;  %v2789_v49 = vunpack.i.l.bf16 %v2788_v45  ;;  %v2364_v45 = vld [vmem:[%s3659_s10] ss:$0 sm:$0xff] }
 0x554   : > { %v1734_v53 = vsel %vm1732_vm5, %v1731_v51, %v2790_v48  ;;  %v1733_v50 = vsel %vm1732_vm5, %v1730_v52, %v2789_v49 }
 0x555   : > { %v1735_v54 = vpack.c.bf16 %v1734_v53, %v1733_v50 }
 0x557   : > { %2592 = vmatmul.mubr.bf16.vlgmr.msra.gmra.mxu0 %v1735_v54 }
 0x558   : > { %2631 = vmatprep.mubr.msk.bf16.mxu0 %vm3106_vm0, %v3105_v1  ;;  %2616 = vmatpush3.bf16.msra.mxu0 %v2839_v15 }
 0x559   : > { %2617 = vmatprep.subr.bf16.mxu0 %v3105_v1 }
 0x55c   : > { %2618 = vmatpush3.bf16.msra.mxu0 %v2840_v16 }
 0x55d   : > { %2619 = vmatprep.subr.bf16.mxu0 %v3105_v1 }
 0x560   : > { %2620 = vmatpush3.bf16.msra.mxu0 %v2841_v17 }
 0x561   : > { %2621 = vmatprep.subr.bf16.mxu0 %v3105_v1 }
 0x564   : > { %2622 = vmatpush3.bf16.msra.mxu0 %v2842_v18 }
 0x565   : > { %2623 = vmatprep.subr.bf16.mxu0 %v3105_v1 }
 0x568   : > { %2624 = vmatpush3.bf16.msra.mxu0 %v2843_v19 }
 0x569   : > { %2625 = vmatprep.subr.bf16.mxu0 %v3105_v1 }
 0x56c   : > { %2626 = vmatpush3.bf16.msra.mxu0 %v2844_v42 }
 0x56d   : > { %2627 = vmatprep.subr.bf16.mxu0 %v3105_v1 }
 0x570   : > { %2628 = vmatpush3.bf16.msra.mxu0 %v2845_v43 }
 0x571   : > { %2629 = vmatprep.subr.bf16.mxu0 %v3105_v1  ;;  %v2373_v1 = vld [vmem:[%s3661_s12] ss:$0 sm:$0xff] }
 0x574   : > { %2630 = vmatpush3.bf16.msra.mxu0 %v2846_v44 }
 0x617   : > { %v1841_v57 = vpop.f32.mrf.mxu0 }
 0x618   : > { %v1842_v58 = vadd.f32 %v2353_v55, %v1841_v57 }
 0x619   : > { %v2593_v59 = vpop.f32.mrf.mxu0 }
 0x61a   : > { %v1848_v56 = vadd.f32 %v1842_v58, %v3351_v23 }
 0x61b   : > { %v1844_v60 = vpop.f32.mrf.mxu0 }
 0x61c   : > { %v1845_v61 = vadd.f32 %v2353_v55, %v1844_v60  ;;  %1852 = vadd.xlane.f32.xlu1 %v1848_v56 }
 0x61d   : > { %v2594_v62 = vpop.f32.mrf.mxu0 }
 0x61e   : > { %v1849_v22 = vadd.f32 %v1845_v61, %v3354_v24 }
 0x620   : > { %1854 = vadd.xlane.f32.xlu0 %v1849_v22 }
 0x6a5   : > { %v1853_v0 = vpop.xlane.xlu1 %1852 }
 0x6a6   : > { %v1856_v2 = vmul.f32 0.03125, %v1853_v0 }
 0x6a8   : > { %v1858_v3 = vsub.f32 %v1848_v56, %v1856_v2 }
 0x6a9   : > { %v1855_v23 = vpop.xlane.xlu0 %1854 }
 0x6aa   : > { %v1857_v4 = vmul.f32 0.03125, %v1855_v23  ;;  %v1865_v5 = vsel %vm1862_vm6, %v1858_v3, 0.0 }
 0x6ab   : > { %v1867_v6 = vmul.f32 %v1865_v5, %v1865_v5 }
 0x6ac   : > { %v1859_v24 = vsub.f32 %v1849_v22, %v1857_v4 }
 0x6ad   : > { %1869 = vadd.xlane.f32.xlu0 %v1867_v6 }
 0x6ae   : > { %v1866_v7 = vsel %vm1862_vm6, %v1859_v24, 0.0 }
 0x6af   : > { %v1868_v8 = vmul.f32 %v1866_v7, %v1866_v7 }
 0x6b1   : > { %1871 = vadd.xlane.f32.xlu1 %v1868_v8 }
 0x736   : > { %v1870_v20 = vpop.xlane.xlu0 %1869 }
 0x737   : > { %v1873_v21 = vmul.f32 0.03125, %v1870_v20 }
 0x739   : > { %v1875_v25 = vadd.f32 1e-05, %v1873_v21 }
 0x73a   : > { %v1872_v26 = vpop.xlane.xlu1 %1871 }
 0x73b   : > { %2879 = vrsqrt.f32 %v1875_v25  ;;  %v1874_v27 = vmul.f32 0.03125, %v1872_v26 }
 0x73d   : > { %v1876_v28 = vadd.f32 1e-05, %v1874_v27 }
 0x73f   : > { %2881 = vrsqrt.f32 %v1876_v28 }
 0x748   : > { %v2880_v30 = vpop.eup %2879 }
 0x749   : > { %v1879_v31 = vmul.f32 %v2880_v30, %v1865_v5 }
 0x74b   : > { %v1887_v36 = vmul.f32 %v2362_v33, %v1879_v31 }
 0x74c   : > { %v2882_v34 = vpop.eup %2881 }
 0x74d   : > { %v1880_v35 = vmul.f32 %v2882_v34, %v1866_v7  ;;  %v1895_v39 = vadd.f32 %v2363_v37, %v1887_v36 }
 0x74f   : > { %v1888_v38 = vmul.f32 %v2362_v33, %v1880_v35 }
 0x751   : > { %v1896_v40 = vadd.f32 %v2363_v37, %v1888_v38 }
 0x753   : > { %v1897_v41 = vpack.c.bf16 %v1896_v40, %v1895_v39 }
 0x755   : > { %2612 = vmatmul.mubr.bf16.vlgmr.msra.gmra.mxu1 %v1897_v41 }
 0x815   : > { %v2003_v46 = vpop.f32.mrf.mxu1 }
 0x816   : > { %v2004_v48 = vadd.f32 %v2364_v45, %v2003_v46 }
 0x817   : > { %v2613_v47 = vpop.f32.mrf.mxu1 }
 0x818   : > { %v2010_v53 = vmax.f32 %v2004_v48, 0.0 }
 0x819   : > { %v2006_v49 = vpop.f32.mrf.mxu1 }
 0x81a   : > { %v2007_v51 = vadd.f32 %v2364_v45, %v2006_v49 }
 0x81b   : > { %v2614_v52 = vpop.f32.mrf.mxu1 }
 0x81c   : > { %v2011_v50 = vmax.f32 %v2007_v51, 0.0 }
 0x81e   : > { %v2012_v54 = vpack.c.bf16 %v2011_v50, %v2010_v53 }
 0x820   : > { %2632 = vmatmul.mubr.bf16.vlgmr.msra.gmra.mxu0 %v2012_v54 }
 0x8e0   : > { %v2118_v55 = vpop.f32.mrf.mxu0 }
 0x8e1   : > { %v2119_v57 = vadd.f32 %v2373_v1, %v2118_v55 }
 0x8e2   : > { %v2633_v58 = vpop.f32.mrf.mxu0 }
 0x8e3   : > { %v2125_v59 = vadd.f32 %v2119_v57, %v1895_v39 }
 0x8e4   : > { %v2121_v56 = vpop.f32.mrf.mxu0 }
 0x8e5   : > { %v2122_v60 = vadd.f32 %v2373_v1, %v2121_v56  ;;  %2129 = vadd.xlane.f32.xlu0 %v2125_v59 }
 0x8e6   : > { %v2634_v61 = vpop.f32.mrf.mxu0 }
 0x8e7   : > { %v2126_v62 = vadd.f32 %v2122_v60, %v1896_v40 }
 0x8e9   : > { %2131 = vadd.xlane.f32.xlu1 %v2126_v62 }
 0x96e   : > { %v2130_v22 = vpop.xlane.xlu0 %2129 }
 0x96f   : > { %v2133_v32 = vmul.f32 0.03125, %v2130_v22 }
 0x971   : > { %v2135_v0 = vsub.f32 %v2125_v59, %v2133_v32 }
 0x972   : > { %v2132_v2 = vpop.xlane.xlu1 %2131 }
 0x973   : > { %v2134_v3 = vmul.f32 0.03125, %v2132_v2  ;;  %v2137_v23 = vsel %vm1862_vm6, %v2135_v0, 0.0 }
 0x974   : > { %v2139_v4 = vmul.f32 %v2137_v23, %v2137_v23 }
 0x975   : > { %v2136_v5 = vsub.f32 %v2126_v62, %v2134_v3 }
 0x976   : > { %2141 = vadd.xlane.f32.xlu0 %v2139_v4 }
 0x977   : > { %v2138_v6 = vsel %vm1862_vm6, %v2136_v5, 0.0 }
 0x978   : > { %v2140_v24 = vmul.f32 %v2138_v6, %v2138_v6 }
 0x97a   : > { %2143 = vadd.xlane.f32.xlu1 %v2140_v24 }
 0x9ff   : > { %v2142_v7 = vpop.xlane.xlu0 %2141 }
 0xa00   : > { %v2145_v8 = vmul.f32 0.03125, %v2142_v7 }
 0xa02   : > { %v2147_v29 = vadd.f32 1e-05, %v2145_v8 }
 0xa03   : > { %v2144_v9 = vpop.xlane.xlu1 %2143 }
 0xa04   : > { %2883 = vrsqrt.f32 %v2147_v29  ;;  %v2146_v10 = vmul.f32 0.03125, %v2144_v9 }
 0xa06   : > { %v2148_v11 = vadd.f32 1e-05, %v2146_v10 }
 0xa08   : > { %2885 = vrsqrt.f32 %v2148_v11 }
 0xa11   : > { %v2884_v12 = vpop.eup %2883 }
 0xa12   : > { %v2151_v63 = vmul.f32 %v2884_v12, %v2137_v23 }
 0xa14   : > { %v2159_v15 = vmul.f32 %v2382_v13, %v2151_v63 }
 0xa15   : > { %v2886_v16 = vpop.eup %2885 }
 0xa16   : > { %v2167_v17 = vadd.f32 %v2383_v14, %v2159_v15  ;;  %v2152_v18 = vmul.f32 %v2886_v16, %v2138_v6 }
 0xa18   : > { %v2160_v19 = vmul.f32 %v2382_v13, %v2152_v18  ;;  %2169 = vst [vmem:[%s516_s21] sm:$0xff] %v2167_v17 }
 0xa1a   : > { %v2168_v20 = vadd.f32 %v2383_v14, %v2160_v19 }
 0xa1c   : > { %2170 = vst [vmem:[%s516_s21 + $0x8] sm:$0xff] %v2168_v20 }
 0xa1d   : > { %3032 = shalt.err (!%p3029_p10)
}
 0xa1e   : > { %s3033_s18 = scalar_lea.hbm %s3604_s17, 256  ;;  %s3037_s23 = scalar_lea.hbm %s3694_s20, 512 }
 0xa1f   : > { %p3034_p13 = scmp.ne.s32.totalorder %s3604_s17, %s3033_s18  ;;  %p3038_p8 = scmp.lt.s32.totalorder %s3604_s17, %s3694_s20 }
 0xa20   : > { %p3039_p5 = scmp.lt.s32.totalorder %s3037_s23, %s3033_s18 }
 0xa21   : > { %p3035_p4 = pnand %p3034_p13, %p3695_p0 }
 0xa22   : > { %p3040_p11 = por %p3039_p5, %p3038_p8 }
 0xa23   : > { %p3036_p6 = pneg %p3035_p4 }
 0xa25   : > { %p3041_p12 = pnand %p3040_p11, %p3036_p6 }
 0xa27   : > { %3044 = shalt.err (!%p3041_p12)
}
 0xa28   : > { %s3111_s22 = smov 128   ;;  %s3112_s14 = smov 8  }
 0xa29   : > { %2653 = dma.vmem_to_hbm [thread:$0]  (%p3695_p0), %s3606_s13, 256, %s3604_s17, %s2172_s1, %s3111_s22, %s3111_s22, %s3112_s14  }
 0xa2a PF: > { %s3696_s29 = sld [smem:[#allocation16_spill]]  ;;  %p3699_p3 = scmp.ge.s32.totalorder %s3091_s28, 2 }
 0xa2b   : > { %s3697_s11 = sld [smem:[#allocation17_spill]] }
 0xa30   : > { %s2200_s16 = sand.u32 1, %s3696_s29  }
 0xa31   : > { %p3698_p2 = scmp.ne.s32.totalorder %s3697_s11, 0  ;;  %s2201_s18 = scalar_lea.sflag [#allocation4], %s2200_s16 }
 0xa33   : > { %p2673_p7 = pnand %p3699_p3, %p3698_p2 }
 0xa35   : > { %p2674_p9 = pneg %p2673_p7 }
 0xa37   : > { %3074 = dma.done.wait (%p2674_p9), %s2201_s18, 256  }
 0xa38   : > { %3076 = vsyncadd (%p2674_p9), %s2201_s18, 4294967040  ;;  %p28_p1 = scmp.ge.s32.totalorder %s3271_s15, 4   ;;  %s3700_s25 = smov %s3083_s26 }
 0xa39   : > { %s3701_s26 = smov %s3087_s27  ;;  %s3702_s27 = smov %s3287_s30 }
 0xa3a   : > { %s3703_s28 = smov %s3271_s15  ;;  %30 = sbr.rel (!%p28_p1) target bundleno = 13 (0xd), region = 133 }
 0xa3f   :  { %2206 = vsyncpa [#allocation3], 1 }
 0xa40   :  { %2208 = vsyncpa [#allocation3 + $0x1], 1 }
 0xa41   :  { %2209 = vsyncpa [#allocation6], 1 }
 0xa42   :  { %2210 = vsyncpa [#allocation9], 1 }
 0xa43   :  { %2211 = vsyncpa [#allocation4], 1 }
 0xa44   :  { %2213 = vsyncpa [#allocation4 + $0x1], 1 }

</bundles_post_ra>
